<compile_context>
chip_gen: v5e
topology: v5e:2x2
jax: 0.10.0
libtpu: 0.0.40
codegen_flags: <defaults>
</compile_context>

<pallas_src>
import numpy as np
import jax
import jax.numpy as jnp
from jax.experimental import pallas as pl
from jax.experimental.pallas import tpu as pltpu

PRIMITIVES = [
    'none',
    'max_pool_3x3',
    'avg_pool_3x3',
    'skip_connect',
    'sep_conv_3x3',
    'sep_conv_5x5',
    'dil_conv_3x3',
    'dil_conv_5x5',
]

BN_EPS = 1e-5
_N_ACC = 4          # partial accumulators in the tap loops


# ----------------------------------------------------------------------------
# Architecture parsing (same rule as the PyTorch module)
# ----------------------------------------------------------------------------

def parse_arch(weight, steps):
    w = np.asarray(weight)
    s_n, e_n = 0, 0
    arch = []
    c_op = len(PRIMITIVES)
    i_none = PRIMITIVES.index('none')
    for i_b in range(steps):
        s_n, e_n = e_n, e_n + i_b + 2
        W = w[s_n:e_n].copy()
        i_ns = sorted(
            range(i_b + 2),
            key=lambda i_n: -max(W[i_n][i_op] for i_op in range(c_op)
                                 if i_op != i_none))[:2]
        for i_n in i_ns:
            i_op_best = None
            for i_op in range(c_op):
                if i_op == i_none:
                    continue
                if i_op_best is None or W[i_n][i_op] > W[i_n][i_op_best]:
                    i_op_best = i_op
            arch.append((PRIMITIVES[i_op_best], i_n))
    return arch


# ----------------------------------------------------------------------------
# Parameter initialization (deterministic, synthetic; eval-mode BN folded)
# ----------------------------------------------------------------------------

def _normal(key, shape, std=0.1):
    return std * jax.random.normal(key, shape, dtype=jnp.float32)


def _bn_fold(key, c):
    # eval-mode BN with running_mean=0, running_var=1 folded to scale/shift.
    k1, k2 = jax.random.split(key)
    gamma = 1.0 + _normal(k1, (c,))
    beta = _normal(k2, (c,))
    scale = gamma / jnp.sqrt(1.0 + BN_EPS)
    shift = beta
    return scale, shift


def _pw_folded(key_w, key_bn, cin, cout):
    """1x1 conv weight (Cout, Cin), f32, with the trailing BN scale folded in."""
    w = _normal(key_w, (cout, cin))
    scale, shift = _bn_fold(key_bn, cout)
    w = w * scale[:, None]
    return w, shift.reshape(cout, 1)


def _init_op(key, name, C):
    """Returns (list of (param, is_bias), meta)."""
    if name in ('skip_connect', 'max_pool_3x3', 'avg_pool_3x3'):
        return [], {'name': name}
    k = int(name[-1])
    if name.startswith('sep_conv'):
        ks = jax.random.split(key, 6)
        dw1 = _normal(ks[0], (C, k * k))
        pw1, b1 = _pw_folded(ks[1], ks[2], C, C)
        dw2 = _normal(ks[3], (C, k * k))
        pw2, b2 = _pw_folded(ks[4], ks[5], C, C)
        return ([(dw1, False), (pw1, False), (b1, True),
                 (dw2, False), (pw2, False), (b2, True)],
                {'name': name, 'k': k, 'dil': 1})
    if name.startswith('dil_conv'):
        ks = jax.random.split(key, 3)
        dw = _normal(ks[0], (C, k * k))
        pw, b = _pw_folded(ks[1], ks[2], C, C)
        return ([(dw, False), (pw, False), (b, True)],
                {'name': name, 'k': k, 'dil': 2})
    raise ValueError(name)


# ----------------------------------------------------------------------------
# Host-side tap tables (boundary masks + avg-pool divisor) for one batch block
# of `n_img` images, flat (C, n_img*H*W) layout with m = n*H*W + i*W + j.
# Pre-broadcast along channels so in-kernel use is a plain vreg op.
# ----------------------------------------------------------------------------

def _build_tap_tables(offsets, n_img, H, W, C):
    ii, jj = np.meshgrid(np.arange(H), np.arange(W), indexing='ij')

    def valid(a, b):
        return ((ii + a >= 0) & (ii + a < H) & (jj + b >= 0) & (jj + b < W))

    m_blk = n_img * H * W
    rows = [np.tile(valid(a, b).astype(np.float32).reshape(-1), n_img)
            for (a, b) in offsets]
    masks = np.stack(rows, axis=0)                               # (n_off, m)
    masks = np.broadcast_to(masks[:, None, :],
                            (len(offsets), C, m_blk)).copy()     # (n_off, C, m)

    cnt = np.zeros((H, W), np.float32)                           # count_include_pad=False
    for a in (-1, 0, 1):
        for b in (-1, 0, 1):
            cnt += valid(a, b)
    inv = np.tile((1.0 / cnt).reshape(-1), n_img)
    inv = np.broadcast_to(inv[None, :], (C, m_blk)).copy()       # (C, m)
    return masks, inv


def _tree_reduce(vals, fn):
    vals = [v for v in vals if v is not None]
    while len(vals) > 1:
        nxt = [fn(vals[i], vals[i + 1]) for i in range(0, len(vals) - 1, 2)]
        if len(vals) % 2:
            nxt.append(vals[-1])
        vals = nxt
    return vals[0]


# ----------------------------------------------------------------------------
# Fused cell kernel (one grid step = one batch block, all nodes in VMEM/vregs)
# ----------------------------------------------------------------------------

def _make_cell_kernel(*, pre_idx, ops, off_row, n_params, steps,
                      multiplier, C, W, block_m):
    pre_w_idx, pre_b_idx = pre_idx

    def kernel(*refs):
        s0_ref, s1_ref, masks_ref, invc_ref = refs[:4]
        prm = refs[4:4 + n_params]
        out_ref = refs[4 + n_params]

        def mask_cm(a, b):
            return masks_ref[off_row[(a, b)]]              # (C, block_m) {0,1}

        def rolled(x, a, b):
            # result[m] = x[(m + a*W + b) mod block_m]; any wrapped /
            # cross-image / out-of-image lane is zeroed (or -inf'd) by the
            # boundary mask, so this is bit-identical to zero-padded taps.
            d = a * W + b
            if d == 0:
                return x
            return pltpu.roll(x, shift=(-d) % block_m, axis=1)

        def pw_conv(x, i_w, i_b):
            # 1x1 conv (+ folded BN): f32 MXU matmul; bias pre-broadcast.
            y = jnp.dot(prm[i_w][...], x, preferred_element_type=jnp.float32)
            return y + prm[i_b][...]

        def dw_conv(xr, i_w, k, dil):
            # xr already ReLU'd. Depthwise KxK, stride 1, dilation `dil`,
            # via rolled taps + boundary masks, multi-accumulator reduction.
            w_full = prm[i_w][...]                         # (C, k*k), one load
            pd = dil * (k - 1) // 2
            parts = [None] * _N_ACC
            t = 0
            for di in range(k):
                for dj in range(k):
                    a, b = di * dil - pd, dj * dil - pd
                    v = rolled(xr, a, b)
                    if (a, b) != (0, 0):
                        v = v * mask_cm(a, b)
                    v = v * w_full[:, di * k + dj:di * k + dj + 1]
                    s = t % _N_ACC
                    parts[s] = v if parts[s] is None else parts[s] + v
                    t += 1
            return _tree_reduce(parts, lambda p, q: p + q)

        def max_pool3(x):
            parts = [None] * _N_ACC
            t = 0
            for a in (-1, 0, 1):
                for b in (-1, 0, 1):
                    v = rolled(x, a, b)
                    if (a, b) != (0, 0):
                        v = jnp.where(mask_cm(a, b) > 0.5, v, -jnp.inf)
                    s = t % _N_ACC
                    parts[s] = v if parts[s] is None else jnp.maximum(parts[s], v)
                    t += 1
            return _tree_reduce(parts, jnp.maximum)        # center tap always valid

        def avg_pool3(x):
            parts = [None] * _N_ACC
            t = 0
            for a in (-1, 0, 1):
                for b in (-1, 0, 1):
                    v = rolled(x, a, b)
                    if (a, b) != (0, 0):
                        v = v * mask_cm(a, b)
                    s = t % _N_ACC
                    parts[s] = v if parts[s] is None else parts[s] + v
                    t += 1
            return _tree_reduce(parts, lambda p, q: p + q) * invc_ref[...]

        relu_cache = {}                                    # node idx -> relu(node)

        def relu_of(src, x):
            if src not in relu_cache:
                relu_cache[src] = jnp.maximum(x, 0.0)
            return relu_cache[src]

        def apply_op(meta, src, x):
            name = meta['name']
            if name == 'skip_connect':
                return x
            if name == 'max_pool_3x3':
                return max_pool3(x)
            if name == 'avg_pool_3x3':
                return avg_pool3(x)
            k, dil, p = meta['k'], meta['dil'], meta['pidx']
            xr = relu_of(src, x)
            if name.startswith('sep_conv'):
                t1 = dw_conv(xr, p[0], k, 1)
                t1 = pw_conv(t1, p[1], p[2])
                t1 = dw_conv(jnp.maximum(t1, 0.0), p[3], k, 1)
                return pw_conv(t1, p[4], p[5])
            t1 = dw_conv(xr, p[0], k, dil)                 # dil_conv
            return pw_conv(t1, p[1], p[2])

        # Preprocess: both ReLUConvBN 1x1 convs fused into ONE block-diagonal
        # MXU matmul (doubles K and the output-row count of the dot).
        x_cat = jnp.concatenate(
            [jnp.maximum(s0_ref[...], 0.0), jnp.maximum(s1_ref[...], 0.0)],
            axis=0)
        y = jnp.dot(prm[pre_w_idx][...], x_cat,
                    preferred_element_type=jnp.float32) + prm[pre_b_idx][...]
        stats = [y[:C, :], y[C:2 * C, :]]

        # Walk the DAG entirely in VMEM / vregs.
        for i_b in range(steps):
            op_a, op_b = ops[2 * i_b], ops[2 * i_b + 1]
            va = apply_op(op_a, op_a['src'], stats[op_a['src']])
            vb = apply_op(op_b, op_b['src'], stats[op_b['src']])
            stats.append(va + vb)                          # eval: drop_path inactive

        # Channel concat == write each node into its row block of the output.
        for i, t in enumerate(stats[-multiplier:]):
            out_ref[i * C:(i + 1) * C, :] = t

    return kernel


# ----------------------------------------------------------------------------
# Cell wrapper
# ----------------------------------------------------------------------------

class PallasCell:
    def __init__(self, steps, multiplier, C_prev_prev, C_prev, C,
                 reduction, reduction_prev, weight, key):
        assert not reduction and not reduction_prev, \
            "only normal cells supported (see TODO at top)"
        self.steps = steps
        self.multiplier = multiplier
        self.C = C
        self.arch = parse_arch(weight, steps)

        keys = jax.random.split(key, 2 + len(self.arch))
        self.params = []                      # flat list of kernel params
        self._bias_idx = set()                # indices pre-broadcast at forward

        w0, b0 = _pw_folded(*jax.random.split(keys[0]), C_prev_prev, C)
        w1, b1 = _pw_folded(*jax.random.split(keys[1]), C_prev, C)
        # Block-diagonalize the two preprocess 1x1 convs into one matmul.
        w_pre = jnp.zeros((2 * C, C_prev_prev + C_prev), jnp.float32)
        w_pre = w_pre.at[:C, :C_prev_prev].set(w0)
        w_pre = w_pre.at[C:, C_prev_prev:].set(w1)
        b_pre = jnp.concatenate([b0, b1], axis=0)          # (2C, 1)
        self.pre_idx = (self._add(w_pre), self._add(b_pre, is_bias=True))

        self.ops = []
        for i, (name, src) in enumerate(self.arch):
            plist, meta = _init_op(keys[2 + i], name, C)
            meta['src'] = src
            meta['pidx'] = [self._add(p, is_bias) for p, is_bias in plist]
            self.ops.append(meta)

        # Distinct spatial tap offsets (a, b) needed by this arch.
        off = []

        def _add_off(a, b):
            if (a, b) not in off:
                off.append((a, b))

        for meta in self.ops:
            nm = meta['name']
            if nm in ('max_pool_3x3', 'avg_pool_3x3'):
                for a in (-1, 0, 1):
                    for b in (-1, 0, 1):
                        _add_off(a, b)
            elif nm.startswith(('sep_conv', 'dil_conv')):
                k, dil = meta['k'], meta['dil']
                pd = dil * (k - 1) // 2
                for di in range(k):
                    for dj in range(k):
                        _add_off(di * dil - pd, dj * dil - pd)
        if not off:
            off.append((0, 0))
        self.tap_offsets = off
        self.off_row = {o: r for r, o in enumerate(off)}

        self._fwd = jax.jit(self._forward)

    def _add(self, arr, is_bias=False):
        self.params.append(arr)
        if is_bias:
            self._bias_idx.add(len(self.params) - 1)
        return len(self.params) - 1

    def _forward(self, s0_nchw, s1_nchw):
        N, C_pp, H, W = s0_nchw.shape
        C_p = s1_nchw.shape[1]
        M = N * H * W
        C, mult = self.C, self.multiplier

        # Grid over batch blocks; pick the smallest block with a lane-dense
        # (multiple-of-128) width, falling back to the whole batch.
        block_n = N
        for bn in range(1, N + 1):
            if N % bn == 0 and (bn * H * W) % 128 == 0:
                block_n = bn
                break
        block_m = block_n * H * W
        grid = (N // block_n,)

        # NCHW (PyTorch) -> channel-major flat (C, N*H*W): lane-dense layout.
        s0 = jnp.transpose(s0_nchw, (1, 0, 2, 3)).reshape(C_pp, M)
        s1 = jnp.transpose(s1_nchw, (1, 0, 2, 3)).reshape(C_p, M)

        masks_np, inv_cnt_np = _build_tap_tables(
            self.tap_offsets, block_n, H, W, C)
        masks = jnp.asarray(masks_np)                      # (n_off, C, block_m)
        inv_cnt = jnp.asarray(inv_cnt_np)                  # (C, block_m)

        # Pre-broadcast per-channel shifts to full lane width (resident across
        # the grid) so the in-kernel bias add needs no runtime broadcast.
        run_params = [jnp.broadcast_to(p, (p.shape[0], block_m))
                      if i in self._bias_idx else p
                      for i, p in enumerate(self.params)]

        kernel = _make_cell_kernel(
            pre_idx=self.pre_idx, ops=self.ops, off_row=self.off_row,
            n_params=len(run_params), steps=self.steps, multiplier=mult,
            C=C, W=W, block_m=block_m)

        inputs = [s0, s1, masks, inv_cnt] + run_params
        in_specs = [pl.BlockSpec((C_pp, block_m), lambda i: (0, i)),
                    pl.BlockSpec((C_p, block_m), lambda i: (0, i)),
                    pl.BlockSpec(masks.shape, lambda i: (0, 0, 0)),
                    pl.BlockSpec(inv_cnt.shape, lambda i: (0, 0))]
        for p in run_params:
            in_specs.append(
                pl.BlockSpec(p.shape, lambda i, nd=p.ndim: (0,) * nd))

        out2d = pl.pallas_call(
            kernel,
            out_shape=jax.ShapeDtypeStruct((mult * C, M), jnp.float32),
            grid=grid,
            in_specs=in_specs,
            out_specs=pl.BlockSpec((mult * C, block_m), lambda i: (0, i)),
            compiler_params=pltpu.CompilerParams(
                dimension_semantics=("parallel",),
                vmem_limit_bytes=32 * 1024 * 1024),
        )(*inputs)

        out = out2d.reshape(mult * C, N, H, W)
        return jnp.transpose(out, (1, 0, 2, 3))            # back to NCHW

    def __call__(self, s0_nchw, s1_nchw, drop_prob=0.0):
        # TODO(synk): drop_path ignored (eval-mode forward).
        return self._fwd(s0_nchw, s1_nchw)


# ----------------------------------------------------------------------------
# Demo
# ----------------------------------------------------------------------------

if __name__ == "__main__":
    key = jax.random.PRNGKey(0)
    k_w, k_p, k_s0, k_s1 = jax.random.split(key, 4)

    steps, multiplier = 4, 4
    C_prev_prev, C_prev, C = 8, 8, 8
    N, H, W = 4, 8, 8                       # -> grid of 2 batch blocks (128 lanes each)

    n_edges = sum(i + 2 for i in range(steps))              # 14
    weight = np.asarray(
        jax.random.uniform(k_w, (n_edges, len(PRIMITIVES)), dtype=jnp.float32))

    cell = PallasCell(steps, multiplier, C_prev_prev, C_prev, C,
                      reduction=False, reduction_prev=False,
                      weight=weight, key=k_p)

    s0 = jax.random.normal(k_s0, (N, C_prev_prev, H, W), dtype=jnp.float32)
    s1 = jax.random.normal(k_s1, (N, C_prev, H, W), dtype=jnp.float32)

    out = jax.block_until_ready(cell(s0, s1, drop_prob=0.0))
    assert out.shape == (N, multiplier * C, H, W), out.shape
    assert bool(jnp.all(jnp.isfinite(out)))
    print("KERNEL_OK")
</pallas_src>

<mosaic_0001>
module attributes {stable_mosaic.version = 11 : i64} {
  func.func @kernel(%arg0: i32, %arg1: memref<8x128xf32, #tpu.memory_space<vmem>>, %arg2: memref<8x128xf32, #tpu.memory_space<vmem>>, %arg3: memref<33x8x128xf32, #tpu.memory_space<vmem>>, %arg4: memref<8x128xf32, #tpu.memory_space<vmem>>, %arg5: memref<16x16xf32, #tpu.memory_space<vmem>>, %arg6: memref<16x128xf32, #tpu.memory_space<vmem>>, %arg7: memref<8x9xf32, #tpu.memory_space<vmem>>, %arg8: memref<8x8xf32, #tpu.memory_space<vmem>>, %arg9: memref<8x128xf32, #tpu.memory_space<vmem>>, %arg10: memref<8x9xf32, #tpu.memory_space<vmem>>, %arg11: memref<8x8xf32, #tpu.memory_space<vmem>>, %arg12: memref<8x128xf32, #tpu.memory_space<vmem>>, %arg13: memref<8x9xf32, #tpu.memory_space<vmem>>, %arg14: memref<8x8xf32, #tpu.memory_space<vmem>>, %arg15: memref<8x128xf32, #tpu.memory_space<vmem>>, %arg16: memref<8x25xf32, #tpu.memory_space<vmem>>, %arg17: memref<8x8xf32, #tpu.memory_space<vmem>>, %arg18: memref<8x128xf32, #tpu.memory_space<vmem>>, %arg19: memref<8x25xf32, #tpu.memory_space<vmem>>, %arg20: memref<8x8xf32, #tpu.memory_space<vmem>>, %arg21: memref<8x128xf32, #tpu.memory_space<vmem>>, %arg22: memref<32x128xf32, #tpu.memory_space<vmem>>) attributes {dimension_semantics = [#tpu.dimension_semantics<parallel>], iteration_bounds = array<i64: 2>, scalar_prefetch = 0 : i64, scratch_operands = 0 : i64, tpu.core_type = #tpu.core_type<tc>, window_params = [{transform_indices = @transform_0, window_bounds = array<i64: 8, 128>}, {transform_indices = @transform_1, window_bounds = array<i64: 8, 128>}, {pipeline_mode = #tpu.pipeline_mode<synchronous>, transform_indices = @transform_2, window_bounds = array<i64: 33, 8, 128>}, {pipeline_mode = #tpu.pipeline_mode<synchronous>, transform_indices = @transform_3, window_bounds = array<i64: 8, 128>}, {pipeline_mode = #tpu.pipeline_mode<synchronous>, transform_indices = @transform_4, window_bounds = array<i64: 16, 16>}, {pipeline_mode = #tpu.pipeline_mode<synchronous>, transform_indices = @transform_5, window_bounds = array<i64: 16, 128>}, {pipeline_mode = #tpu.pipeline_mode<synchronous>, transform_indices = @transform_6, window_bounds = array<i64: 8, 9>}, {pipeline_mode = #tpu.pipeline_mode<synchronous>, transform_indices = @transform_7, window_bounds = array<i64: 8, 8>}, {pipeline_mode = #tpu.pipeline_mode<synchronous>, transform_indices = @transform_8, window_bounds = array<i64: 8, 128>}, {pipeline_mode = #tpu.pipeline_mode<synchronous>, transform_indices = @transform_9, window_bounds = array<i64: 8, 9>}, {pipeline_mode = #tpu.pipeline_mode<synchronous>, transform_indices = @transform_10, window_bounds = array<i64: 8, 8>}, {pipeline_mode = #tpu.pipeline_mode<synchronous>, transform_indices = @transform_11, window_bounds = array<i64: 8, 128>}, {pipeline_mode = #tpu.pipeline_mode<synchronous>, transform_indices = @transform_12, window_bounds = array<i64: 8, 9>}, {pipeline_mode = #tpu.pipeline_mode<synchronous>, transform_indices = @transform_13, window_bounds = array<i64: 8, 8>}, {pipeline_mode = #tpu.pipeline_mode<synchronous>, transform_indices = @transform_14, window_bounds = array<i64: 8, 128>}, {pipeline_mode = #tpu.pipeline_mode<synchronous>, transform_indices = @transform_15, window_bounds = array<i64: 8, 25>}, {pipeline_mode = #tpu.pipeline_mode<synchronous>, transform_indices = @transform_16, window_bounds = array<i64: 8, 8>}, {pipeline_mode = #tpu.pipeline_mode<synchronous>, transform_indices = @transform_17, window_bounds = array<i64: 8, 128>}, {pipeline_mode = #tpu.pipeline_mode<synchronous>, transform_indices = @transform_18, window_bounds = array<i64: 8, 25>}, {pipeline_mode = #tpu.pipeline_mode<synchronous>, transform_indices = @transform_19, window_bounds = array<i64: 8, 8>}, {pipeline_mode = #tpu.pipeline_mode<synchronous>, transform_indices = @transform_20, window_bounds = array<i64: 8, 128>}, {transform_indices = @transform_21, window_bounds = array<i64: 32, 128>}]} {
    %c0 = arith.constant 0 : index
    %c0_0 = arith.constant 0 : index
    %0 = vector.load %arg1[%c0, %c0_0] : memref<8x128xf32, #tpu.memory_space<vmem>>, vector<8x128xf32>
    %cst = arith.constant 0.000000e+00 : f32
    %1 = vector.broadcast %cst : f32 to vector<8x128xf32>
    %2 = arith.maximumf %0, %1 : vector<8x128xf32>
    %c0_1 = arith.constant 0 : index
    %c0_2 = arith.constant 0 : index
    %3 = vector.load %arg2[%c0_1, %c0_2] : memref<8x128xf32, #tpu.memory_space<vmem>>, vector<8x128xf32>
    %cst_3 = arith.constant 0.000000e+00 : f32
    %4 = vector.broadcast %cst_3 : f32 to vector<8x128xf32>
    %5 = arith.maximumf %3, %4 : vector<8x128xf32>
    %6 = tpu.concatenate %2, %5 in 0 : vector<8x128xf32>, vector<8x128xf32> -> vector<16x128xf32>
    %c0_4 = arith.constant 0 : index
    %c0_5 = arith.constant 0 : index
    %7 = vector.load %arg5[%c0_4, %c0_5] : memref<16x16xf32, #tpu.memory_space<vmem>>, vector<16x16xf32>
    %cst_6 = arith.constant dense<0.000000e+00> : vector<16x128xf32>
    %8 = tpu.matmul %7, %6, %cst_6 {dimension_numbers = #tpu.dot_dimension_numbers<[1], [0], [0], [1], [0, 0, 1, 1], [], []>} : vector<16x16xf32>, vector<16x128xf32>, vector<16x128xf32> -> vector<16x128xf32>
    %c0_7 = arith.constant 0 : index
    %c0_8 = arith.constant 0 : index
    %9 = vector.load %arg6[%c0_7, %c0_8] : memref<16x128xf32, #tpu.memory_space<vmem>>, vector<16x128xf32>
    %10 = arith.addf %8, %9 : vector<16x128xf32>
    %11 = vector.extract_strided_slice %10 {offsets = [0, 0], sizes = [8, 128], strides = [1, 1]} : vector<16x128xf32> to vector<8x128xf32>
    %12 = vector.extract_strided_slice %10 {offsets = [8, 0], sizes = [8, 128], strides = [1, 1]} : vector<16x128xf32> to vector<8x128xf32>
    %cst_9 = arith.constant 0.000000e+00 : f32
    %13 = vector.broadcast %cst_9 : f32 to vector<8x128xf32>
    %14 = arith.maximumf %12, %13 : vector<8x128xf32>
    %c0_10 = arith.constant 0 : index
    %c0_11 = arith.constant 0 : index
    %15 = vector.load %arg7[%c0_10, %c0_11] : memref<8x9xf32, #tpu.memory_space<vmem>>, vector<8x9xf32>
    %c18_i32 = arith.constant 18 : i32
    %16 = tpu.dynamic_rotate %14 by %c18_i32 dim 1 : vector<8x128xf32>, i32 -> vector<8x128xf32>
    %c0_12 = arith.constant 0 : index
    %c0_13 = arith.constant 0 : index
    %c0_14 = arith.constant 0 : index
    %17 = vector.load %arg3[%c0_12, %c0_13, %c0_14] : memref<33x8x128xf32, #tpu.memory_space<vmem>>, vector<1x8x128xf32>
    %18 = vector.shape_cast %17 : vector<1x8x128xf32> to vector<8x128xf32>
    %19 = arith.mulf %16, %18 : vector<8x128xf32>
    %20 = vector.extract_strided_slice %15 {offsets = [0, 0], sizes = [8, 1], strides = [1, 1]} : vector<8x9xf32> to vector<8x1xf32>
    %21 = vector.broadcast %20 : vector<8x1xf32> to vector<8x128xf32>
    %22 = arith.mulf %19, %21 : vector<8x128xf32>
    %c16_i32 = arith.constant 16 : i32
    %23 = tpu.dynamic_rotate %14 by %c16_i32 dim 1 : vector<8x128xf32>, i32 -> vector<8x128xf32>
    %c1 = arith.constant 1 : index
    %c0_15 = arith.constant 0 : index
    %c0_16 = arith.constant 0 : index
    %24 = vector.load %arg3[%c1, %c0_15, %c0_16] : memref<33x8x128xf32, #tpu.memory_space<vmem>>, vector<1x8x128xf32>
    %25 = vector.shape_cast %24 : vector<1x8x128xf32> to vector<8x128xf32>
    %26 = arith.mulf %23, %25 : vector<8x128xf32>
    %27 = vector.extract_strided_slice %15 {offsets = [0, 1], sizes = [8, 1], strides = [1, 1]} : vector<8x9xf32> to vector<8x1xf32>
    %28 = vector.broadcast %27 : vector<8x1xf32> to vector<8x128xf32>
    %29 = arith.mulf %26, %28 : vector<8x128xf32>
    %c14_i32 = arith.constant 14 : i32
    %30 = tpu.dynamic_rotate %14 by %c14_i32 dim 1 : vector<8x128xf32>, i32 -> vector<8x128xf32>
    %c2 = arith.constant 2 : index
    %c0_17 = arith.constant 0 : index
    %c0_18 = arith.constant 0 : index
    %31 = vector.load %arg3[%c2, %c0_17, %c0_18] : memref<33x8x128xf32, #tpu.memory_space<vmem>>, vector<1x8x128xf32>
    %32 = vector.shape_cast %31 : vector<1x8x128xf32> to vector<8x128xf32>
    %33 = arith.mulf %30, %32 : vector<8x128xf32>
    %34 = vector.extract_strided_slice %15 {offsets = [0, 2], sizes = [8, 1], strides = [1, 1]} : vector<8x9xf32> to vector<8x1xf32>
    %35 = vector.broadcast %34 : vector<8x1xf32> to vector<8x128xf32>
    %36 = arith.mulf %33, %35 : vector<8x128xf32>
    %c2_i32 = arith.constant 2 : i32
    %37 = tpu.dynamic_rotate %14 by %c2_i32 dim 1 : vector<8x128xf32>, i32 -> vector<8x128xf32>
    %c3 = arith.constant 3 : index
    %c0_19 = arith.constant 0 : index
    %c0_20 = arith.constant 0 : index
    %38 = vector.load %arg3[%c3, %c0_19, %c0_20] : memref<33x8x128xf32, #tpu.memory_space<vmem>>, vector<1x8x128xf32>
    %39 = vector.shape_cast %38 : vector<1x8x128xf32> to vector<8x128xf32>
    %40 = arith.mulf %37, %39 : vector<8x128xf32>
    %41 = vector.extract_strided_slice %15 {offsets = [0, 3], sizes = [8, 1], strides = [1, 1]} : vector<8x9xf32> to vector<8x1xf32>
    %42 = vector.broadcast %41 : vector<8x1xf32> to vector<8x128xf32>
    %43 = arith.mulf %40, %42 : vector<8x128xf32>
    %44 = vector.extract_strided_slice %15 {offsets = [0, 4], sizes = [8, 1], strides = [1, 1]} : vector<8x9xf32> to vector<8x1xf32>
    %45 = vector.broadcast %44 : vector<8x1xf32> to vector<8x128xf32>
    %46 = arith.mulf %14, %45 : vector<8x128xf32>
    %47 = arith.addf %22, %46 : vector<8x128xf32>
    %c126_i32 = arith.constant 126 : i32
    %48 = tpu.dynamic_rotate %14 by %c126_i32 dim 1 : vector<8x128xf32>, i32 -> vector<8x128xf32>
    %c5 = arith.constant 5 : index
    %c0_21 = arith.constant 0 : index
    %c0_22 = arith.constant 0 : index
    %49 = vector.load %arg3[%c5, %c0_21, %c0_22] : memref<33x8x128xf32, #tpu.memory_space<vmem>>, vector<1x8x128xf32>
    %50 = vector.shape_cast %49 : vector<1x8x128xf32> to vector<8x128xf32>
    %51 = arith.mulf %48, %50 : vector<8x128xf32>
    %52 = vector.extract_strided_slice %15 {offsets = [0, 5], sizes = [8, 1], strides = [1, 1]} : vector<8x9xf32> to vector<8x1xf32>
    %53 = vector.broadcast %52 : vector<8x1xf32> to vector<8x128xf32>
    %54 = arith.mulf %51, %53 : vector<8x128xf32>
    %55 = arith.addf %29, %54 : vector<8x128xf32>
    %c114_i32 = arith.constant 114 : i32
    %56 = tpu.dynamic_rotate %14 by %c114_i32 dim 1 : vector<8x128xf32>, i32 -> vector<8x128xf32>
    %c6 = arith.constant 6 : index
    %c0_23 = arith.constant 0 : index
    %c0_24 = arith.constant 0 : index
    %57 = vector.load %arg3[%c6, %c0_23, %c0_24] : memref<33x8x128xf32, #tpu.memory_space<vmem>>, vector<1x8x128xf32>
    %58 = vector.shape_cast %57 : vector<1x8x128xf32> to vector<8x128xf32>
    %59 = arith.mulf %56, %58 : vector<8x128xf32>
    %60 = vector.extract_strided_slice %15 {offsets = [0, 6], sizes = [8, 1], strides = [1, 1]} : vector<8x9xf32> to vector<8x1xf32>
    %61 = vector.broadcast %60 : vector<8x1xf32> to vector<8x128xf32>
    %62 = arith.mulf %59, %61 : vector<8x128xf32>
    %63 = arith.addf %36, %62 : vector<8x128xf32>
    %c112_i32 = arith.constant 112 : i32
    %64 = tpu.dynamic_rotate %14 by %c112_i32 dim 1 : vector<8x128xf32>, i32 -> vector<8x128xf32>
    %c7 = arith.constant 7 : index
    %c0_25 = arith.constant 0 : index
    %c0_26 = arith.constant 0 : index
    %65 = vector.load %arg3[%c7, %c0_25, %c0_26] : memref<33x8x128xf32, #tpu.memory_space<vmem>>, vector<1x8x128xf32>
    %66 = vector.shape_cast %65 : vector<1x8x128xf32> to vector<8x128xf32>
    %67 = arith.mulf %64, %66 : vector<8x128xf32>
    %68 = vector.extract_strided_slice %15 {offsets = [0, 7], sizes = [8, 1], strides = [1, 1]} : vector<8x9xf32> to vector<8x1xf32>
    %69 = vector.broadcast %68 : vector<8x1xf32> to vector<8x128xf32>
    %70 = arith.mulf %67, %69 : vector<8x128xf32>
    %71 = arith.addf %43, %70 : vector<8x128xf32>
    %c110_i32 = arith.constant 110 : i32
    %72 = tpu.dynamic_rotate %14 by %c110_i32 dim 1 : vector<8x128xf32>, i32 -> vector<8x128xf32>
    %c8 = arith.constant 8 : index
    %c0_27 = arith.constant 0 : index
    %c0_28 = arith.constant 0 : index
    %73 = vector.load %arg3[%c8, %c0_27, %c0_28] : memref<33x8x128xf32, #tpu.memory_space<vmem>>, vector<1x8x128xf32>
    %74 = vector.shape_cast %73 : vector<1x8x128xf32> to vector<8x128xf32>
    %75 = arith.mulf %72, %74 : vector<8x128xf32>
    %76 = vector.extract_strided_slice %15 {offsets = [0, 8], sizes = [8, 1], strides = [1, 1]} : vector<8x9xf32> to vector<8x1xf32>
    %77 = vector.broadcast %76 : vector<8x1xf32> to vector<8x128xf32>
    %78 = arith.mulf %75, %77 : vector<8x128xf32>
    %79 = arith.addf %47, %78 : vector<8x128xf32>
    %80 = arith.addf %79, %55 : vector<8x128xf32>
    %81 = arith.addf %63, %71 : vector<8x128xf32>
    %82 = arith.addf %80, %81 : vector<8x128xf32>
    %c0_29 = arith.constant 0 : index
    %c0_30 = arith.constant 0 : index
    %83 = vector.load %arg8[%c0_29, %c0_30] : memref<8x8xf32, #tpu.memory_space<vmem>>, vector<8x8xf32>
    %cst_31 = arith.constant dense<0.000000e+00> : vector<8x128xf32>
    %84 = tpu.matmul %83, %82, %cst_31 {dimension_numbers = #tpu.dot_dimension_numbers<[1], [0], [0], [1], [0, 0, 1, 1], [], []>} : vector<8x8xf32>, vector<8x128xf32>, vector<8x128xf32> -> vector<8x128xf32>
    %c0_32 = arith.constant 0 : index
    %c0_33 = arith.constant 0 : index
    %85 = vector.load %arg9[%c0_32, %c0_33] : memref<8x128xf32, #tpu.memory_space<vmem>>, vector<8x128xf32>
    %86 = arith.addf %84, %85 : vector<8x128xf32>
    %cst_34 = arith.constant 0.000000e+00 : f32
    %87 = vector.broadcast %cst_34 : f32 to vector<8x128xf32>
    %88 = arith.maximumf %11, %87 : vector<8x128xf32>
    %c0_35 = arith.constant 0 : index
    %c0_36 = arith.constant 0 : index
    %89 = vector.load %arg10[%c0_35, %c0_36] : memref<8x9xf32, #tpu.memory_space<vmem>>, vector<8x9xf32>
    %c18_i32_37 = arith.constant 18 : i32
    %90 = tpu.dynamic_rotate %88 by %c18_i32_37 dim 1 : vector<8x128xf32>, i32 -> vector<8x128xf32>
    %c0_38 = arith.constant 0 : index
    %c0_39 = arith.constant 0 : index
    %c0_40 = arith.constant 0 : index
    %91 = vector.load %arg3[%c0_38, %c0_39, %c0_40] : memref<33x8x128xf32, #tpu.memory_space<vmem>>, vector<1x8x128xf32>
    %92 = vector.shape_cast %91 : vector<1x8x128xf32> to vector<8x128xf32>
    %93 = arith.mulf %90, %92 : vector<8x128xf32>
    %94 = vector.extract_strided_slice %89 {offsets = [0, 0], sizes = [8, 1], strides = [1, 1]} : vector<8x9xf32> to vector<8x1xf32>
    %95 = vector.broadcast %94 : vector<8x1xf32> to vector<8x128xf32>
    %96 = arith.mulf %93, %95 : vector<8x128xf32>
    %c16_i32_41 = arith.constant 16 : i32
    %97 = tpu.dynamic_rotate %88 by %c16_i32_41 dim 1 : vector<8x128xf32>, i32 -> vector<8x128xf32>
    %c1_42 = arith.constant 1 : index
    %c0_43 = arith.constant 0 : index
    %c0_44 = arith.constant 0 : index
    %98 = vector.load %arg3[%c1_42, %c0_43, %c0_44] : memref<33x8x128xf32, #tpu.memory_space<vmem>>, vector<1x8x128xf32>
    %99 = vector.shape_cast %98 : vector<1x8x128xf32> to vector<8x128xf32>
    %100 = arith.mulf %97, %99 : vector<8x128xf32>
    %101 = vector.extract_strided_slice %89 {offsets = [0, 1], sizes = [8, 1], strides = [1, 1]} : vector<8x9xf32> to vector<8x1xf32>
    %102 = vector.broadcast %101 : vector<8x1xf32> to vector<8x128xf32>
    %103 = arith.mulf %100, %102 : vector<8x128xf32>
    %c14_i32_45 = arith.constant 14 : i32
    %104 = tpu.dynamic_rotate %88 by %c14_i32_45 dim 1 : vector<8x128xf32>, i32 -> vector<8x128xf32>
    %c2_46 = arith.constant 2 : index
    %c0_47 = arith.constant 0 : index
    %c0_48 = arith.constant 0 : index
    %105 = vector.load %arg3[%c2_46, %c0_47, %c0_48] : memref<33x8x128xf32, #tpu.memory_space<vmem>>, vector<1x8x128xf32>
    %106 = vector.shape_cast %105 : vector<1x8x128xf32> to vector<8x128xf32>
    %107 = arith.mulf %104, %106 : vector<8x128xf32>
    %108 = vector.extract_strided_slice %89 {offsets = [0, 2], sizes = [8, 1], strides = [1, 1]} : vector<8x9xf32> to vector<8x1xf32>
    %109 = vector.broadcast %108 : vector<8x1xf32> to vector<8x128xf32>
    %110 = arith.mulf %107, %109 : vector<8x128xf32>
    %c2_i32_49 = arith.constant 2 : i32
    %111 = tpu.dynamic_rotate %88 by %c2_i32_49 dim 1 : vector<8x128xf32>, i32 -> vector<8x128xf32>
    %c3_50 = arith.constant 3 : index
    %c0_51 = arith.constant 0 : index
    %c0_52 = arith.constant 0 : index
    %112 = vector.load %arg3[%c3_50, %c0_51, %c0_52] : memref<33x8x128xf32, #tpu.memory_space<vmem>>, vector<1x8x128xf32>
    %113 = vector.shape_cast %112 : vector<1x8x128xf32> to vector<8x128xf32>
    %114 = arith.mulf %111, %113 : vector<8x128xf32>
    %115 = vector.extract_strided_slice %89 {offsets = [0, 3], sizes = [8, 1], strides = [1, 1]} : vector<8x9xf32> to vector<8x1xf32>
    %116 = vector.broadcast %115 : vector<8x1xf32> to vector<8x128xf32>
    %117 = arith.mulf %114, %116 : vector<8x128xf32>
    %118 = vector.extract_strided_slice %89 {offsets = [0, 4], sizes = [8, 1], strides = [1, 1]} : vector<8x9xf32> to vector<8x1xf32>
    %119 = vector.broadcast %118 : vector<8x1xf32> to vector<8x128xf32>
    %120 = arith.mulf %88, %119 : vector<8x128xf32>
    %121 = arith.addf %96, %120 : vector<8x128xf32>
    %c126_i32_53 = arith.constant 126 : i32
    %122 = tpu.dynamic_rotate %88 by %c126_i32_53 dim 1 : vector<8x128xf32>, i32 -> vector<8x128xf32>
    %c5_54 = arith.constant 5 : index
    %c0_55 = arith.constant 0 : index
    %c0_56 = arith.constant 0 : index
    %123 = vector.load %arg3[%c5_54, %c0_55, %c0_56] : memref<33x8x128xf32, #tpu.memory_space<vmem>>, vector<1x8x128xf32>
    %124 = vector.shape_cast %123 : vector<1x8x128xf32> to vector<8x128xf32>
    %125 = arith.mulf %122, %124 : vector<8x128xf32>
    %126 = vector.extract_strided_slice %89 {offsets = [0, 5], sizes = [8, 1], strides = [1, 1]} : vector<8x9xf32> to vector<8x1xf32>
    %127 = vector.broadcast %126 : vector<8x1xf32> to vector<8x128xf32>
    %128 = arith.mulf %125, %127 : vector<8x128xf32>
    %129 = arith.addf %103, %128 : vector<8x128xf32>
    %c114_i32_57 = arith.constant 114 : i32
    %130 = tpu.dynamic_rotate %88 by %c114_i32_57 dim 1 : vector<8x128xf32>, i32 -> vector<8x128xf32>
    %c6_58 = arith.constant 6 : index
    %c0_59 = arith.constant 0 : index
    %c0_60 = arith.constant 0 : index
    %131 = vector.load %arg3[%c6_58, %c0_59, %c0_60] : memref<33x8x128xf32, #tpu.memory_space<vmem>>, vector<1x8x128xf32>
    %132 = vector.shape_cast %131 : vector<1x8x128xf32> to vector<8x128xf32>
    %133 = arith.mulf %130, %132 : vector<8x128xf32>
    %134 = vector.extract_strided_slice %89 {offsets = [0, 6], sizes = [8, 1], strides = [1, 1]} : vector<8x9xf32> to vector<8x1xf32>
    %135 = vector.broadcast %134 : vector<8x1xf32> to vector<8x128xf32>
    %136 = arith.mulf %133, %135 : vector<8x128xf32>
    %137 = arith.addf %110, %136 : vector<8x128xf32>
    %c112_i32_61 = arith.constant 112 : i32
    %138 = tpu.dynamic_rotate %88 by %c112_i32_61 dim 1 : vector<8x128xf32>, i32 -> vector<8x128xf32>
    %c7_62 = arith.constant 7 : index
    %c0_63 = arith.constant 0 : index
    %c0_64 = arith.constant 0 : index
    %139 = vector.load %arg3[%c7_62, %c0_63, %c0_64] : memref<33x8x128xf32, #tpu.memory_space<vmem>>, vector<1x8x128xf32>
    %140 = vector.shape_cast %139 : vector<1x8x128xf32> to vector<8x128xf32>
    %141 = arith.mulf %138, %140 : vector<8x128xf32>
    %142 = vector.extract_strided_slice %89 {offsets = [0, 7], sizes = [8, 1], strides = [1, 1]} : vector<8x9xf32> to vector<8x1xf32>
    %143 = vector.broadcast %142 : vector<8x1xf32> to vector<8x128xf32>
    %144 = arith.mulf %141, %143 : vector<8x128xf32>
    %145 = arith.addf %117, %144 : vector<8x128xf32>
    %c110_i32_65 = arith.constant 110 : i32
    %146 = tpu.dynamic_rotate %88 by %c110_i32_65 dim 1 : vector<8x128xf32>, i32 -> vector<8x128xf32>
    %c8_66 = arith.constant 8 : index
    %c0_67 = arith.constant 0 : index
    %c0_68 = arith.constant 0 : index
    %147 = vector.load %arg3[%c8_66, %c0_67, %c0_68] : memref<33x8x128xf32, #tpu.memory_space<vmem>>, vector<1x8x128xf32>
    %148 = vector.shape_cast %147 : vector<1x8x128xf32> to vector<8x128xf32>
    %149 = arith.mulf %146, %148 : vector<8x128xf32>
    %150 = vector.extract_strided_slice %89 {offsets = [0, 8], sizes = [8, 1], strides = [1, 1]} : vector<8x9xf32> to vector<8x1xf32>
    %151 = vector.broadcast %150 : vector<8x1xf32> to vector<8x128xf32>
    %152 = arith.mulf %149, %151 : vector<8x128xf32>
    %153 = arith.addf %121, %152 : vector<8x128xf32>
    %154 = arith.addf %153, %129 : vector<8x128xf32>
    %155 = arith.addf %137, %145 : vector<8x128xf32>
    %156 = arith.addf %154, %155 : vector<8x128xf32>
    %c0_69 = arith.constant 0 : index
    %c0_70 = arith.constant 0 : index
    %157 = vector.load %arg11[%c0_69, %c0_70] : memref<8x8xf32, #tpu.memory_space<vmem>>, vector<8x8xf32>
    %cst_71 = arith.constant dense<0.000000e+00> : vector<8x128xf32>
    %158 = tpu.matmul %157, %156, %cst_71 {dimension_numbers = #tpu.dot_dimension_numbers<[1], [0], [0], [1], [0, 0, 1, 1], [], []>} : vector<8x8xf32>, vector<8x128xf32>, vector<8x128xf32> -> vector<8x128xf32>
    %c0_72 = arith.constant 0 : index
    %c0_73 = arith.constant 0 : index
    %159 = vector.load %arg12[%c0_72, %c0_73] : memref<8x128xf32, #tpu.memory_space<vmem>>, vector<8x128xf32>
    %160 = arith.addf %158, %159 : vector<8x128xf32>
    %161 = arith.addf %86, %160 : vector<8x128xf32>
    %c9_i32 = arith.constant 9 : i32
    %162 = tpu.dynamic_rotate %161 by %c9_i32 dim 1 : vector<8x128xf32>, i32 -> vector<8x128xf32>
    %c9 = arith.constant 9 : index
    %c0_74 = arith.constant 0 : index
    %c0_75 = arith.constant 0 : index
    %163 = vector.load %arg3[%c9, %c0_74, %c0_75] : memref<33x8x128xf32, #tpu.memory_space<vmem>>, vector<1x8x128xf32>
    %164 = vector.shape_cast %163 : vector<1x8x128xf32> to vector<8x128xf32>
    %cst_76 = arith.constant 5.000000e-01 : f32
    %165 = vector.broadcast %cst_76 : f32 to vector<8x128xf32>
    %166 = arith.cmpf ogt, %164, %165 : vector<8x128xf32>
    %cst_77 = arith.constant 0xFF800000 : f32
    %167 = vector.broadcast %cst_77 : f32 to vector<8x128xf32>
    %168 = arith.select %166, %162, %167 : vector<8x128xi1>, vector<8x128xf32>
    %c8_i32 = arith.constant 8 : i32
    %169 = tpu.dynamic_rotate %161 by %c8_i32 dim 1 : vector<8x128xf32>, i32 -> vector<8x128xf32>
    %c10 = arith.constant 10 : index
    %c0_78 = arith.constant 0 : index
    %c0_79 = arith.constant 0 : index
    %170 = vector.load %arg3[%c10, %c0_78, %c0_79] : memref<33x8x128xf32, #tpu.memory_space<vmem>>, vector<1x8x128xf32>
    %171 = vector.shape_cast %170 : vector<1x8x128xf32> to vector<8x128xf32>
    %cst_80 = arith.constant 5.000000e-01 : f32
    %172 = vector.broadcast %cst_80 : f32 to vector<8x128xf32>
    %173 = arith.cmpf ogt, %171, %172 : vector<8x128xf32>
    %cst_81 = arith.constant 0xFF800000 : f32
    %174 = vector.broadcast %cst_81 : f32 to vector<8x128xf32>
    %175 = arith.select %173, %169, %174 : vector<8x128xi1>, vector<8x128xf32>
    %c7_i32 = arith.constant 7 : i32
    %176 = tpu.dynamic_rotate %161 by %c7_i32 dim 1 : vector<8x128xf32>, i32 -> vector<8x128xf32>
    %c11 = arith.constant 11 : index
    %c0_82 = arith.constant 0 : index
    %c0_83 = arith.constant 0 : index
    %177 = vector.load %arg3[%c11, %c0_82, %c0_83] : memref<33x8x128xf32, #tpu.memory_space<vmem>>, vector<1x8x128xf32>
    %178 = vector.shape_cast %177 : vector<1x8x128xf32> to vector<8x128xf32>
    %cst_84 = arith.constant 5.000000e-01 : f32
    %179 = vector.broadcast %cst_84 : f32 to vector<8x128xf32>
    %180 = arith.cmpf ogt, %178, %179 : vector<8x128xf32>
    %cst_85 = arith.constant 0xFF800000 : f32
    %181 = vector.broadcast %cst_85 : f32 to vector<8x128xf32>
    %182 = arith.select %180, %176, %181 : vector<8x128xi1>, vector<8x128xf32>
    %c1_i32 = arith.constant 1 : i32
    %183 = tpu.dynamic_rotate %161 by %c1_i32 dim 1 : vector<8x128xf32>, i32 -> vector<8x128xf32>
    %c12 = arith.constant 12 : index
    %c0_86 = arith.constant 0 : index
    %c0_87 = arith.constant 0 : index
    %184 = vector.load %arg3[%c12, %c0_86, %c0_87] : memref<33x8x128xf32, #tpu.memory_space<vmem>>, vector<1x8x128xf32>
    %185 = vector.shape_cast %184 : vector<1x8x128xf32> to vector<8x128xf32>
    %cst_88 = arith.constant 5.000000e-01 : f32
    %186 = vector.broadcast %cst_88 : f32 to vector<8x128xf32>
    %187 = arith.cmpf ogt, %185, %186 : vector<8x128xf32>
    %cst_89 = arith.constant 0xFF800000 : f32
    %188 = vector.broadcast %cst_89 : f32 to vector<8x128xf32>
    %189 = arith.select %187, %183, %188 : vector<8x128xi1>, vector<8x128xf32>
    %190 = arith.maximumf %168, %161 : vector<8x128xf32>
    %c127_i32 = arith.constant 127 : i32
    %191 = tpu.dynamic_rotate %161 by %c127_i32 dim 1 : vector<8x128xf32>, i32 -> vector<8x128xf32>
    %c13 = arith.constant 13 : index
    %c0_90 = arith.constant 0 : index
    %c0_91 = arith.constant 0 : index
    %192 = vector.load %arg3[%c13, %c0_90, %c0_91] : memref<33x8x128xf32, #tpu.memory_space<vmem>>, vector<1x8x128xf32>
    %193 = vector.shape_cast %192 : vector<1x8x128xf32> to vector<8x128xf32>
    %cst_92 = arith.constant 5.000000e-01 : f32
    %194 = vector.broadcast %cst_92 : f32 to vector<8x128xf32>
    %195 = arith.cmpf ogt, %193, %194 : vector<8x128xf32>
    %cst_93 = arith.constant 0xFF800000 : f32
    %196 = vector.broadcast %cst_93 : f32 to vector<8x128xf32>
    %197 = arith.select %195, %191, %196 : vector<8x128xi1>, vector<8x128xf32>
    %198 = arith.maximumf %175, %197 : vector<8x128xf32>
    %c121_i32 = arith.constant 121 : i32
    %199 = tpu.dynamic_rotate %161 by %c121_i32 dim 1 : vector<8x128xf32>, i32 -> vector<8x128xf32>
    %c14 = arith.constant 14 : index
    %c0_94 = arith.constant 0 : index
    %c0_95 = arith.constant 0 : index
    %200 = vector.load %arg3[%c14, %c0_94, %c0_95] : memref<33x8x128xf32, #tpu.memory_space<vmem>>, vector<1x8x128xf32>
    %201 = vector.shape_cast %200 : vector<1x8x128xf32> to vector<8x128xf32>
    %cst_96 = arith.constant 5.000000e-01 : f32
    %202 = vector.broadcast %cst_96 : f32 to vector<8x128xf32>
    %203 = arith.cmpf ogt, %201, %202 : vector<8x128xf32>
    %cst_97 = arith.constant 0xFF800000 : f32
    %204 = vector.broadcast %cst_97 : f32 to vector<8x128xf32>
    %205 = arith.select %203, %199, %204 : vector<8x128xi1>, vector<8x128xf32>
    %206 = arith.maximumf %182, %205 : vector<8x128xf32>
    %c120_i32 = arith.constant 120 : i32
    %207 = tpu.dynamic_rotate %161 by %c120_i32 dim 1 : vector<8x128xf32>, i32 -> vector<8x128xf32>
    %c15 = arith.constant 15 : index
    %c0_98 = arith.constant 0 : index
    %c0_99 = arith.constant 0 : index
    %208 = vector.load %arg3[%c15, %c0_98, %c0_99] : memref<33x8x128xf32, #tpu.memory_space<vmem>>, vector<1x8x128xf32>
    %209 = vector.shape_cast %208 : vector<1x8x128xf32> to vector<8x128xf32>
    %cst_100 = arith.constant 5.000000e-01 : f32
    %210 = vector.broadcast %cst_100 : f32 to vector<8x128xf32>
    %211 = arith.cmpf ogt, %209, %210 : vector<8x128xf32>
    %cst_101 = arith.constant 0xFF800000 : f32
    %212 = vector.broadcast %cst_101 : f32 to vector<8x128xf32>
    %213 = arith.select %211, %207, %212 : vector<8x128xi1>, vector<8x128xf32>
    %214 = arith.maximumf %189, %213 : vector<8x128xf32>
    %c119_i32 = arith.constant 119 : i32
    %215 = tpu.dynamic_rotate %161 by %c119_i32 dim 1 : vector<8x128xf32>, i32 -> vector<8x128xf32>
    %c16 = arith.constant 16 : index
    %c0_102 = arith.constant 0 : index
    %c0_103 = arith.constant 0 : index
    %216 = vector.load %arg3[%c16, %c0_102, %c0_103] : memref<33x8x128xf32, #tpu.memory_space<vmem>>, vector<1x8x128xf32>
    %217 = vector.shape_cast %216 : vector<1x8x128xf32> to vector<8x128xf32>
    %cst_104 = arith.constant 5.000000e-01 : f32
    %218 = vector.broadcast %cst_104 : f32 to vector<8x128xf32>
    %219 = arith.cmpf ogt, %217, %218 : vector<8x128xf32>
    %cst_105 = arith.constant 0xFF800000 : f32
    %220 = vector.broadcast %cst_105 : f32 to vector<8x128xf32>
    %221 = arith.select %219, %215, %220 : vector<8x128xi1>, vector<8x128xf32>
    %222 = arith.maximumf %190, %221 : vector<8x128xf32>
    %223 = arith.maximumf %222, %198 : vector<8x128xf32>
    %224 = arith.maximumf %206, %214 : vector<8x128xf32>
    %225 = arith.maximumf %223, %224 : vector<8x128xf32>
    %c0_106 = arith.constant 0 : index
    %c0_107 = arith.constant 0 : index
    %226 = vector.load %arg13[%c0_106, %c0_107] : memref<8x9xf32, #tpu.memory_space<vmem>>, vector<8x9xf32>
    %c18_i32_108 = arith.constant 18 : i32
    %227 = tpu.dynamic_rotate %14 by %c18_i32_108 dim 1 : vector<8x128xf32>, i32 -> vector<8x128xf32>
    %c0_109 = arith.constant 0 : index
    %c0_110 = arith.constant 0 : index
    %c0_111 = arith.constant 0 : index
    %228 = vector.load %arg3[%c0_109, %c0_110, %c0_111] : memref<33x8x128xf32, #tpu.memory_space<vmem>>, vector<1x8x128xf32>
    %229 = vector.shape_cast %228 : vector<1x8x128xf32> to vector<8x128xf32>
    %230 = arith.mulf %227, %229 : vector<8x128xf32>
    %231 = vector.extract_strided_slice %226 {offsets = [0, 0], sizes = [8, 1], strides = [1, 1]} : vector<8x9xf32> to vector<8x1xf32>
    %232 = vector.broadcast %231 : vector<8x1xf32> to vector<8x128xf32>
    %233 = arith.mulf %230, %232 : vector<8x128xf32>
    %c16_i32_112 = arith.constant 16 : i32
    %234 = tpu.dynamic_rotate %14 by %c16_i32_112 dim 1 : vector<8x128xf32>, i32 -> vector<8x128xf32>
    %c1_113 = arith.constant 1 : index
    %c0_114 = arith.constant 0 : index
    %c0_115 = arith.constant 0 : index
    %235 = vector.load %arg3[%c1_113, %c0_114, %c0_115] : memref<33x8x128xf32, #tpu.memory_space<vmem>>, vector<1x8x128xf32>
    %236 = vector.shape_cast %235 : vector<1x8x128xf32> to vector<8x128xf32>
    %237 = arith.mulf %234, %236 : vector<8x128xf32>
    %238 = vector.extract_strided_slice %226 {offsets = [0, 1], sizes = [8, 1], strides = [1, 1]} : vector<8x9xf32> to vector<8x1xf32>
    %239 = vector.broadcast %238 : vector<8x1xf32> to vector<8x128xf32>
    %240 = arith.mulf %237, %239 : vector<8x128xf32>
    %c14_i32_116 = arith.constant 14 : i32
    %241 = tpu.dynamic_rotate %14 by %c14_i32_116 dim 1 : vector<8x128xf32>, i32 -> vector<8x128xf32>
    %c2_117 = arith.constant 2 : index
    %c0_118 = arith.constant 0 : index
    %c0_119 = arith.constant 0 : index
    %242 = vector.load %arg3[%c2_117, %c0_118, %c0_119] : memref<33x8x128xf32, #tpu.memory_space<vmem>>, vector<1x8x128xf32>
    %243 = vector.shape_cast %242 : vector<1x8x128xf32> to vector<8x128xf32>
    %244 = arith.mulf %241, %243 : vector<8x128xf32>
    %245 = vector.extract_strided_slice %226 {offsets = [0, 2], sizes = [8, 1], strides = [1, 1]} : vector<8x9xf32> to vector<8x1xf32>
    %246 = vector.broadcast %245 : vector<8x1xf32> to vector<8x128xf32>
    %247 = arith.mulf %244, %246 : vector<8x128xf32>
    %c2_i32_120 = arith.constant 2 : i32
    %248 = tpu.dynamic_rotate %14 by %c2_i32_120 dim 1 : vector<8x128xf32>, i32 -> vector<8x128xf32>
    %c3_121 = arith.constant 3 : index
    %c0_122 = arith.constant 0 : index
    %c0_123 = arith.constant 0 : index
    %249 = vector.load %arg3[%c3_121, %c0_122, %c0_123] : memref<33x8x128xf32, #tpu.memory_space<vmem>>, vector<1x8x128xf32>
    %250 = vector.shape_cast %249 : vector<1x8x128xf32> to vector<8x128xf32>
    %251 = arith.mulf %248, %250 : vector<8x128xf32>
    %252 = vector.extract_strided_slice %226 {offsets = [0, 3], sizes = [8, 1], strides = [1, 1]} : vector<8x9xf32> to vector<8x1xf32>
    %253 = vector.broadcast %252 : vector<8x1xf32> to vector<8x128xf32>
    %254 = arith.mulf %251, %253 : vector<8x128xf32>
    %255 = vector.extract_strided_slice %226 {offsets = [0, 4], sizes = [8, 1], strides = [1, 1]} : vector<8x9xf32> to vector<8x1xf32>
    %256 = vector.broadcast %255 : vector<8x1xf32> to vector<8x128xf32>
    %257 = arith.mulf %14, %256 : vector<8x128xf32>
    %258 = arith.addf %233, %257 : vector<8x128xf32>
    %c126_i32_124 = arith.constant 126 : i32
    %259 = tpu.dynamic_rotate %14 by %c126_i32_124 dim 1 : vector<8x128xf32>, i32 -> vector<8x128xf32>
    %c5_125 = arith.constant 5 : index
    %c0_126 = arith.constant 0 : index
    %c0_127 = arith.constant 0 : index
    %260 = vector.load %arg3[%c5_125, %c0_126, %c0_127] : memref<33x8x128xf32, #tpu.memory_space<vmem>>, vector<1x8x128xf32>
    %261 = vector.shape_cast %260 : vector<1x8x128xf32> to vector<8x128xf32>
    %262 = arith.mulf %259, %261 : vector<8x128xf32>
    %263 = vector.extract_strided_slice %226 {offsets = [0, 5], sizes = [8, 1], strides = [1, 1]} : vector<8x9xf32> to vector<8x1xf32>
    %264 = vector.broadcast %263 : vector<8x1xf32> to vector<8x128xf32>
    %265 = arith.mulf %262, %264 : vector<8x128xf32>
    %266 = arith.addf %240, %265 : vector<8x128xf32>
    %c114_i32_128 = arith.constant 114 : i32
    %267 = tpu.dynamic_rotate %14 by %c114_i32_128 dim 1 : vector<8x128xf32>, i32 -> vector<8x128xf32>
    %c6_129 = arith.constant 6 : index
    %c0_130 = arith.constant 0 : index
    %c0_131 = arith.constant 0 : index
    %268 = vector.load %arg3[%c6_129, %c0_130, %c0_131] : memref<33x8x128xf32, #tpu.memory_space<vmem>>, vector<1x8x128xf32>
    %269 = vector.shape_cast %268 : vector<1x8x128xf32> to vector<8x128xf32>
    %270 = arith.mulf %267, %269 : vector<8x128xf32>
    %271 = vector.extract_strided_slice %226 {offsets = [0, 6], sizes = [8, 1], strides = [1, 1]} : vector<8x9xf32> to vector<8x1xf32>
    %272 = vector.broadcast %271 : vector<8x1xf32> to vector<8x128xf32>
    %273 = arith.mulf %270, %272 : vector<8x128xf32>
    %274 = arith.addf %247, %273 : vector<8x128xf32>
    %c112_i32_132 = arith.constant 112 : i32
    %275 = tpu.dynamic_rotate %14 by %c112_i32_132 dim 1 : vector<8x128xf32>, i32 -> vector<8x128xf32>
    %c7_133 = arith.constant 7 : index
    %c0_134 = arith.constant 0 : index
    %c0_135 = arith.constant 0 : index
    %276 = vector.load %arg3[%c7_133, %c0_134, %c0_135] : memref<33x8x128xf32, #tpu.memory_space<vmem>>, vector<1x8x128xf32>
    %277 = vector.shape_cast %276 : vector<1x8x128xf32> to vector<8x128xf32>
    %278 = arith.mulf %275, %277 : vector<8x128xf32>
    %279 = vector.extract_strided_slice %226 {offsets = [0, 7], sizes = [8, 1], strides = [1, 1]} : vector<8x9xf32> to vector<8x1xf32>
    %280 = vector.broadcast %279 : vector<8x1xf32> to vector<8x128xf32>
    %281 = arith.mulf %278, %280 : vector<8x128xf32>
    %282 = arith.addf %254, %281 : vector<8x128xf32>
    %c110_i32_136 = arith.constant 110 : i32
    %283 = tpu.dynamic_rotate %14 by %c110_i32_136 dim 1 : vector<8x128xf32>, i32 -> vector<8x128xf32>
    %c8_137 = arith.constant 8 : index
    %c0_138 = arith.constant 0 : index
    %c0_139 = arith.constant 0 : index
    %284 = vector.load %arg3[%c8_137, %c0_138, %c0_139] : memref<33x8x128xf32, #tpu.memory_space<vmem>>, vector<1x8x128xf32>
    %285 = vector.shape_cast %284 : vector<1x8x128xf32> to vector<8x128xf32>
    %286 = arith.mulf %283, %285 : vector<8x128xf32>
    %287 = vector.extract_strided_slice %226 {offsets = [0, 8], sizes = [8, 1], strides = [1, 1]} : vector<8x9xf32> to vector<8x1xf32>
    %288 = vector.broadcast %287 : vector<8x1xf32> to vector<8x128xf32>
    %289 = arith.mulf %286, %288 : vector<8x128xf32>
    %290 = arith.addf %258, %289 : vector<8x128xf32>
    %291 = arith.addf %290, %266 : vector<8x128xf32>
    %292 = arith.addf %274, %282 : vector<8x128xf32>
    %293 = arith.addf %291, %292 : vector<8x128xf32>
    %c0_140 = arith.constant 0 : index
    %c0_141 = arith.constant 0 : index
    %294 = vector.load %arg14[%c0_140, %c0_141] : memref<8x8xf32, #tpu.memory_space<vmem>>, vector<8x8xf32>
    %cst_142 = arith.constant dense<0.000000e+00> : vector<8x128xf32>
    %295 = tpu.matmul %294, %293, %cst_142 {dimension_numbers = #tpu.dot_dimension_numbers<[1], [0], [0], [1], [0, 0, 1, 1], [], []>} : vector<8x8xf32>, vector<8x128xf32>, vector<8x128xf32> -> vector<8x128xf32>
    %c0_143 = arith.constant 0 : index
    %c0_144 = arith.constant 0 : index
    %296 = vector.load %arg15[%c0_143, %c0_144] : memref<8x128xf32, #tpu.memory_space<vmem>>, vector<8x128xf32>
    %297 = arith.addf %295, %296 : vector<8x128xf32>
    %298 = arith.addf %225, %297 : vector<8x128xf32>
    %299 = arith.addf %298, %12 : vector<8x128xf32>
    %c0_145 = arith.constant 0 : index
    %c0_146 = arith.constant 0 : index
    %300 = vector.load %arg16[%c0_145, %c0_146] : memref<8x25xf32, #tpu.memory_space<vmem>>, vector<8x25xf32>
    %c36_i32 = arith.constant 36 : i32
    %301 = tpu.dynamic_rotate %14 by %c36_i32 dim 1 : vector<8x128xf32>, i32 -> vector<8x128xf32>
    %c17 = arith.constant 17 : index
    %c0_147 = arith.constant 0 : index
    %c0_148 = arith.constant 0 : index
    %302 = vector.load %arg3[%c17, %c0_147, %c0_148] : memref<33x8x128xf32, #tpu.memory_space<vmem>>, vector<1x8x128xf32>
    %303 = vector.shape_cast %302 : vector<1x8x128xf32> to vector<8x128xf32>
    %304 = arith.mulf %301, %303 : vector<8x128xf32>
    %305 = vector.extract_strided_slice %300 {offsets = [0, 0], sizes = [8, 1], strides = [1, 1]} : vector<8x25xf32> to vector<8x1xf32>
    %306 = vector.broadcast %305 : vector<8x1xf32> to vector<8x128xf32>
    %307 = arith.mulf %304, %306 : vector<8x128xf32>
    %c34_i32 = arith.constant 34 : i32
    %308 = tpu.dynamic_rotate %14 by %c34_i32 dim 1 : vector<8x128xf32>, i32 -> vector<8x128xf32>
    %c18 = arith.constant 18 : index
    %c0_149 = arith.constant 0 : index
    %c0_150 = arith.constant 0 : index
    %309 = vector.load %arg3[%c18, %c0_149, %c0_150] : memref<33x8x128xf32, #tpu.memory_space<vmem>>, vector<1x8x128xf32>
    %310 = vector.shape_cast %309 : vector<1x8x128xf32> to vector<8x128xf32>
    %311 = arith.mulf %308, %310 : vector<8x128xf32>
    %312 = vector.extract_strided_slice %300 {offsets = [0, 1], sizes = [8, 1], strides = [1, 1]} : vector<8x25xf32> to vector<8x1xf32>
    %313 = vector.broadcast %312 : vector<8x1xf32> to vector<8x128xf32>
    %314 = arith.mulf %311, %313 : vector<8x128xf32>
    %c32_i32 = arith.constant 32 : i32
    %315 = tpu.dynamic_rotate %14 by %c32_i32 dim 1 : vector<8x128xf32>, i32 -> vector<8x128xf32>
    %c19 = arith.constant 19 : index
    %c0_151 = arith.constant 0 : index
    %c0_152 = arith.constant 0 : index
    %316 = vector.load %arg3[%c19, %c0_151, %c0_152] : memref<33x8x128xf32, #tpu.memory_space<vmem>>, vector<1x8x128xf32>
    %317 = vector.shape_cast %316 : vector<1x8x128xf32> to vector<8x128xf32>
    %318 = arith.mulf %315, %317 : vector<8x128xf32>
    %319 = vector.extract_strided_slice %300 {offsets = [0, 2], sizes = [8, 1], strides = [1, 1]} : vector<8x25xf32> to vector<8x1xf32>
    %320 = vector.broadcast %319 : vector<8x1xf32> to vector<8x128xf32>
    %321 = arith.mulf %318, %320 : vector<8x128xf32>
    %c30_i32 = arith.constant 30 : i32
    %322 = tpu.dynamic_rotate %14 by %c30_i32 dim 1 : vector<8x128xf32>, i32 -> vector<8x128xf32>
    %c20 = arith.constant 20 : index
    %c0_153 = arith.constant 0 : index
    %c0_154 = arith.constant 0 : index
    %323 = vector.load %arg3[%c20, %c0_153, %c0_154] : memref<33x8x128xf32, #tpu.memory_space<vmem>>, vector<1x8x128xf32>
    %324 = vector.shape_cast %323 : vector<1x8x128xf32> to vector<8x128xf32>
    %325 = arith.mulf %322, %324 : vector<8x128xf32>
    %326 = vector.extract_strided_slice %300 {offsets = [0, 3], sizes = [8, 1], strides = [1, 1]} : vector<8x25xf32> to vector<8x1xf32>
    %327 = vector.broadcast %326 : vector<8x1xf32> to vector<8x128xf32>
    %328 = arith.mulf %325, %327 : vector<8x128xf32>
    %c28_i32 = arith.constant 28 : i32
    %329 = tpu.dynamic_rotate %14 by %c28_i32 dim 1 : vector<8x128xf32>, i32 -> vector<8x128xf32>
    %c21 = arith.constant 21 : index
    %c0_155 = arith.constant 0 : index
    %c0_156 = arith.constant 0 : index
    %330 = vector.load %arg3[%c21, %c0_155, %c0_156] : memref<33x8x128xf32, #tpu.memory_space<vmem>>, vector<1x8x128xf32>
    %331 = vector.shape_cast %330 : vector<1x8x128xf32> to vector<8x128xf32>
    %332 = arith.mulf %329, %331 : vector<8x128xf32>
    %333 = vector.extract_strided_slice %300 {offsets = [0, 4], sizes = [8, 1], strides = [1, 1]} : vector<8x25xf32> to vector<8x1xf32>
    %334 = vector.broadcast %333 : vector<8x1xf32> to vector<8x128xf32>
    %335 = arith.mulf %332, %334 : vector<8x128xf32>
    %336 = arith.addf %307, %335 : vector<8x128xf32>
    %c20_i32 = arith.constant 20 : i32
    %337 = tpu.dynamic_rotate %14 by %c20_i32 dim 1 : vector<8x128xf32>, i32 -> vector<8x128xf32>
    %c22 = arith.constant 22 : index
    %c0_157 = arith.constant 0 : index
    %c0_158 = arith.constant 0 : index
    %338 = vector.load %arg3[%c22, %c0_157, %c0_158] : memref<33x8x128xf32, #tpu.memory_space<vmem>>, vector<1x8x128xf32>
    %339 = vector.shape_cast %338 : vector<1x8x128xf32> to vector<8x128xf32>
    %340 = arith.mulf %337, %339 : vector<8x128xf32>
    %341 = vector.extract_strided_slice %300 {offsets = [0, 5], sizes = [8, 1], strides = [1, 1]} : vector<8x25xf32> to vector<8x1xf32>
    %342 = vector.broadcast %341 : vector<8x1xf32> to vector<8x128xf32>
    %343 = arith.mulf %340, %342 : vector<8x128xf32>
    %344 = arith.addf %314, %343 : vector<8x128xf32>
    %c18_i32_159 = arith.constant 18 : i32
    %345 = tpu.dynamic_rotate %14 by %c18_i32_159 dim 1 : vector<8x128xf32>, i32 -> vector<8x128xf32>
    %c0_160 = arith.constant 0 : index
    %c0_161 = arith.constant 0 : index
    %c0_162 = arith.constant 0 : index
    %346 = vector.load %arg3[%c0_160, %c0_161, %c0_162] : memref<33x8x128xf32, #tpu.memory_space<vmem>>, vector<1x8x128xf32>
    %347 = vector.shape_cast %346 : vector<1x8x128xf32> to vector<8x128xf32>
    %348 = arith.mulf %345, %347 : vector<8x128xf32>
    %349 = vector.extract_strided_slice %300 {offsets = [0, 6], sizes = [8, 1], strides = [1, 1]} : vector<8x25xf32> to vector<8x1xf32>
    %350 = vector.broadcast %349 : vector<8x1xf32> to vector<8x128xf32>
    %351 = arith.mulf %348, %350 : vector<8x128xf32>
    %352 = arith.addf %321, %351 : vector<8x128xf32>
    %c16_i32_163 = arith.constant 16 : i32
    %353 = tpu.dynamic_rotate %14 by %c16_i32_163 dim 1 : vector<8x128xf32>, i32 -> vector<8x128xf32>
    %c1_164 = arith.constant 1 : index
    %c0_165 = arith.constant 0 : index
    %c0_166 = arith.constant 0 : index
    %354 = vector.load %arg3[%c1_164, %c0_165, %c0_166] : memref<33x8x128xf32, #tpu.memory_space<vmem>>, vector<1x8x128xf32>
    %355 = vector.shape_cast %354 : vector<1x8x128xf32> to vector<8x128xf32>
    %356 = arith.mulf %353, %355 : vector<8x128xf32>
    %357 = vector.extract_strided_slice %300 {offsets = [0, 7], sizes = [8, 1], strides = [1, 1]} : vector<8x25xf32> to vector<8x1xf32>
    %358 = vector.broadcast %357 : vector<8x1xf32> to vector<8x128xf32>
    %359 = arith.mulf %356, %358 : vector<8x128xf32>
    %360 = arith.addf %328, %359 : vector<8x128xf32>
    %c14_i32_167 = arith.constant 14 : i32
    %361 = tpu.dynamic_rotate %14 by %c14_i32_167 dim 1 : vector<8x128xf32>, i32 -> vector<8x128xf32>
    %c2_168 = arith.constant 2 : index
    %c0_169 = arith.constant 0 : index
    %c0_170 = arith.constant 0 : index
    %362 = vector.load %arg3[%c2_168, %c0_169, %c0_170] : memref<33x8x128xf32, #tpu.memory_space<vmem>>, vector<1x8x128xf32>
    %363 = vector.shape_cast %362 : vector<1x8x128xf32> to vector<8x128xf32>
    %364 = arith.mulf %361, %363 : vector<8x128xf32>
    %365 = vector.extract_strided_slice %300 {offsets = [0, 8], sizes = [8, 1], strides = [1, 1]} : vector<8x25xf32> to vector<8x1xf32>
    %366 = vector.broadcast %365 : vector<8x1xf32> to vector<8x128xf32>
    %367 = arith.mulf %364, %366 : vector<8x128xf32>
    %368 = arith.addf %336, %367 : vector<8x128xf32>
    %c12_i32 = arith.constant 12 : i32
    %369 = tpu.dynamic_rotate %14 by %c12_i32 dim 1 : vector<8x128xf32>, i32 -> vector<8x128xf32>
    %c23 = arith.constant 23 : index
    %c0_171 = arith.constant 0 : index
    %c0_172 = arith.constant 0 : index
    %370 = vector.load %arg3[%c23, %c0_171, %c0_172] : memref<33x8x128xf32, #tpu.memory_space<vmem>>, vector<1x8x128xf32>
    %371 = vector.shape_cast %370 : vector<1x8x128xf32> to vector<8x128xf32>
    %372 = arith.mulf %369, %371 : vector<8x128xf32>
    %373 = vector.extract_strided_slice %300 {offsets = [0, 9], sizes = [8, 1], strides = [1, 1]} : vector<8x25xf32> to vector<8x1xf32>
    %374 = vector.broadcast %373 : vector<8x1xf32> to vector<8x128xf32>
    %375 = arith.mulf %372, %374 : vector<8x128xf32>
    %376 = arith.addf %344, %375 : vector<8x128xf32>
    %c4_i32 = arith.constant 4 : i32
    %377 = tpu.dynamic_rotate %14 by %c4_i32 dim 1 : vector<8x128xf32>, i32 -> vector<8x128xf32>
    %c24 = arith.constant 24 : index
    %c0_173 = arith.constant 0 : index
    %c0_174 = arith.constant 0 : index
    %378 = vector.load %arg3[%c24, %c0_173, %c0_174] : memref<33x8x128xf32, #tpu.memory_space<vmem>>, vector<1x8x128xf32>
    %379 = vector.shape_cast %378 : vector<1x8x128xf32> to vector<8x128xf32>
    %380 = arith.mulf %377, %379 : vector<8x128xf32>
    %381 = vector.extract_strided_slice %300 {offsets = [0, 10], sizes = [8, 1], strides = [1, 1]} : vector<8x25xf32> to vector<8x1xf32>
    %382 = vector.broadcast %381 : vector<8x1xf32> to vector<8x128xf32>
    %383 = arith.mulf %380, %382 : vector<8x128xf32>
    %384 = arith.addf %352, %383 : vector<8x128xf32>
    %c2_i32_175 = arith.constant 2 : i32
    %385 = tpu.dynamic_rotate %14 by %c2_i32_175 dim 1 : vector<8x128xf32>, i32 -> vector<8x128xf32>
    %c3_176 = arith.constant 3 : index
    %c0_177 = arith.constant 0 : index
    %c0_178 = arith.constant 0 : index
    %386 = vector.load %arg3[%c3_176, %c0_177, %c0_178] : memref<33x8x128xf32, #tpu.memory_space<vmem>>, vector<1x8x128xf32>
    %387 = vector.shape_cast %386 : vector<1x8x128xf32> to vector<8x128xf32>
    %388 = arith.mulf %385, %387 : vector<8x128xf32>
    %389 = vector.extract_strided_slice %300 {offsets = [0, 11], sizes = [8, 1], strides = [1, 1]} : vector<8x25xf32> to vector<8x1xf32>
    %390 = vector.broadcast %389 : vector<8x1xf32> to vector<8x128xf32>
    %391 = arith.mulf %388, %390 : vector<8x128xf32>
    %392 = arith.addf %360, %391 : vector<8x128xf32>
    %393 = vector.extract_strided_slice %300 {offsets = [0, 12], sizes = [8, 1], strides = [1, 1]} : vector<8x25xf32> to vector<8x1xf32>
    %394 = vector.broadcast %393 : vector<8x1xf32> to vector<8x128xf32>
    %395 = arith.mulf %14, %394 : vector<8x128xf32>
    %396 = arith.addf %368, %395 : vector<8x128xf32>
    %c126_i32_179 = arith.constant 126 : i32
    %397 = tpu.dynamic_rotate %14 by %c126_i32_179 dim 1 : vector<8x128xf32>, i32 -> vector<8x128xf32>
    %c5_180 = arith.constant 5 : index
    %c0_181 = arith.constant 0 : index
    %c0_182 = arith.constant 0 : index
    %398 = vector.load %arg3[%c5_180, %c0_181, %c0_182] : memref<33x8x128xf32, #tpu.memory_space<vmem>>, vector<1x8x128xf32>
    %399 = vector.shape_cast %398 : vector<1x8x128xf32> to vector<8x128xf32>
    %400 = arith.mulf %397, %399 : vector<8x128xf32>
    %401 = vector.extract_strided_slice %300 {offsets = [0, 13], sizes = [8, 1], strides = [1, 1]} : vector<8x25xf32> to vector<8x1xf32>
    %402 = vector.broadcast %401 : vector<8x1xf32> to vector<8x128xf32>
    %403 = arith.mulf %400, %402 : vector<8x128xf32>
    %404 = arith.addf %376, %403 : vector<8x128xf32>
    %c124_i32 = arith.constant 124 : i32
    %405 = tpu.dynamic_rotate %14 by %c124_i32 dim 1 : vector<8x128xf32>, i32 -> vector<8x128xf32>
    %c25 = arith.constant 25 : index
    %c0_183 = arith.constant 0 : index
    %c0_184 = arith.constant 0 : index
    %406 = vector.load %arg3[%c25, %c0_183, %c0_184] : memref<33x8x128xf32, #tpu.memory_space<vmem>>, vector<1x8x128xf32>
    %407 = vector.shape_cast %406 : vector<1x8x128xf32> to vector<8x128xf32>
    %408 = arith.mulf %405, %407 : vector<8x128xf32>
    %409 = vector.extract_strided_slice %300 {offsets = [0, 14], sizes = [8, 1], strides = [1, 1]} : vector<8x25xf32> to vector<8x1xf32>
    %410 = vector.broadcast %409 : vector<8x1xf32> to vector<8x128xf32>
    %411 = arith.mulf %408, %410 : vector<8x128xf32>
    %412 = arith.addf %384, %411 : vector<8x128xf32>
    %c116_i32 = arith.constant 116 : i32
    %413 = tpu.dynamic_rotate %14 by %c116_i32 dim 1 : vector<8x128xf32>, i32 -> vector<8x128xf32>
    %c26 = arith.constant 26 : index
    %c0_185 = arith.constant 0 : index
    %c0_186 = arith.constant 0 : index
    %414 = vector.load %arg3[%c26, %c0_185, %c0_186] : memref<33x8x128xf32, #tpu.memory_space<vmem>>, vector<1x8x128xf32>
    %415 = vector.shape_cast %414 : vector<1x8x128xf32> to vector<8x128xf32>
    %416 = arith.mulf %413, %415 : vector<8x128xf32>
    %417 = vector.extract_strided_slice %300 {offsets = [0, 15], sizes = [8, 1], strides = [1, 1]} : vector<8x25xf32> to vector<8x1xf32>
    %418 = vector.broadcast %417 : vector<8x1xf32> to vector<8x128xf32>
    %419 = arith.mulf %416, %418 : vector<8x128xf32>
    %420 = arith.addf %392, %419 : vector<8x128xf32>
    %c114_i32_187 = arith.constant 114 : i32
    %421 = tpu.dynamic_rotate %14 by %c114_i32_187 dim 1 : vector<8x128xf32>, i32 -> vector<8x128xf32>
    %c6_188 = arith.constant 6 : index
    %c0_189 = arith.constant 0 : index
    %c0_190 = arith.constant 0 : index
    %422 = vector.load %arg3[%c6_188, %c0_189, %c0_190] : memref<33x8x128xf32, #tpu.memory_space<vmem>>, vector<1x8x128xf32>
    %423 = vector.shape_cast %422 : vector<1x8x128xf32> to vector<8x128xf32>
    %424 = arith.mulf %421, %423 : vector<8x128xf32>
    %425 = vector.extract_strided_slice %300 {offsets = [0, 16], sizes = [8, 1], strides = [1, 1]} : vector<8x25xf32> to vector<8x1xf32>
    %426 = vector.broadcast %425 : vector<8x1xf32> to vector<8x128xf32>
    %427 = arith.mulf %424, %426 : vector<8x128xf32>
    %428 = arith.addf %396, %427 : vector<8x128xf32>
    %c112_i32_191 = arith.constant 112 : i32
    %429 = tpu.dynamic_rotate %14 by %c112_i32_191 dim 1 : vector<8x128xf32>, i32 -> vector<8x128xf32>
    %c7_192 = arith.constant 7 : index
    %c0_193 = arith.constant 0 : index
    %c0_194 = arith.constant 0 : index
    %430 = vector.load %arg3[%c7_192, %c0_193, %c0_194] : memref<33x8x128xf32, #tpu.memory_space<vmem>>, vector<1x8x128xf32>
    %431 = vector.shape_cast %430 : vector<1x8x128xf32> to vector<8x128xf32>
    %432 = arith.mulf %429, %431 : vector<8x128xf32>
    %433 = vector.extract_strided_slice %300 {offsets = [0, 17], sizes = [8, 1], strides = [1, 1]} : vector<8x25xf32> to vector<8x1xf32>
    %434 = vector.broadcast %433 : vector<8x1xf32> to vector<8x128xf32>
    %435 = arith.mulf %432, %434 : vector<8x128xf32>
    %436 = arith.addf %404, %435 : vector<8x128xf32>
    %c110_i32_195 = arith.constant 110 : i32
    %437 = tpu.dynamic_rotate %14 by %c110_i32_195 dim 1 : vector<8x128xf32>, i32 -> vector<8x128xf32>
    %c8_196 = arith.constant 8 : index
    %c0_197 = arith.constant 0 : index
    %c0_198 = arith.constant 0 : index
    %438 = vector.load %arg3[%c8_196, %c0_197, %c0_198] : memref<33x8x128xf32, #tpu.memory_space<vmem>>, vector<1x8x128xf32>
    %439 = vector.shape_cast %438 : vector<1x8x128xf32> to vector<8x128xf32>
    %440 = arith.mulf %437, %439 : vector<8x128xf32>
    %441 = vector.extract_strided_slice %300 {offsets = [0, 18], sizes = [8, 1], strides = [1, 1]} : vector<8x25xf32> to vector<8x1xf32>
    %442 = vector.broadcast %441 : vector<8x1xf32> to vector<8x128xf32>
    %443 = arith.mulf %440, %442 : vector<8x128xf32>
    %444 = arith.addf %412, %443 : vector<8x128xf32>
    %c108_i32 = arith.constant 108 : i32
    %445 = tpu.dynamic_rotate %14 by %c108_i32 dim 1 : vector<8x128xf32>, i32 -> vector<8x128xf32>
    %c27 = arith.constant 27 : index
    %c0_199 = arith.constant 0 : index
    %c0_200 = arith.constant 0 : index
    %446 = vector.load %arg3[%c27, %c0_199, %c0_200] : memref<33x8x128xf32, #tpu.memory_space<vmem>>, vector<1x8x128xf32>
    %447 = vector.shape_cast %446 : vector<1x8x128xf32> to vector<8x128xf32>
    %448 = arith.mulf %445, %447 : vector<8x128xf32>
    %449 = vector.extract_strided_slice %300 {offsets = [0, 19], sizes = [8, 1], strides = [1, 1]} : vector<8x25xf32> to vector<8x1xf32>
    %450 = vector.broadcast %449 : vector<8x1xf32> to vector<8x128xf32>
    %451 = arith.mulf %448, %450 : vector<8x128xf32>
    %452 = arith.addf %420, %451 : vector<8x128xf32>
    %c100_i32 = arith.constant 100 : i32
    %453 = tpu.dynamic_rotate %14 by %c100_i32 dim 1 : vector<8x128xf32>, i32 -> vector<8x128xf32>
    %c28 = arith.constant 28 : index
    %c0_201 = arith.constant 0 : index
    %c0_202 = arith.constant 0 : index
    %454 = vector.load %arg3[%c28, %c0_201, %c0_202] : memref<33x8x128xf32, #tpu.memory_space<vmem>>, vector<1x8x128xf32>
    %455 = vector.shape_cast %454 : vector<1x8x128xf32> to vector<8x128xf32>
    %456 = arith.mulf %453, %455 : vector<8x128xf32>
    %457 = vector.extract_strided_slice %300 {offsets = [0, 20], sizes = [8, 1], strides = [1, 1]} : vector<8x25xf32> to vector<8x1xf32>
    %458 = vector.broadcast %457 : vector<8x1xf32> to vector<8x128xf32>
    %459 = arith.mulf %456, %458 : vector<8x128xf32>
    %460 = arith.addf %428, %459 : vector<8x128xf32>
    %c98_i32 = arith.constant 98 : i32
    %461 = tpu.dynamic_rotate %14 by %c98_i32 dim 1 : vector<8x128xf32>, i32 -> vector<8x128xf32>
    %c29 = arith.constant 29 : index
    %c0_203 = arith.constant 0 : index
    %c0_204 = arith.constant 0 : index
    %462 = vector.load %arg3[%c29, %c0_203, %c0_204] : memref<33x8x128xf32, #tpu.memory_space<vmem>>, vector<1x8x128xf32>
    %463 = vector.shape_cast %462 : vector<1x8x128xf32> to vector<8x128xf32>
    %464 = arith.mulf %461, %463 : vector<8x128xf32>
    %465 = vector.extract_strided_slice %300 {offsets = [0, 21], sizes = [8, 1], strides = [1, 1]} : vector<8x25xf32> to vector<8x1xf32>
    %466 = vector.broadcast %465 : vector<8x1xf32> to vector<8x128xf32>
    %467 = arith.mulf %464, %466 : vector<8x128xf32>
    %468 = arith.addf %436, %467 : vector<8x128xf32>
    %c96_i32 = arith.constant 96 : i32
    %469 = tpu.dynamic_rotate %14 by %c96_i32 dim 1 : vector<8x128xf32>, i32 -> vector<8x128xf32>
    %c30 = arith.constant 30 : index
    %c0_205 = arith.constant 0 : index
    %c0_206 = arith.constant 0 : index
    %470 = vector.load %arg3[%c30, %c0_205, %c0_206] : memref<33x8x128xf32, #tpu.memory_space<vmem>>, vector<1x8x128xf32>
    %471 = vector.shape_cast %470 : vector<1x8x128xf32> to vector<8x128xf32>
    %472 = arith.mulf %469, %471 : vector<8x128xf32>
    %473 = vector.extract_strided_slice %300 {offsets = [0, 22], sizes = [8, 1], strides = [1, 1]} : vector<8x25xf32> to vector<8x1xf32>
    %474 = vector.broadcast %473 : vector<8x1xf32> to vector<8x128xf32>
    %475 = arith.mulf %472, %474 : vector<8x128xf32>
    %476 = arith.addf %444, %475 : vector<8x128xf32>
    %c94_i32 = arith.constant 94 : i32
    %477 = tpu.dynamic_rotate %14 by %c94_i32 dim 1 : vector<8x128xf32>, i32 -> vector<8x128xf32>
    %c31 = arith.constant 31 : index
    %c0_207 = arith.constant 0 : index
    %c0_208 = arith.constant 0 : index
    %478 = vector.load %arg3[%c31, %c0_207, %c0_208] : memref<33x8x128xf32, #tpu.memory_space<vmem>>, vector<1x8x128xf32>
    %479 = vector.shape_cast %478 : vector<1x8x128xf32> to vector<8x128xf32>
    %480 = arith.mulf %477, %479 : vector<8x128xf32>
    %481 = vector.extract_strided_slice %300 {offsets = [0, 23], sizes = [8, 1], strides = [1, 1]} : vector<8x25xf32> to vector<8x1xf32>
    %482 = vector.broadcast %481 : vector<8x1xf32> to vector<8x128xf32>
    %483 = arith.mulf %480, %482 : vector<8x128xf32>
    %484 = arith.addf %452, %483 : vector<8x128xf32>
    %c92_i32 = arith.constant 92 : i32
    %485 = tpu.dynamic_rotate %14 by %c92_i32 dim 1 : vector<8x128xf32>, i32 -> vector<8x128xf32>
    %c32 = arith.constant 32 : index
    %c0_209 = arith.constant 0 : index
    %c0_210 = arith.constant 0 : index
    %486 = vector.load %arg3[%c32, %c0_209, %c0_210] : memref<33x8x128xf32, #tpu.memory_space<vmem>>, vector<1x8x128xf32>
    %487 = vector.shape_cast %486 : vector<1x8x128xf32> to vector<8x128xf32>
    %488 = arith.mulf %485, %487 : vector<8x128xf32>
    %489 = vector.extract_strided_slice %300 {offsets = [0, 24], sizes = [8, 1], strides = [1, 1]} : vector<8x25xf32> to vector<8x1xf32>
    %490 = vector.broadcast %489 : vector<8x1xf32> to vector<8x128xf32>
    %491 = arith.mulf %488, %490 : vector<8x128xf32>
    %492 = arith.addf %460, %491 : vector<8x128xf32>
    %493 = arith.addf %492, %468 : vector<8x128xf32>
    %494 = arith.addf %476, %484 : vector<8x128xf32>
    %495 = arith.addf %493, %494 : vector<8x128xf32>
    %c0_211 = arith.constant 0 : index
    %c0_212 = arith.constant 0 : index
    %496 = vector.load %arg17[%c0_211, %c0_212] : memref<8x8xf32, #tpu.memory_space<vmem>>, vector<8x8xf32>
    %cst_213 = arith.constant dense<0.000000e+00> : vector<8x128xf32>
    %497 = tpu.matmul %496, %495, %cst_213 {dimension_numbers = #tpu.dot_dimension_numbers<[1], [0], [0], [1], [0, 0, 1, 1], [], []>} : vector<8x8xf32>, vector<8x128xf32>, vector<8x128xf32> -> vector<8x128xf32>
    %c0_214 = arith.constant 0 : index
    %c0_215 = arith.constant 0 : index
    %498 = vector.load %arg18[%c0_214, %c0_215] : memref<8x128xf32, #tpu.memory_space<vmem>>, vector<8x128xf32>
    %499 = arith.addf %497, %498 : vector<8x128xf32>
    %cst_216 = arith.constant 0.000000e+00 : f32
    %500 = vector.broadcast %cst_216 : f32 to vector<8x128xf32>
    %501 = arith.maximumf %298, %500 : vector<8x128xf32>
    %c0_217 = arith.constant 0 : index
    %c0_218 = arith.constant 0 : index
    %502 = vector.load %arg19[%c0_217, %c0_218] : memref<8x25xf32, #tpu.memory_space<vmem>>, vector<8x25xf32>
    %c36_i32_219 = arith.constant 36 : i32
    %503 = tpu.dynamic_rotate %501 by %c36_i32_219 dim 1 : vector<8x128xf32>, i32 -> vector<8x128xf32>
    %c17_220 = arith.constant 17 : index
    %c0_221 = arith.constant 0 : index
    %c0_222 = arith.constant 0 : index
    %504 = vector.load %arg3[%c17_220, %c0_221, %c0_222] : memref<33x8x128xf32, #tpu.memory_space<vmem>>, vector<1x8x128xf32>
    %505 = vector.shape_cast %504 : vector<1x8x128xf32> to vector<8x128xf32>
    %506 = arith.mulf %503, %505 : vector<8x128xf32>
    %507 = vector.extract_strided_slice %502 {offsets = [0, 0], sizes = [8, 1], strides = [1, 1]} : vector<8x25xf32> to vector<8x1xf32>
    %508 = vector.broadcast %507 : vector<8x1xf32> to vector<8x128xf32>
    %509 = arith.mulf %506, %508 : vector<8x128xf32>
    %c34_i32_223 = arith.constant 34 : i32
    %510 = tpu.dynamic_rotate %501 by %c34_i32_223 dim 1 : vector<8x128xf32>, i32 -> vector<8x128xf32>
    %c18_224 = arith.constant 18 : index
    %c0_225 = arith.constant 0 : index
    %c0_226 = arith.constant 0 : index
    %511 = vector.load %arg3[%c18_224, %c0_225, %c0_226] : memref<33x8x128xf32, #tpu.memory_space<vmem>>, vector<1x8x128xf32>
    %512 = vector.shape_cast %511 : vector<1x8x128xf32> to vector<8x128xf32>
    %513 = arith.mulf %510, %512 : vector<8x128xf32>
    %514 = vector.extract_strided_slice %502 {offsets = [0, 1], sizes = [8, 1], strides = [1, 1]} : vector<8x25xf32> to vector<8x1xf32>
    %515 = vector.broadcast %514 : vector<8x1xf32> to vector<8x128xf32>
    %516 = arith.mulf %513, %515 : vector<8x128xf32>
    %c32_i32_227 = arith.constant 32 : i32
    %517 = tpu.dynamic_rotate %501 by %c32_i32_227 dim 1 : vector<8x128xf32>, i32 -> vector<8x128xf32>
    %c19_228 = arith.constant 19 : index
    %c0_229 = arith.constant 0 : index
    %c0_230 = arith.constant 0 : index
    %518 = vector.load %arg3[%c19_228, %c0_229, %c0_230] : memref<33x8x128xf32, #tpu.memory_space<vmem>>, vector<1x8x128xf32>
    %519 = vector.shape_cast %518 : vector<1x8x128xf32> to vector<8x128xf32>
    %520 = arith.mulf %517, %519 : vector<8x128xf32>
    %521 = vector.extract_strided_slice %502 {offsets = [0, 2], sizes = [8, 1], strides = [1, 1]} : vector<8x25xf32> to vector<8x1xf32>
    %522 = vector.broadcast %521 : vector<8x1xf32> to vector<8x128xf32>
    %523 = arith.mulf %520, %522 : vector<8x128xf32>
    %c30_i32_231 = arith.constant 30 : i32
    %524 = tpu.dynamic_rotate %501 by %c30_i32_231 dim 1 : vector<8x128xf32>, i32 -> vector<8x128xf32>
    %c20_232 = arith.constant 20 : index
    %c0_233 = arith.constant 0 : index
    %c0_234 = arith.constant 0 : index
    %525 = vector.load %arg3[%c20_232, %c0_233, %c0_234] : memref<33x8x128xf32, #tpu.memory_space<vmem>>, vector<1x8x128xf32>
    %526 = vector.shape_cast %525 : vector<1x8x128xf32> to vector<8x128xf32>
    %527 = arith.mulf %524, %526 : vector<8x128xf32>
    %528 = vector.extract_strided_slice %502 {offsets = [0, 3], sizes = [8, 1], strides = [1, 1]} : vector<8x25xf32> to vector<8x1xf32>
    %529 = vector.broadcast %528 : vector<8x1xf32> to vector<8x128xf32>
    %530 = arith.mulf %527, %529 : vector<8x128xf32>
    %c28_i32_235 = arith.constant 28 : i32
    %531 = tpu.dynamic_rotate %501 by %c28_i32_235 dim 1 : vector<8x128xf32>, i32 -> vector<8x128xf32>
    %c21_236 = arith.constant 21 : index
    %c0_237 = arith.constant 0 : index
    %c0_238 = arith.constant 0 : index
    %532 = vector.load %arg3[%c21_236, %c0_237, %c0_238] : memref<33x8x128xf32, #tpu.memory_space<vmem>>, vector<1x8x128xf32>
    %533 = vector.shape_cast %532 : vector<1x8x128xf32> to vector<8x128xf32>
    %534 = arith.mulf %531, %533 : vector<8x128xf32>
    %535 = vector.extract_strided_slice %502 {offsets = [0, 4], sizes = [8, 1], strides = [1, 1]} : vector<8x25xf32> to vector<8x1xf32>
    %536 = vector.broadcast %535 : vector<8x1xf32> to vector<8x128xf32>
    %537 = arith.mulf %534, %536 : vector<8x128xf32>
    %538 = arith.addf %509, %537 : vector<8x128xf32>
    %c20_i32_239 = arith.constant 20 : i32
    %539 = tpu.dynamic_rotate %501 by %c20_i32_239 dim 1 : vector<8x128xf32>, i32 -> vector<8x128xf32>
    %c22_240 = arith.constant 22 : index
    %c0_241 = arith.constant 0 : index
    %c0_242 = arith.constant 0 : index
    %540 = vector.load %arg3[%c22_240, %c0_241, %c0_242] : memref<33x8x128xf32, #tpu.memory_space<vmem>>, vector<1x8x128xf32>
    %541 = vector.shape_cast %540 : vector<1x8x128xf32> to vector<8x128xf32>
    %542 = arith.mulf %539, %541 : vector<8x128xf32>
    %543 = vector.extract_strided_slice %502 {offsets = [0, 5], sizes = [8, 1], strides = [1, 1]} : vector<8x25xf32> to vector<8x1xf32>
    %544 = vector.broadcast %543 : vector<8x1xf32> to vector<8x128xf32>
    %545 = arith.mulf %542, %544 : vector<8x128xf32>
    %546 = arith.addf %516, %545 : vector<8x128xf32>
    %c18_i32_243 = arith.constant 18 : i32
    %547 = tpu.dynamic_rotate %501 by %c18_i32_243 dim 1 : vector<8x128xf32>, i32 -> vector<8x128xf32>
    %c0_244 = arith.constant 0 : index
    %c0_245 = arith.constant 0 : index
    %c0_246 = arith.constant 0 : index
    %548 = vector.load %arg3[%c0_244, %c0_245, %c0_246] : memref<33x8x128xf32, #tpu.memory_space<vmem>>, vector<1x8x128xf32>
    %549 = vector.shape_cast %548 : vector<1x8x128xf32> to vector<8x128xf32>
    %550 = arith.mulf %547, %549 : vector<8x128xf32>
    %551 = vector.extract_strided_slice %502 {offsets = [0, 6], sizes = [8, 1], strides = [1, 1]} : vector<8x25xf32> to vector<8x1xf32>
    %552 = vector.broadcast %551 : vector<8x1xf32> to vector<8x128xf32>
    %553 = arith.mulf %550, %552 : vector<8x128xf32>
    %554 = arith.addf %523, %553 : vector<8x128xf32>
    %c16_i32_247 = arith.constant 16 : i32
    %555 = tpu.dynamic_rotate %501 by %c16_i32_247 dim 1 : vector<8x128xf32>, i32 -> vector<8x128xf32>
    %c1_248 = arith.constant 1 : index
    %c0_249 = arith.constant 0 : index
    %c0_250 = arith.constant 0 : index
    %556 = vector.load %arg3[%c1_248, %c0_249, %c0_250] : memref<33x8x128xf32, #tpu.memory_space<vmem>>, vector<1x8x128xf32>
    %557 = vector.shape_cast %556 : vector<1x8x128xf32> to vector<8x128xf32>
    %558 = arith.mulf %555, %557 : vector<8x128xf32>
    %559 = vector.extract_strided_slice %502 {offsets = [0, 7], sizes = [8, 1], strides = [1, 1]} : vector<8x25xf32> to vector<8x1xf32>
    %560 = vector.broadcast %559 : vector<8x1xf32> to vector<8x128xf32>
    %561 = arith.mulf %558, %560 : vector<8x128xf32>
    %562 = arith.addf %530, %561 : vector<8x128xf32>
    %c14_i32_251 = arith.constant 14 : i32
    %563 = tpu.dynamic_rotate %501 by %c14_i32_251 dim 1 : vector<8x128xf32>, i32 -> vector<8x128xf32>
    %c2_252 = arith.constant 2 : index
    %c0_253 = arith.constant 0 : index
    %c0_254 = arith.constant 0 : index
    %564 = vector.load %arg3[%c2_252, %c0_253, %c0_254] : memref<33x8x128xf32, #tpu.memory_space<vmem>>, vector<1x8x128xf32>
    %565 = vector.shape_cast %564 : vector<1x8x128xf32> to vector<8x128xf32>
    %566 = arith.mulf %563, %565 : vector<8x128xf32>
    %567 = vector.extract_strided_slice %502 {offsets = [0, 8], sizes = [8, 1], strides = [1, 1]} : vector<8x25xf32> to vector<8x1xf32>
    %568 = vector.broadcast %567 : vector<8x1xf32> to vector<8x128xf32>
    %569 = arith.mulf %566, %568 : vector<8x128xf32>
    %570 = arith.addf %538, %569 : vector<8x128xf32>
    %c12_i32_255 = arith.constant 12 : i32
    %571 = tpu.dynamic_rotate %501 by %c12_i32_255 dim 1 : vector<8x128xf32>, i32 -> vector<8x128xf32>
    %c23_256 = arith.constant 23 : index
    %c0_257 = arith.constant 0 : index
    %c0_258 = arith.constant 0 : index
    %572 = vector.load %arg3[%c23_256, %c0_257, %c0_258] : memref<33x8x128xf32, #tpu.memory_space<vmem>>, vector<1x8x128xf32>
    %573 = vector.shape_cast %572 : vector<1x8x128xf32> to vector<8x128xf32>
    %574 = arith.mulf %571, %573 : vector<8x128xf32>
    %575 = vector.extract_strided_slice %502 {offsets = [0, 9], sizes = [8, 1], strides = [1, 1]} : vector<8x25xf32> to vector<8x1xf32>
    %576 = vector.broadcast %575 : vector<8x1xf32> to vector<8x128xf32>
    %577 = arith.mulf %574, %576 : vector<8x128xf32>
    %578 = arith.addf %546, %577 : vector<8x128xf32>
    %c4_i32_259 = arith.constant 4 : i32
    %579 = tpu.dynamic_rotate %501 by %c4_i32_259 dim 1 : vector<8x128xf32>, i32 -> vector<8x128xf32>
    %c24_260 = arith.constant 24 : index
    %c0_261 = arith.constant 0 : index
    %c0_262 = arith.constant 0 : index
    %580 = vector.load %arg3[%c24_260, %c0_261, %c0_262] : memref<33x8x128xf32, #tpu.memory_space<vmem>>, vector<1x8x128xf32>
    %581 = vector.shape_cast %580 : vector<1x8x128xf32> to vector<8x128xf32>
    %582 = arith.mulf %579, %581 : vector<8x128xf32>
    %583 = vector.extract_strided_slice %502 {offsets = [0, 10], sizes = [8, 1], strides = [1, 1]} : vector<8x25xf32> to vector<8x1xf32>
    %584 = vector.broadcast %583 : vector<8x1xf32> to vector<8x128xf32>
    %585 = arith.mulf %582, %584 : vector<8x128xf32>
    %586 = arith.addf %554, %585 : vector<8x128xf32>
    %c2_i32_263 = arith.constant 2 : i32
    %587 = tpu.dynamic_rotate %501 by %c2_i32_263 dim 1 : vector<8x128xf32>, i32 -> vector<8x128xf32>
    %c3_264 = arith.constant 3 : index
    %c0_265 = arith.constant 0 : index
    %c0_266 = arith.constant 0 : index
    %588 = vector.load %arg3[%c3_264, %c0_265, %c0_266] : memref<33x8x128xf32, #tpu.memory_space<vmem>>, vector<1x8x128xf32>
    %589 = vector.shape_cast %588 : vector<1x8x128xf32> to vector<8x128xf32>
    %590 = arith.mulf %587, %589 : vector<8x128xf32>
    %591 = vector.extract_strided_slice %502 {offsets = [0, 11], sizes = [8, 1], strides = [1, 1]} : vector<8x25xf32> to vector<8x1xf32>
    %592 = vector.broadcast %591 : vector<8x1xf32> to vector<8x128xf32>
    %593 = arith.mulf %590, %592 : vector<8x128xf32>
    %594 = arith.addf %562, %593 : vector<8x128xf32>
    %595 = vector.extract_strided_slice %502 {offsets = [0, 12], sizes = [8, 1], strides = [1, 1]} : vector<8x25xf32> to vector<8x1xf32>
    %596 = vector.broadcast %595 : vector<8x1xf32> to vector<8x128xf32>
    %597 = arith.mulf %501, %596 : vector<8x128xf32>
    %598 = arith.addf %570, %597 : vector<8x128xf32>
    %c126_i32_267 = arith.constant 126 : i32
    %599 = tpu.dynamic_rotate %501 by %c126_i32_267 dim 1 : vector<8x128xf32>, i32 -> vector<8x128xf32>
    %c5_268 = arith.constant 5 : index
    %c0_269 = arith.constant 0 : index
    %c0_270 = arith.constant 0 : index
    %600 = vector.load %arg3[%c5_268, %c0_269, %c0_270] : memref<33x8x128xf32, #tpu.memory_space<vmem>>, vector<1x8x128xf32>
    %601 = vector.shape_cast %600 : vector<1x8x128xf32> to vector<8x128xf32>
    %602 = arith.mulf %599, %601 : vector<8x128xf32>
    %603 = vector.extract_strided_slice %502 {offsets = [0, 13], sizes = [8, 1], strides = [1, 1]} : vector<8x25xf32> to vector<8x1xf32>
    %604 = vector.broadcast %603 : vector<8x1xf32> to vector<8x128xf32>
    %605 = arith.mulf %602, %604 : vector<8x128xf32>
    %606 = arith.addf %578, %605 : vector<8x128xf32>
    %c124_i32_271 = arith.constant 124 : i32
    %607 = tpu.dynamic_rotate %501 by %c124_i32_271 dim 1 : vector<8x128xf32>, i32 -> vector<8x128xf32>
    %c25_272 = arith.constant 25 : index
    %c0_273 = arith.constant 0 : index
    %c0_274 = arith.constant 0 : index
    %608 = vector.load %arg3[%c25_272, %c0_273, %c0_274] : memref<33x8x128xf32, #tpu.memory_space<vmem>>, vector<1x8x128xf32>
    %609 = vector.shape_cast %608 : vector<1x8x128xf32> to vector<8x128xf32>
    %610 = arith.mulf %607, %609 : vector<8x128xf32>
    %611 = vector.extract_strided_slice %502 {offsets = [0, 14], sizes = [8, 1], strides = [1, 1]} : vector<8x25xf32> to vector<8x1xf32>
    %612 = vector.broadcast %611 : vector<8x1xf32> to vector<8x128xf32>
    %613 = arith.mulf %610, %612 : vector<8x128xf32>
    %614 = arith.addf %586, %613 : vector<8x128xf32>
    %c116_i32_275 = arith.constant 116 : i32
    %615 = tpu.dynamic_rotate %501 by %c116_i32_275 dim 1 : vector<8x128xf32>, i32 -> vector<8x128xf32>
    %c26_276 = arith.constant 26 : index
    %c0_277 = arith.constant 0 : index
    %c0_278 = arith.constant 0 : index
    %616 = vector.load %arg3[%c26_276, %c0_277, %c0_278] : memref<33x8x128xf32, #tpu.memory_space<vmem>>, vector<1x8x128xf32>
    %617 = vector.shape_cast %616 : vector<1x8x128xf32> to vector<8x128xf32>
    %618 = arith.mulf %615, %617 : vector<8x128xf32>
    %619 = vector.extract_strided_slice %502 {offsets = [0, 15], sizes = [8, 1], strides = [1, 1]} : vector<8x25xf32> to vector<8x1xf32>
    %620 = vector.broadcast %619 : vector<8x1xf32> to vector<8x128xf32>
    %621 = arith.mulf %618, %620 : vector<8x128xf32>
    %622 = arith.addf %594, %621 : vector<8x128xf32>
    %c114_i32_279 = arith.constant 114 : i32
    %623 = tpu.dynamic_rotate %501 by %c114_i32_279 dim 1 : vector<8x128xf32>, i32 -> vector<8x128xf32>
    %c6_280 = arith.constant 6 : index
    %c0_281 = arith.constant 0 : index
    %c0_282 = arith.constant 0 : index
    %624 = vector.load %arg3[%c6_280, %c0_281, %c0_282] : memref<33x8x128xf32, #tpu.memory_space<vmem>>, vector<1x8x128xf32>
    %625 = vector.shape_cast %624 : vector<1x8x128xf32> to vector<8x128xf32>
    %626 = arith.mulf %623, %625 : vector<8x128xf32>
    %627 = vector.extract_strided_slice %502 {offsets = [0, 16], sizes = [8, 1], strides = [1, 1]} : vector<8x25xf32> to vector<8x1xf32>
    %628 = vector.broadcast %627 : vector<8x1xf32> to vector<8x128xf32>
    %629 = arith.mulf %626, %628 : vector<8x128xf32>
    %630 = arith.addf %598, %629 : vector<8x128xf32>
    %c112_i32_283 = arith.constant 112 : i32
    %631 = tpu.dynamic_rotate %501 by %c112_i32_283 dim 1 : vector<8x128xf32>, i32 -> vector<8x128xf32>
    %c7_284 = arith.constant 7 : index
    %c0_285 = arith.constant 0 : index
    %c0_286 = arith.constant 0 : index
    %632 = vector.load %arg3[%c7_284, %c0_285, %c0_286] : memref<33x8x128xf32, #tpu.memory_space<vmem>>, vector<1x8x128xf32>
    %633 = vector.shape_cast %632 : vector<1x8x128xf32> to vector<8x128xf32>
    %634 = arith.mulf %631, %633 : vector<8x128xf32>
    %635 = vector.extract_strided_slice %502 {offsets = [0, 17], sizes = [8, 1], strides = [1, 1]} : vector<8x25xf32> to vector<8x1xf32>
    %636 = vector.broadcast %635 : vector<8x1xf32> to vector<8x128xf32>
    %637 = arith.mulf %634, %636 : vector<8x128xf32>
    %638 = arith.addf %606, %637 : vector<8x128xf32>
    %c110_i32_287 = arith.constant 110 : i32
    %639 = tpu.dynamic_rotate %501 by %c110_i32_287 dim 1 : vector<8x128xf32>, i32 -> vector<8x128xf32>
    %c8_288 = arith.constant 8 : index
    %c0_289 = arith.constant 0 : index
    %c0_290 = arith.constant 0 : index
    %640 = vector.load %arg3[%c8_288, %c0_289, %c0_290] : memref<33x8x128xf32, #tpu.memory_space<vmem>>, vector<1x8x128xf32>
    %641 = vector.shape_cast %640 : vector<1x8x128xf32> to vector<8x128xf32>
    %642 = arith.mulf %639, %641 : vector<8x128xf32>
    %643 = vector.extract_strided_slice %502 {offsets = [0, 18], sizes = [8, 1], strides = [1, 1]} : vector<8x25xf32> to vector<8x1xf32>
    %644 = vector.broadcast %643 : vector<8x1xf32> to vector<8x128xf32>
    %645 = arith.mulf %642, %644 : vector<8x128xf32>
    %646 = arith.addf %614, %645 : vector<8x128xf32>
    %c108_i32_291 = arith.constant 108 : i32
    %647 = tpu.dynamic_rotate %501 by %c108_i32_291 dim 1 : vector<8x128xf32>, i32 -> vector<8x128xf32>
    %c27_292 = arith.constant 27 : index
    %c0_293 = arith.constant 0 : index
    %c0_294 = arith.constant 0 : index
    %648 = vector.load %arg3[%c27_292, %c0_293, %c0_294] : memref<33x8x128xf32, #tpu.memory_space<vmem>>, vector<1x8x128xf32>
    %649 = vector.shape_cast %648 : vector<1x8x128xf32> to vector<8x128xf32>
    %650 = arith.mulf %647, %649 : vector<8x128xf32>
    %651 = vector.extract_strided_slice %502 {offsets = [0, 19], sizes = [8, 1], strides = [1, 1]} : vector<8x25xf32> to vector<8x1xf32>
    %652 = vector.broadcast %651 : vector<8x1xf32> to vector<8x128xf32>
    %653 = arith.mulf %650, %652 : vector<8x128xf32>
    %654 = arith.addf %622, %653 : vector<8x128xf32>
    %c100_i32_295 = arith.constant 100 : i32
    %655 = tpu.dynamic_rotate %501 by %c100_i32_295 dim 1 : vector<8x128xf32>, i32 -> vector<8x128xf32>
    %c28_296 = arith.constant 28 : index
    %c0_297 = arith.constant 0 : index
    %c0_298 = arith.constant 0 : index
    %656 = vector.load %arg3[%c28_296, %c0_297, %c0_298] : memref<33x8x128xf32, #tpu.memory_space<vmem>>, vector<1x8x128xf32>
    %657 = vector.shape_cast %656 : vector<1x8x128xf32> to vector<8x128xf32>
    %658 = arith.mulf %655, %657 : vector<8x128xf32>
    %659 = vector.extract_strided_slice %502 {offsets = [0, 20], sizes = [8, 1], strides = [1, 1]} : vector<8x25xf32> to vector<8x1xf32>
    %660 = vector.broadcast %659 : vector<8x1xf32> to vector<8x128xf32>
    %661 = arith.mulf %658, %660 : vector<8x128xf32>
    %662 = arith.addf %630, %661 : vector<8x128xf32>
    %c98_i32_299 = arith.constant 98 : i32
    %663 = tpu.dynamic_rotate %501 by %c98_i32_299 dim 1 : vector<8x128xf32>, i32 -> vector<8x128xf32>
    %c29_300 = arith.constant 29 : index
    %c0_301 = arith.constant 0 : index
    %c0_302 = arith.constant 0 : index
    %664 = vector.load %arg3[%c29_300, %c0_301, %c0_302] : memref<33x8x128xf32, #tpu.memory_space<vmem>>, vector<1x8x128xf32>
    %665 = vector.shape_cast %664 : vector<1x8x128xf32> to vector<8x128xf32>
    %666 = arith.mulf %663, %665 : vector<8x128xf32>
    %667 = vector.extract_strided_slice %502 {offsets = [0, 21], sizes = [8, 1], strides = [1, 1]} : vector<8x25xf32> to vector<8x1xf32>
    %668 = vector.broadcast %667 : vector<8x1xf32> to vector<8x128xf32>
    %669 = arith.mulf %666, %668 : vector<8x128xf32>
    %670 = arith.addf %638, %669 : vector<8x128xf32>
    %c96_i32_303 = arith.constant 96 : i32
    %671 = tpu.dynamic_rotate %501 by %c96_i32_303 dim 1 : vector<8x128xf32>, i32 -> vector<8x128xf32>
    %c30_304 = arith.constant 30 : index
    %c0_305 = arith.constant 0 : index
    %c0_306 = arith.constant 0 : index
    %672 = vector.load %arg3[%c30_304, %c0_305, %c0_306] : memref<33x8x128xf32, #tpu.memory_space<vmem>>, vector<1x8x128xf32>
    %673 = vector.shape_cast %672 : vector<1x8x128xf32> to vector<8x128xf32>
    %674 = arith.mulf %671, %673 : vector<8x128xf32>
    %675 = vector.extract_strided_slice %502 {offsets = [0, 22], sizes = [8, 1], strides = [1, 1]} : vector<8x25xf32> to vector<8x1xf32>
    %676 = vector.broadcast %675 : vector<8x1xf32> to vector<8x128xf32>
    %677 = arith.mulf %674, %676 : vector<8x128xf32>
    %678 = arith.addf %646, %677 : vector<8x128xf32>
    %c94_i32_307 = arith.constant 94 : i32
    %679 = tpu.dynamic_rotate %501 by %c94_i32_307 dim 1 : vector<8x128xf32>, i32 -> vector<8x128xf32>
    %c31_308 = arith.constant 31 : index
    %c0_309 = arith.constant 0 : index
    %c0_310 = arith.constant 0 : index
    %680 = vector.load %arg3[%c31_308, %c0_309, %c0_310] : memref<33x8x128xf32, #tpu.memory_space<vmem>>, vector<1x8x128xf32>
    %681 = vector.shape_cast %680 : vector<1x8x128xf32> to vector<8x128xf32>
    %682 = arith.mulf %679, %681 : vector<8x128xf32>
    %683 = vector.extract_strided_slice %502 {offsets = [0, 23], sizes = [8, 1], strides = [1, 1]} : vector<8x25xf32> to vector<8x1xf32>
    %684 = vector.broadcast %683 : vector<8x1xf32> to vector<8x128xf32>
    %685 = arith.mulf %682, %684 : vector<8x128xf32>
    %686 = arith.addf %654, %685 : vector<8x128xf32>
    %c92_i32_311 = arith.constant 92 : i32
    %687 = tpu.dynamic_rotate %501 by %c92_i32_311 dim 1 : vector<8x128xf32>, i32 -> vector<8x128xf32>
    %c32_312 = arith.constant 32 : index
    %c0_313 = arith.constant 0 : index
    %c0_314 = arith.constant 0 : index
    %688 = vector.load %arg3[%c32_312, %c0_313, %c0_314] : memref<33x8x128xf32, #tpu.memory_space<vmem>>, vector<1x8x128xf32>
    %689 = vector.shape_cast %688 : vector<1x8x128xf32> to vector<8x128xf32>
    %690 = arith.mulf %687, %689 : vector<8x128xf32>
    %691 = vector.extract_strided_slice %502 {offsets = [0, 24], sizes = [8, 1], strides = [1, 1]} : vector<8x25xf32> to vector<8x1xf32>
    %692 = vector.broadcast %691 : vector<8x1xf32> to vector<8x128xf32>
    %693 = arith.mulf %690, %692 : vector<8x128xf32>
    %694 = arith.addf %662, %693 : vector<8x128xf32>
    %695 = arith.addf %694, %670 : vector<8x128xf32>
    %696 = arith.addf %678, %686 : vector<8x128xf32>
    %697 = arith.addf %695, %696 : vector<8x128xf32>
    %c0_315 = arith.constant 0 : index
    %c0_316 = arith.constant 0 : index
    %698 = vector.load %arg20[%c0_315, %c0_316] : memref<8x8xf32, #tpu.memory_space<vmem>>, vector<8x8xf32>
    %cst_317 = arith.constant dense<0.000000e+00> : vector<8x128xf32>
    %699 = tpu.matmul %698, %697, %cst_317 {dimension_numbers = #tpu.dot_dimension_numbers<[1], [0], [0], [1], [0, 0, 1, 1], [], []>} : vector<8x8xf32>, vector<8x128xf32>, vector<8x128xf32> -> vector<8x128xf32>
    %c0_318 = arith.constant 0 : index
    %c0_319 = arith.constant 0 : index
    %700 = vector.load %arg21[%c0_318, %c0_319] : memref<8x128xf32, #tpu.memory_space<vmem>>, vector<8x128xf32>
    %701 = arith.addf %699, %700 : vector<8x128xf32>
    %702 = arith.addf %499, %701 : vector<8x128xf32>
    %c0_320 = arith.constant 0 : index
    %c0_321 = arith.constant 0 : index
    %703 = vector.load %arg22[%c0_320, %c0_321] : memref<32x128xf32, #tpu.memory_space<vmem>>, vector<8x128xf32>
    tpu.vector_store %arg22[%c0_320, %c0_321], %161 {strides = array<i32>} : memref<32x128xf32, #tpu.memory_space<vmem>>, vector<8x128xf32>,
    %c8_322 = arith.constant 8 : index
    %c0_323 = arith.constant 0 : index
    %704 = vector.load %arg22[%c8_322, %c0_323] : memref<32x128xf32, #tpu.memory_space<vmem>>, vector<8x128xf32>
    tpu.vector_store %arg22[%c8_322, %c0_323], %298 {strides = array<i32>} : memref<32x128xf32, #tpu.memory_space<vmem>>, vector<8x128xf32>,
    %c16_324 = arith.constant 16 : index
    %c0_325 = arith.constant 0 : index
    %705 = vector.load %arg22[%c16_324, %c0_325] : memref<32x128xf32, #tpu.memory_space<vmem>>, vector<8x128xf32>
    tpu.vector_store %arg22[%c16_324, %c0_325], %299 {strides = array<i32>} : memref<32x128xf32, #tpu.memory_space<vmem>>, vector<8x128xf32>,
    %c24_326 = arith.constant 24 : index
    %c0_327 = arith.constant 0 : index
    %706 = vector.load %arg22[%c24_326, %c0_327] : memref<32x128xf32, #tpu.memory_space<vmem>>, vector<8x128xf32>
    tpu.vector_store %arg22[%c24_326, %c0_327], %702 {strides = array<i32>} : memref<32x128xf32, #tpu.memory_space<vmem>>, vector<8x128xf32>,
    return
  }
  func.func @transform_0(%arg0: i32) -> (i32, i32) {
    %c0_i32 = arith.constant 0 : i32
    %c0_i32_0 = arith.constant 0 : i32
    return %c0_i32, %arg0 : i32, i32
  }
  func.func @transform_1(%arg0: i32) -> (i32, i32) {
    %c0_i32 = arith.constant 0 : i32
    %c0_i32_0 = arith.constant 0 : i32
    return %c0_i32, %arg0 : i32, i32
  }
  func.func @transform_2(%arg0: i32) -> (i32, i32, i32) {
    %c0_i32 = arith.constant 0 : i32
    %c0_i32_0 = arith.constant 0 : i32
    %c0_i32_1 = arith.constant 0 : i32
    %c0_i32_2 = arith.constant 0 : i32
    return %c0_i32, %c0_i32_0, %c0_i32_1 : i32, i32, i32
  }
  func.func @transform_3(%arg0: i32) -> (i32, i32) {
    %c0_i32 = arith.constant 0 : i32
    %c0_i32_0 = arith.constant 0 : i32
    %c0_i32_1 = arith.constant 0 : i32
    return %c0_i32, %c0_i32_0 : i32, i32
  }
  func.func @transform_4(%arg0: i32) -> (i32, i32) {
    %c0_i32 = arith.constant 0 : i32
    %c0_i32_0 = arith.constant 0 : i32
    %c0_i32_1 = arith.constant 0 : i32
    return %c0_i32, %c0_i32_0 : i32, i32
  }
  func.func @transform_5(%arg0: i32) -> (i32, i32) {
    %c0_i32 = arith.constant 0 : i32
    %c0_i32_0 = arith.constant 0 : i32
    %c0_i32_1 = arith.constant 0 : i32
    return %c0_i32, %c0_i32_0 : i32, i32
  }
  func.func @transform_6(%arg0: i32) -> (i32, i32) {
    %c0_i32 = arith.constant 0 : i32
    %c0_i32_0 = arith.constant 0 : i32
    %c0_i32_1 = arith.constant 0 : i32
    return %c0_i32, %c0_i32_0 : i32, i32
  }
  func.func @transform_7(%arg0: i32) -> (i32, i32) {
    %c0_i32 = arith.constant 0 : i32
    %c0_i32_0 = arith.constant 0 : i32
    %c0_i32_1 = arith.constant 0 : i32
    return %c0_i32, %c0_i32_0 : i32, i32
  }
  func.func @transform_8(%arg0: i32) -> (i32, i32) {
    %c0_i32 = arith.constant 0 : i32
    %c0_i32_0 = arith.constant 0 : i32
    %c0_i32_1 = arith.constant 0 : i32
    return %c0_i32, %c0_i32_0 : i32, i32
  }
  func.func @transform_9(%arg0: i32) -> (i32, i32) {
    %c0_i32 = arith.constant 0 : i32
    %c0_i32_0 = arith.constant 0 : i32
    %c0_i32_1 = arith.constant 0 : i32
    return %c0_i32, %c0_i32_0 : i32, i32
  }
  func.func @transform_10(%arg0: i32) -> (i32, i32) {
    %c0_i32 = arith.constant 0 : i32
    %c0_i32_0 = arith.constant 0 : i32
    %c0_i32_1 = arith.constant 0 : i32
    return %c0_i32, %c0_i32_0 : i32, i32
  }
  func.func @transform_11(%arg0: i32) -> (i32, i32) {
    %c0_i32 = arith.constant 0 : i32
    %c0_i32_0 = arith.constant 0 : i32
    %c0_i32_1 = arith.constant 0 : i32
    return %c0_i32, %c0_i32_0 : i32, i32
  }
  func.func @transform_12(%arg0: i32) -> (i32, i32) {
    %c0_i32 = arith.constant 0 : i32
    %c0_i32_0 = arith.constant 0 : i32
    %c0_i32_1 = arith.constant 0 : i32
    return %c0_i32, %c0_i32_0 : i32, i32
  }
  func.func @transform_13(%arg0: i32) -> (i32, i32) {
    %c0_i32 = arith.constant 0 : i32
    %c0_i32_0 = arith.constant 0 : i32
    %c0_i32_1 = arith.constant 0 : i32
    return %c0_i32, %c0_i32_0 : i32, i32
  }
  func.func @transform_14(%arg0: i32) -> (i32, i32) {
    %c0_i32 = arith.constant 0 : i32
    %c0_i32_0 = arith.constant 0 : i32
    %c0_i32_1 = arith.constant 0 : i32
    return %c0_i32, %c0_i32_0 : i32, i32
  }
  func.func @transform_15(%arg0: i32) -> (i32, i32) {
    %c0_i32 = arith.constant 0 : i32
    %c0_i32_0 = arith.constant 0 : i32
    %c0_i32_1 = arith.constant 0 : i32
    return %c0_i32, %c0_i32_0 : i32, i32
  }
  func.func @transform_16(%arg0: i32) -> (i32, i32) {
    %c0_i32 = arith.constant 0 : i32
    %c0_i32_0 = arith.constant 0 : i32
    %c0_i32_1 = arith.constant 0 : i32
    return %c0_i32, %c0_i32_0 : i32, i32
  }
  func.func @transform_17(%arg0: i32) -> (i32, i32) {
    %c0_i32 = arith.constant 0 : i32
    %c0_i32_0 = arith.constant 0 : i32
    %c0_i32_1 = arith.constant 0 : i32
    return %c0_i32, %c0_i32_0 : i32, i32
  }
  func.func @transform_18(%arg0: i32) -> (i32, i32) {
    %c0_i32 = arith.constant 0 : i32
    %c0_i32_0 = arith.constant 0 : i32
    %c0_i32_1 = arith.constant 0 : i32
    return %c0_i32, %c0_i32_0 : i32, i32
  }
  func.func @transform_19(%arg0: i32) -> (i32, i32) {
    %c0_i32 = arith.constant 0 : i32
    %c0_i32_0 = arith.constant 0 : i32
    %c0_i32_1 = arith.constant 0 : i32
    return %c0_i32, %c0_i32_0 : i32, i32
  }
  func.func @transform_20(%arg0: i32) -> (i32, i32) {
    %c0_i32 = arith.constant 0 : i32
    %c0_i32_0 = arith.constant 0 : i32
    %c0_i32_1 = arith.constant 0 : i32
    return %c0_i32, %c0_i32_0 : i32, i32
  }
  func.func @transform_21(%arg0: i32) -> (i32, i32) {
    %c0_i32 = arith.constant 0 : i32
    %c0_i32_0 = arith.constant 0 : i32
    return %c0_i32, %arg0 : i32, i32
  }
}

</mosaic_0001>

<bundles_post_ra>
// kernel: _forward.1
= control target key start
LH: loop header
LB: loop body
LE: loop exit
PB: predicated region body
PF: predicated region fallthrough
CT: control target
= control target key end

     0   :  { %s2921_s0 = inlined_call_operand.vmem [shape: f32[8,256], index: 0, kind: input, shape index: {}]   ;;  %s2922_s1 = inlined_call_operand.vmem [shape: f32[8,256], index: 1, kind: input, shape index: {}]   ;;  %s2923_s2 = inlined_call_operand.vmem [shape: f32[33,8,128], index: 2, kind: input, shape index: {}]   ;;  %s2924_s3 = inlined_call_operand.vmem [shape: f32[8,128], index: 3, kind: input, shape index: {}]   ;;  %s2925_s4 = inlined_call_operand.vmem [shape: f32[16,16], index: 4, kind: input, shape index: {}]   ;;  %s2926_s5 = inlined_call_operand.vmem [shape: f32[16,128], index: 5, kind: input, shape index: {}]   ;;  %s2927_s6 = inlined_call_operand.vmem [shape: f32[8,9], index: 6, kind: input, shape index: {}]   ;;  %s2928_s7 = inlined_call_operand.vmem [shape: f32[8,8], index: 7, kind: input, shape index: {}]   ;;  %s2929_s8 = inlined_call_operand.vmem [shape: f32[8,128], index: 8, kind: input, shape index: {}]   ;;  %s2930_s9 = inlined_call_operand.vmem [shape: f32[8,9], index: 9, kind: input, shape index: {}]   ;;  %s2931_s10 = inlined_call_operand.vmem [shape: f32[8,8], index: 10, kind: input, shape index: {}]   ;;  %s2932_s11 = inlined_call_operand.vmem [shape: f32[8,128], index: 11, kind: input, shape index: {}]   ;;  %s2933_s12 = inlined_call_operand.vmem [shape: f32[8,9], index: 12, kind: input, shape index: {}]   ;;  %s2934_s13 = inlined_call_operand.vmem [shape: f32[8,8], index: 13, kind: input, shape index: {}]   ;;  %s2935_s14 = inlined_call_operand.vmem [shape: f32[8,128], index: 14, kind: input, shape index: {}]   ;;  %s2936_s15 = inlined_call_operand.vmem [shape: f32[8,25], index: 15, kind: input, shape index: {}]   ;;  %s2937_s16 = inlined_call_operand.vmem [shape: f32[8,8], index: 16, kind: input, shape index: {}]   ;;  %s2938_s17 = inlined_call_operand.vmem [shape: f32[8,128], index: 17, kind: input, shape index: {}]   ;;  %s2939_s18 = inlined_call_operand.vmem [shape: f32[8,25], index: 18, kind: input, shape index: {}]   ;;  %s2940_s19 = inlined_call_operand.vmem [shape: f32[8,8], index: 19, kind: input, shape index: {}]   ;;  %s2941_s20 = inlined_call_operand.vmem [shape: f32[8,128], index: 20, kind: input, shape index: {}]   ;;  %s2942_s21 = inlined_call_operand.vmem [shape: f32[32,256], index: 21, kind: output, shape index: {}]  }
   0x1   :  { %2998 = sst [smem:[#allocation19_spill]] %s2921_s0 }
   0x2   :  { %2999 = sst [smem:[#allocation20_spill]] %s2922_s1 }
   0x3   :  { %3000 = sst [smem:[#allocation21_spill]] %s2923_s2 }
   0x4   :  { %3001 = sst [smem:[#allocation22_spill]] %s2925_s4 }
   0x5   :  { %3002 = sst [smem:[#allocation23_spill]] %s2926_s5 }
   0x6   :  { %3003 = sst [smem:[#allocation24_spill]] %s2927_s6 }
   0x7   :  { %s2093_s2 = smov 0   ;;  %s2095_s25 = smov 0  }
   0x8   :  { %s2097_s26 = smov 0  }
   0x9 LB: > { %3004 = sst [smem:[#allocation3_spill]] %s1920_s25  ;;  %s2106_s27 = sadd.s32 4294967295, %s1924_s26   ;;  %s1924_s26 = sphi %s2097_s26, %s3086_s26   ;;  %s1920_s25 = sphi %s2095_s25, %s3085_s25   ;;  %s1916_s2 = sphi %s2093_s2, %s3084_s2  }
   0xa   : > { %s2108_s3 = sadd.s32 1, %s1924_s26   ;;  %s489_s29 = sadd.s32 1, %s1920_s25 }
   0xb   : > { %s486_s28 = ssub.s32 %s1924_s26, %s2108_s3  ;;  %p499_p1 = scmp.ne.s32.totalorder %s1920_s25, %s1916_s2 }
   0xc   : > { %p487_p0 = scmp.eq.s32.totalorder %s486_s28, 0  ;;  %p500_p2 = scmp.eq.s32.totalorder %s2106_s27, 1 }
   0xd   : > { %p1698_p3 = scmp.ge.s32.totalorder %s1924_s26, 1  ;;  %p595_p5 = scmp.lt.s32.totalorder %s1924_s26, 3 }
   0xe   : > { %s2116_s0 = scalar_select %p487_p0, %s1920_s25, %s489_s29  }
   0xf   : > { %p2118_p4 = por %p500_p2, %p499_p1  ;;  %p596_p6 = pnand %p1698_p3, %p595_p5 }
  0x10   : > { %3005 = sst [smem:[#allocation4_spill]] %s2116_s0 }
  0x11   : > { %599 = sbr.rel (%p596_p6) target bundleno = 979 (0x3d3), region = 104 }
  0x16   : > { %s3007_s6 = sld [smem:[#allocation24_spill]]  ;;  %p657_p7 = scmp.lt.s32.totalorder %s2106_s27, 1  ;;  %v1926_v1 = vmov 1   ;;  %v1927_v2 = vmov 2   ;;  %v1928_v7 = vmov 0   ;;  %vm673_vm0 = vcmask 130048  }
  0x17   : > { %1826 = vset.pattern.permute.xlu1 %v1926_v1  ;;  %1827 = vset.pattern.permute.xlu2 %v1927_v2  ;;  %s3008_s26 = sld [smem:[#allocation20_spill]]  ;;  %v2979_v9 = vmov 7   ;;  %v2976_v10 = vmov 3   ;;  %v2980_v11 = vmov 4   ;;  %v825_v12 = vld [vmem:[%s2930_s9] sm:$0xff]  ;;  %v1932_v14 = vmov 5  }
  0x18   : > { %s658_s22 = scalar_select %p657_p7, %s2106_s27, 1  ;;  %1825 = vset.pattern.permute.xlu0 %v1928_v7  ;;  %v2977_v15 = vmov 8   ;;  %v2981_v16 = vmov 6   ;;  %v986_v17 = vld [vmem:[%s2933_s12] sm:$0xff]  ;;  %v2975_v42 = vmov 10   ;;  %v2963_v46 = vmov 14  }
  0x19   : > { %s3009_s5 = sld [smem:[#allocation19_spill]]  ;;  %v2177_v18 = vld [vmem:[%s2936_s15] sm:$0xff]  ;;  %s2948_s24 = smov 126   ;;  %v2961_v50 = vmov 18   ;;  %v2967_v51 = vmov 12   ;;  %v2960_v56 = vmov 22  }
  0x1a   : > { %s1700_s23 = sshll.u32 %s658_s22, 3  ;;  %s3010_s22 = sld [smem:[#allocation22_spill]]  ;;  %v2964_v61 = vmov 15   ;;  %vm800_vm1 = vcmask 64512  }
  0x1b   : > { %s2947_s29 = smov 112   ;;  %s2971_s30 = smov 34  }
  0x1c   : > { %v704_v0 = vld [vmem:[%s3007_s6] sm:$0xff]  ;;  %s2957_s6 = smov 18   ;;  %s2951_s25 = smov 110  }
  0x1d   : > { %721 = vperm.xlu1 %1826, %v704_v0   ;;  %731 = vperm.xlu2 %1827, %v704_v0   ;;  %s664_s28 = scalar_lea.vmem %s3008_s26, %s1700_s23  ;;  %s2953_s26 = smov 16  }
  0x1e   : > { %v667_v3 = vld [vmem:[%s664_s28] sm:$0xff]  ;;  %711 = vperm.xlu0 %1825, %v704_v0   ;;  %s2949_s28 = smov 114   ;;  %s2988_s1 = smov 32  }
  0x1f   : > { %s660_s0 = scalar_lea.vmem %s3009_s5, %s1700_s23  ;;  %v668_v5 = vmax.f32 %v667_v3, 0.0  ;;  %s3011_s5 = sld [smem:[#allocation23_spill]] }
  0x20   : > { %v665_v4 = vld [vmem:[%s660_s0] sm:$0xff]  ;;  %v670_v13 = vld [vmem:[%s3010_s22 + $0x8] sm:$0xff]  ;;  %s2950_s0 = smov 2   ;;  %s2952_s23 = smov 14  }
  0x21   : > { %v666_v6 = vmax.f32 %v665_v4, 0.0  ;;  %694 = vmatpush.msra.mxu0 %v668_v5  ;;  %v669_v8 = vld [vmem:[%s3010_s22] sm:$0xff]  ;;  %v2962_v4 = vmov 17  }
  0x23   : > { %695 = vmatpush.msra.mxu0 %v666_v6 }
  0x24   : > { %1702 = vmatmul.msk.f32.vlgmr.msra.gmra.mxu0 %vm673_vm0, %v669_v8  ;;  %v2974_v8 = vmov 11  }
  0x25   : > { %1832 = vset.pattern.permute.xlu1 %v2979_v9  ;;  %1828 = vset.pattern.permute.xlu2 %v2976_v10  ;;  %v671_v23 = vld [vmem:[%s3011_s5] sm:$0xff]  ;;  %v672_v28 = vld [vmem:[%s3011_s5 + $0x8] sm:$0xff]  ;;  %s3051_s5 = smov 124  }
  0x26   : > { %779 = vperm.xlu1 %1832, %v704_v0   ;;  %741 = vperm.xlu2 %1828, %v704_v0  }
  0x27   : > { %1829 = vset.pattern.permute.xlu0 %v2980_v11 }
  0x28   : > { %746 = vperm.xlu0 %1829, %v704_v0  }
  0x2c   : > { %1703 = vmatmul.msk.f32.gmra.mxu0 %vm673_vm0, %v670_v13 }
  0x2e   : > { %1836 = vset.pattern.permute.xlu1 %v1927_v2  ;;  %1830 = vset.pattern.permute.xlu2 %v1932_v14 }
  0x2f   : > { %847 = vperm.xlu1 %1836, %v825_v12   ;;  %757 = vperm.xlu2 %1830, %v704_v0  }
  0x30   : > { %1833 = vset.pattern.permute.xlu0 %v2977_v15 }
  0x31   : > { %790 = vperm.xlu0 %1833, %v704_v0  }
  0x37   : > { %1838 = vset.pattern.permute.xlu1 %v2980_v11  ;;  %1831 = vset.pattern.permute.xlu2 %v2981_v16 }
  0x38   : > { %860 = vperm.xlu1 %1838, %v825_v12   ;;  %768 = vperm.xlu2 %1831, %v704_v0   ;;  %v2973_v0 = vmov 9  }
  0x39   : > { %1837 = vset.pattern.permute.xlu0 %v2976_v10 }
  0x3a   : > { %855 = vperm.xlu0 %1837, %v825_v12  }
  0x40   : > { %1839 = vset.pattern.permute.xlu1 %v1932_v14  ;;  %1834 = vset.pattern.permute.xlu2 %v1928_v7 }
  0x41   : > { %869 = vperm.xlu1 %1839, %v825_v12   ;;  %831 = vperm.xlu2 %1834, %v825_v12  }
  0x42   : > { %1843 = vset.pattern.permute.xlu0 %v1926_v1 }
  0x43   : > { %994 = vperm.xlu0 %1843, %v986_v17  }
  0x49   : > { %1845 = vset.pattern.permute.xlu1 %v1927_v2  ;;  %1835 = vset.pattern.permute.xlu2 %v1926_v1 }
  0x4a   : > { %999 = vperm.xlu1 %1845, %v986_v17   ;;  %839 = vperm.xlu2 %1835, %v825_v12  }
  0x4b   : > { %1844 = vset.pattern.permute.xlu0 %v2981_v16 }
  0x4c   : > { %878 = vperm.xlu0 %1844, %v825_v12  }
  0x52   : > { %1847 = vset.pattern.permute.xlu1 %v2980_v11  ;;  %1840 = vset.pattern.permute.xlu2 %v2979_v9 }
  0x53   : > { %1009 = vperm.xlu1 %1847, %v986_v17   ;;  %887 = vperm.xlu2 %1840, %v825_v12  }
  0x54   : > { %1021 = vperm.xlu0 %1844, %v986_v17  }
  0x5b   : > { %1849 = vset.pattern.permute.xlu1 %v2979_v9  ;;  %1841 = vset.pattern.permute.xlu2 %v2977_v15 }
  0x5c   : > { %1027 = vperm.xlu1 %1849, %v986_v17   ;;  %896 = vperm.xlu2 %1841, %v825_v12  }
  0x5d   : > { %1853 = vset.pattern.permute.xlu0 %v1927_v2 }
  0x64   : > { %1852 = vset.pattern.permute.xlu1 %v1926_v1  ;;  %1842 = vset.pattern.permute.xlu2 %v1928_v7 }
  0x65   : > { %989 = vperm.xlu2 %1842, %v986_v17   ;;  %1086 = vperm.xlu1 %1852, %v2177_v18  }
  0x6d   : > { %1846 = vset.pattern.permute.xlu2 %v2976_v10  ;;  %1856 = vset.pattern.permute.xlu1 %v1932_v14 }
  0x6e   : > { %1004 = vperm.xlu2 %1846, %v986_v17  }
  0x76   : > { %1848 = vset.pattern.permute.xlu2 %v1932_v14 }
  0x77   : > { %1015 = vperm.xlu2 %1848, %v986_v17   ;;  %v2181_v19 = vpop.permute.xlu2 %731 }
  0x7f   : > { %1850 = vset.pattern.permute.xlu2 %v2977_v15 }
  0x80   : > { %1033 = vperm.xlu2 %1850, %v986_v17   ;;  %v2186_v20 = vpop.permute.xlu2 %741 }
  0x88   : > { %1851 = vset.pattern.permute.xlu2 %v1928_v7 }
  0x89   : > { %1076 = vperm.xlu2 %1851, %v2177_v18   ;;  %v2189_v21 = vpop.permute.xlu2 %757 }
  0x8f   : > { %v2236_v34 = vpop.permute.xlu1 %721 }
  0x90   : > { %v2256_v38 = vpop.permute.xlu0 %711 }
  0x91   : > { %1854 = vset.pattern.permute.xlu2 %v2976_v10 }
  0x92   : > { %v2191_v22 = vpop.permute.xlu2 %768 }
  0x98   : > { %v2245_v36 = vpop.permute.xlu1 %779 }
  0x9a   : > { %v2266_v41 = vpop.permute.xlu0 %746 }
  0x9b   : > { %v2202_v27 = vpop.permute.xlu2 %831 }
  0xa1   : > { %v697_v24 = vpop.f32.mrf.mxu0  ;;  %v2260_v39 = vpop.permute.xlu1 %847 }
  0xa2   : > { %v698_v25 = vadd.f32 %v697_v24, %v671_v23 }
  0xa3   : > { %v2278_v45 = vpop.permute.xlu0 %790 }
  0xa4   : > { %v2196_v26 = vmax.f32 %v698_v25, 0.0  ;;  %v2220_v32 = vpop.permute.xlu2 %839 }
  0xa6   : > { %851 = vrot.lane.b32.xlu2 %v2196_v26, %s2950_s0  ;;  %843 = vrot.lane.b32.xlu0 %v2196_v26, %s2952_s23 }
  0xa7   : > { %826 = vrot.lane.b32.xlu1 %v2196_v26, %s2957_s6 }
  0xa9   : > { %v700_v29 = vpop.f32.mrf.mxu0 }
  0xaa   : > { %v2209_v30 = vadd.f32 %v700_v29, %v672_v28  ;;  %v2274_v43 = vpop.permute.xlu1 %860  ;;  %v2965_v29 = vmov 19  }
  0xac   : > { %v2212_v31 = vmax.f32 %v2209_v30, 0.0  ;;  %v2294_v49 = vpop.permute.xlu0 %855 }
  0xad   : > { %v2228_v33 = vpop.permute.xlu2 %887 }
  0xae   : > { %865 = vrot.lane.b32.xlu2 %v2196_v26, %s2948_s24  ;;  %705 = vrot.lane.b32.xlu0 %v2212_v31, %s2957_s6  ;;  %s3012_s6 = sld [smem:[#allocation21_spill]] }
  0xaf   : > { %835 = vrot.lane.b32.xlu1 %v2196_v26, %s2953_s26 }
  0xb3   : > { %v2285_v47 = vpop.permute.xlu1 %869 }
  0xb4   : > { %v2343_v12 = vld [vmem:[%s3012_s6 + $0x40] sm:$0xff] }
  0xb5   : > { %v2309_v54 = vpop.permute.xlu0 %994  ;;  %3013 = vst [vmem:[#allocation5_spill] sm:$0xff] %v2343_v12  ;;  %v2348_v13 = vld [vmem:[%s3012_s6] sm:$0xff] }
  0xb6   : > { %874 = vrot.lane.b32.xlu2 %v2196_v26, %s2949_s28  ;;  %773 = vrot.lane.b32.xlu0 %v2212_v31, %s2947_s29  ;;  %v2238_v35 = vpop.permute.xlu2 %896 }
  0xb7   : > { %883 = vrot.lane.b32.xlu1 %v2196_v26, %s2947_s29  ;;  %s2958_s29 = smov 20  }
  0xbc   : > { %v2299_v52 = vpop.permute.xlu1 %999 }
  0xbe   : > { %725 = vrot.lane.b32.xlu2 %v2212_v31, %s2952_s23  ;;  %1080 = vrot.lane.b32.xlu0 %v2212_v31, %s2971_s30  ;;  %s2955_s23 = smov 4   ;;  %v2317_v58 = vpop.permute.xlu0 %878  ;;  %s2987_s30 = smov 96  }
  0xbf   : > { %892 = vrot.lane.b32.xlu1 %v2196_v26, %s2951_s25  ;;  %v2251_v37 = vpop.permute.xlu2 %989 }
  0xc5   : > { %v1010_v55 = vpop.permute.xlu1 %1009 }
  0xc6   : > { %784 = vrot.lane.b32.xlu2 %v2212_v31, %s2951_s25  ;;  %1096 = vperm.xlu0 %1853, %v2177_v18   ;;  %s2969_s25 = smov 28   ;;  %v2327_v62 = vpop.permute.xlu0 %1021 }
  0xc7   : > { %715 = vrot.lane.b32.xlu1 %v2212_v31, %s2953_s26  ;;  %s2954_s26 = smov 98  }
  0xc8   : > { %v2264_v40 = vpop.permute.xlu2 %1004 }
  0xce   : > { %1090 = vrot.lane.b32.xlu2 %v2212_v31, %s2988_s1  ;;  %1121 = vrot.lane.b32.xlu0 %v2212_v31, %s2958_s29  ;;  %v2319_v59 = vpop.permute.xlu1 %1027  ;;  %s2984_s29 = smov 92   ;;  %s3052_s1 = smov 16  }
  0xcf   : > { %735 = vrot.lane.b32.xlu1 %v2212_v31, %s2950_s0  ;;  %1858 = vset.pattern.permute.xlu0 %v2979_v9  ;;  %s2959_s0 = smov 12  }
  0xd1   : > { %v2276_v44 = vpop.permute.xlu2 %1015 }
  0xd6   : > { %1106 = vperm.xlu2 %1854, %v2177_v18   ;;  %1139 = vperm.xlu0 %1858, %v2177_v18  }
  0xd7   : > { %751 = vrot.lane.b32.xlu1 %v2212_v31, %s2948_s24  ;;  %s2970_s24 = smov 36   ;;  %v2329_v63 = vpop.permute.xlu1 %1086 }
  0xda   : > { %v2288_v48 = vpop.permute.xlu2 %1033 }
  0xde   : > { %1855 = vset.pattern.permute.xlu2 %v2980_v11  ;;  %1861 = vset.pattern.permute.xlu0 %v2975_v42 }
  0xdf   : > { %762 = vrot.lane.b32.xlu1 %v2212_v31, %s2949_s28  ;;  %1116 = vperm.xlu2 %1855, %v2177_v18   ;;  %s2968_s28 = smov 30  }
  0xe0   : > { %1167 = vperm.xlu0 %1861, %v2177_v18  }
  0xe3   : > { %v2301_v53 = vpop.permute.xlu2 %1076 }
  0xe7   : > { %1069 = vrot.lane.b32.xlu1 %v2212_v31, %s2970_s24  ;;  %1857 = vset.pattern.permute.xlu2 %v2981_v16  ;;  %v863_v16 = vmul.f32 %v2274_v43, %v2196_v26 }
  0xe8   : > { %1865 = vset.pattern.permute.xlu0 %v2963_v46  ;;  %1133 = vperm.xlu2 %1857, %v2177_v18  }
  0xe9   : > { %1196 = vperm.xlu0 %1865, %v2177_v18  }
  0xef   : > { %1100 = vrot.lane.b32.xlu1 %v2212_v31, %s2968_s28  ;;  %s2982_s28 = smov 100  }
  0xf0   : > { %1150 = vrot.lane.b32.xlu2 %v2212_v31, %s2959_s0  ;;  %s2986_s0 = smov 116  }
  0xf1   : > { %1869 = vset.pattern.permute.xlu0 %v2961_v50  ;;  %1863 = vset.pattern.permute.xlu2 %v2967_v51  ;;  %v1012_v50 = vmul.f32 %v1010_v55, %v2212_v31  ;;  %v2972_v51 = vmov 20  }
  0xf2   : > { %1225 = vperm.xlu0 %1869, %v2177_v18  }
  0xf7   : > { %1110 = vrot.lane.b32.xlu1 %v2212_v31, %s2969_s25  ;;  %s1979_s25 = smov 127  }
  0xf8   : > { %1161 = vrot.lane.b32.xlu2 %v2212_v31, %s2955_s23  ;;  %s2985_s23 = smov 108  }
  0xfa   : > { %1252 = vrot.lane.b32.xlu0 %v2212_v31, %s2954_s26  ;;  %s2956_s26 = smov 124  }
  0xfb   : > { %1873 = vset.pattern.permute.xlu0 %v2960_v56  ;;  %v2966_v56 = vmov 13  }
  0xff   : > { %1127 = vperm.xlu1 %1856, %v2177_v18  }
 0x100   : > { %1179 = vperm.xlu2 %1863, %v2177_v18   ;;  %v2314_v57 = vpop.permute.xlu2 %851 }
 0x102   : > { %1269 = vperm.xlu0 %1873, %v2177_v18  }
 0x107   : > { %1859 = vset.pattern.permute.xlu1 %v2977_v15 }
 0x108   : > { %1145 = vperm.xlu1 %1859, %v2177_v18   ;;  %1190 = vrot.lane.b32.xlu2 %v2212_v31, %s2956_s26  ;;  %v866_v60 = vpop.permute.xlu2 %865  ;;  %s2983_s26 = smov 94  }
 0x109   : > { %1866 = vset.pattern.permute.xlu2 %v2964_v61 }
 0x10a   : > { %1877 = vset.pattern.permute.xlu0 %v1926_v1 }
 0x110   : > { %1860 = vset.pattern.permute.xlu1 %v2973_v0  ;;  %1207 = vperm.xlu2 %1866, %v2177_v18   ;;  %v875_v3 = vpop.permute.xlu2 %874  ;;  %v2404_v0 = vld [vmem:[%s3012_s6 + $0x30] sm:$0xff] }
 0x111   : > { %1156 = vperm.xlu1 %1860, %v2177_v18  }
 0x118   : > { %1868 = vset.pattern.permute.xlu2 %v2962_v4  ;;  %v2335_v5 = vpop.permute.xlu2 %725  ;;  %v844_v6 = vpop.permute.xlu0 %843 }
 0x119   : > { %1862 = vset.pattern.permute.xlu1 %v2974_v8  ;;  %v827_v1 = vpop.permute.xlu1 %826  ;;  %1219 = vperm.xlu2 %1868, %v2177_v18  }
 0x11a   : > { %1173 = vperm.xlu1 %1862, %v2177_v18  }
 0x120   : > { %v785_v17 = vpop.permute.xlu2 %784  ;;  %v706_v23 = vpop.permute.xlu0 %705 }
 0x121   : > { %v2351_v24 = vmul.f32 %v2343_v12, %v785_v17  ;;  %v2354_v25 = vmul.f32 %v2348_v13, %v706_v23  ;;  %v836_v28 = vpop.permute.xlu1 %835  ;;  %1870 = vset.pattern.permute.xlu2 %v2965_v29 }
 0x122   : > { %1864 = vset.pattern.permute.xlu1 %v2966_v56  ;;  %1236 = vperm.xlu2 %1870, %v2177_v18   ;;  %v2372_v56 = vld [vmem:[%s3012_s6 + $0x38] sm:$0xff] }
 0x123   : > { %v992_v4 = vmul.f32 %v2251_v37, %v2354_v25  ;;  %1185 = vperm.xlu1 %1864, %v2177_v18   ;;  %v1036_v17 = vmul.f32 %v2288_v48, %v2351_v24  ;;  %v2378_v37 = vld [vmem:[%s3012_s6 + $0x18] sm:$0xff]  ;;  %v2383_v48 = vld [vmem:[%s3012_s6 + $0x10] sm:$0xff] }
 0x124   : > { %v853_v8 = vmul.f32 %v2378_v37, %v2314_v57  ;;  %v845_v42 = vmul.f32 %v2383_v48, %v844_v6 }
 0x125   : > { %v1013_v23 = vadd.f32 %v1012_v50, %v992_v4  ;;  %v2388_v50 = vld [vmem:[%s3012_s6 + $0x8] sm:$0xff] }
 0x126   : > { %v2396_v4 = vld [vmem:[%s3012_s6 + $0x28] sm:$0xff]  ;;  %v837_v10 = vmul.f32 %v2388_v50, %v836_v28  ;;  %v858_v6 = vmul.f32 %v2294_v49, %v853_v8  ;;  %v850_v28 = vmul.f32 %v2260_v39, %v845_v42 }
 0x127   : > { %v2365_v46 = vadd.f32 %v1036_v17, %v1013_v23  ;;  %v828_v17 = vmul.f32 %v827_v1, %v2348_v13  ;;  %v867_v15 = vmul.f32 %v2396_v4, %v866_v60  ;;  %v876_v1 = vmul.f32 %v2404_v0, %v875_v3 }
 0x128   : > { %v1091_v61 = vpop.permute.xlu2 %1090  ;;  %v2367_v29 = vpop.permute.xlu0 %773  ;;  %v842_v60 = vmul.f32 %v2220_v32, %v837_v10 }
 0x129   : > { %v884_v55 = vpop.permute.xlu1 %883 }
 0x12a   : > { %1871 = vset.pattern.permute.xlu2 %v2972_v51  ;;  %v885_v23 = vmul.f32 %v2372_v56, %v884_v55  ;;  %v2978_v51 = vmov 16   ;;  %v834_v55 = vmul.f32 %v2202_v27, %v828_v17  ;;  %v872_v27 = vmul.f32 %v2285_v47, %v867_v15 }
 0x12b   : > { %1201 = vrot.lane.b32.xlu1 %v2212_v31, %s2986_s0  ;;  %1247 = vperm.xlu2 %1871, %v2177_v18   ;;  %s1978_s0 = smov 121  }
 0x12c   : > { %1867 = vset.pattern.permute.xlu1 %v2978_v51  ;;  %v890_v51 = vmul.f32 %v2228_v33, %v885_v23  ;;  %v881_v33 = vmul.f32 %v2317_v58, %v876_v1  ;;  %v864_v26 = vadd.f32 %v863_v16, %v834_v55  ;;  %v873_v8 = vadd.f32 %v872_v27, %v842_v60 }
 0x12d   : > { %v1969_v16 = vmov 21  }
 0x12e   : > { %v891_v49 = vadd.f32 %v890_v51, %v858_v6  ;;  %v882_v39 = vadd.f32 %v881_v33, %v850_v28 }
 0x130   : > { %v2414_v9 = vpop.permute.xlu0 %1080  ;;  %v2416_v11 = vpop.permute.xlu2 %1106  ;;  %v902_v17 = vadd.f32 %v891_v49, %v882_v39  ;;  %v714_v49 = vmul.f32 %v2256_v38, %v2354_v25 }
 0x131   : > { %v893_v57 = vpop.permute.xlu1 %892 }
 0x132   : > { %v894_v3 = vmul.f32 %v2343_v12, %v893_v57  ;;  %v904_v57 = vld [vmem:[%s2931_s10] sm:$0xff] }
 0x133   : > { %1213 = vperm.xlu1 %1867, %v2177_v18   ;;  %1263 = vrot.lane.b32.xlu2 %v2212_v31, %s2987_s30  ;;  %s1976_s30 = smov 8  }
 0x134   : > { %v899_v43 = vmul.f32 %v2238_v35, %v894_v3  ;;  %v2442_v35 = vld [vmem:[%s3012_s6 + $0x98] sm:$0xff] }
 0x135   : > { %v1094_v58 = vmul.f32 %v2442_v35, %v1091_v61  ;;  %v1971_v61 = vmov 23  }
 0x136   : > { %v900_v42 = vadd.f32 %v899_v43, %v864_v26  ;;  %1874 = vset.pattern.permute.xlu2 %v1971_v61  ;;  %v2461_v43 = vmul.f32 %v2383_v48, %v2335_v5 }
 0x138   : > { %v1097_v10 = vpop.permute.xlu0 %1096  ;;  %v901_v32 = vadd.f32 %v900_v42, %v873_v8  ;;  %v2468_v8 = vmul.f32 %v2372_v56, %v2367_v29  ;;  %v1002_v38 = vmul.f32 %v2299_v52, %v2461_v43  ;;  %v2487_v29 = vld [vmem:[%s3012_s6 + $0xc0] sm:$0xff] }
 0x139   : > { %v716_v23 = vpop.permute.xlu1 %715  ;;  %v2430_v15 = vpop.permute.xlu2 %1116  ;;  %v1099_v6 = vmul.f32 %v1097_v10, %v1094_v58  ;;  %v749_v10 = vmul.f32 %v2266_v41, %v2212_v31  ;;  %v793_v41 = vmul.f32 %v2278_v45, %v2351_v24 }
 0x13a   : > { %v903_v47 = vadd.f32 %v902_v17, %v901_v32  ;;  %v719_v39 = vmul.f32 %v2388_v50, %v716_v23  ;;  %v734_v32 = vmul.f32 %v2181_v19, %v2461_v43 }
 0x13b   : > { %1230 = vrot.lane.b32.xlu1 %v2212_v31, %s2985_s23  ;;  %1280 = vperm.xlu2 %1874, %v2177_v18   ;;  %v750_v23 = vadd.f32 %v749_v10, %v714_v49  ;;  %s654_s23 = sand.u32 1, %s1916_s2   ;;  %s1977_s2 = smov 9  }
 0x13c   : > { %924 = vmatpush.msra.mxu2 %v903_v47  ;;  %1872 = vset.pattern.permute.xlu1 %v1969_v16  ;;  %v724_v17 = vmul.f32 %v2236_v34, %v719_v39  ;;  %v997_v52 = vmul.f32 %v2309_v54, %v719_v39 }
 0x13d   : > { %1712 = vmatmul.msk.f32.vlgmr.msra.gmra.mxu2 %vm800_vm1, %v904_v57 }
 0x140   : > { %v2444_v51 = vpop.permute.xlu0 %1121 }
 0x141   : > { %v736_v1 = vpop.permute.xlu1 %735 }
 0x142   : > { %v1134_v55 = vpop.permute.xlu2 %1133  ;;  %v2472_v42 = vmul.f32 %v2378_v37, %v736_v1 }
 0x143   : > { %v1136_v28 = vmul.f32 %v1134_v55, %v2354_v25  ;;  %1241 = vrot.lane.b32.xlu1 %v2212_v31, %s2982_s28  ;;  %v2990_v55 = vmov 24   ;;  %s1699_s28 = sshll.u32 %s654_s23, 5  ;;  %s1980_s23 = smov 1  }
 0x144   : > { %v1007_v47 = vmul.f32 %v2264_v40, %v2472_v42  ;;  %1875 = vset.pattern.permute.xlu2 %v2990_v55  ;;  %s2693_s24 = scalar_lea.vmem [#allocation2], %s1699_s28  ;;  %s3045_s28 = smov 36  }
 0x145   : > { %v1137_v60 = vadd.f32 %v1136_v28, %v1099_v6  ;;  %v794_v6 = vadd.f32 %v793_v41, %v750_v23  ;;  %1291 = vperm.xlu2 %1875, %v2177_v18   ;;  %v2535_v41 = vld [vmem:[%s3012_s6 + $0x88] sm:$0xff] }
 0x148   : > { %v2450_v27 = vpop.permute.xlu0 %1139 }
 0x149   : > { %v752_v3 = vpop.permute.xlu1 %751 }
 0x14a   : > { %v2452_v33 = vpop.permute.xlu2 %1150  ;;  %v2455_v26 = vmul.f32 %v2396_v4, %v752_v3 }
 0x14b   : > { %1258 = vperm.xlu1 %1872, %v2177_v18   ;;  %v2527_v18 = vld [vmem:[%s3012_s6 + $0xa0] sm:$0xff] }
 0x14c   : > { %v760_v5 = vmul.f32 %v2189_v21, %v2455_v26  ;;  %v1018_v25 = vmul.f32 %v2276_v44, %v2455_v26  ;;  %v782_v21 = vmul.f32 %v2245_v36, %v2468_v8  ;;  %v744_v44 = vmul.f32 %v2186_v20, %v2472_v42 }
 0x14d   : > { %v1030_v36 = vmul.f32 %v2319_v59, %v2468_v8  ;;  %1878 = vset.pattern.permute.xlu2 %v1927_v2  ;;  %v2542_v2 = vld [vmem:[%s3012_s6 + $0xa8] sm:$0xff] }
 0x14e   : > { %v761_v54 = vadd.f32 %v760_v5, %v724_v17  ;;  %v1019_v1 = vadd.f32 %v1018_v25, %v997_v52  ;;  %v783_v3 = vadd.f32 %v782_v21, %v744_v44 }
 0x14f   : > { %v1031_v10 = vadd.f32 %v1030_v36, %v1007_v47 }
 0x151   : > { %v763_v19 = vpop.permute.xlu1 %762 }
 0x152   : > { %v2500_v57 = vmul.f32 %v2404_v0, %v763_v19  ;;  %v1162_v58 = vpop.permute.xlu2 %1161  ;;  %v1168_v45 = vpop.permute.xlu0 %1167 }
 0x153   : > { %v1165_v34 = vmul.f32 %v2487_v29, %v1162_v58  ;;  %1274 = vrot.lane.b32.xlu1 %v2212_v31, %s2983_s26  ;;  %s1975_s26 = smov 7  }
 0x154   : > { %v771_v20 = vmul.f32 %v2191_v22, %v2500_v57  ;;  %v1024_v40 = vmul.f32 %v2327_v62, %v2500_v57  ;;  %1876 = vset.pattern.permute.xlu1 %v1928_v7  ;;  %v795_v22 = vadd.f32 %v794_v6, %v761_v54  ;;  %v1038_v62 = vadd.f32 %v2365_v46, %v1019_v1  ;;  %v798_v7 = vld [vmem:[%s2928_s7] sm:$0xff] }
 0x155   : > { %v1170_v59 = vmul.f32 %v1168_v45, %v1165_v34  ;;  %v2556_v45 = vld [vmem:[%s3012_s6 + $0xb0] sm:$0xff] }
 0x156   : > { %v772_v28 = vadd.f32 %v771_v20, %v734_v32  ;;  %v1025_v49 = vadd.f32 %v1024_v40, %v1002_v38  ;;  %v1142_v32 = vmul.f32 %v2450_v27, %v719_v39  ;;  %v1125_v54 = vmul.f32 %v2556_v45, %v2444_v51 }
 0x157   : > { %v2514_v5 = vadd.f32 %v1170_v59, %v1137_v60 }
 0x158   : > { %v796_v17 = vadd.f32 %v783_v3, %v772_v28  ;;  %v1039_v25 = vadd.f32 %v1031_v10, %v1025_v49  ;;  %v2569_v28 = vld [vmem:[%s3012_s6 + $0xb8] sm:$0xff]  ;;  %v3014_v10 = vmov 6  }
 0x159   : > { %v1070_v19 = vpop.permute.xlu1 %1069 }
 0x15a   : > { %v797_v52 = vadd.f32 %v796_v17, %v795_v22  ;;  %v1040_v58 = vadd.f32 %v1039_v25, %v1038_v62  ;;  %v1073_v23 = vmul.f32 %v2535_v41, %v1070_v19  ;;  %v2576_v51 = vpop.permute.xlu2 %1179  ;;  %v3015_v22 = vmov 4  }
 0x15b   : > { %1285 = vrot.lane.b32.xlu1 %v2212_v31, %s2984_s29  ;;  %v3016_v62 = vmov 7   ;;  %v3017_v25 = vmov 8   ;;  %v3018_v19 = vmov 3   ;;  %s1982_s29 = smov 119  }
 0x15c   : > { %819 = vmatpush.msra.mxu1 %v797_v52  ;;  %1061 = vmatpush.msra.mxu3 %v1040_v58  ;;  %v1079_v27 = vmul.f32 %v2301_v53, %v1073_v23  ;;  %v3019_v58 = vmov 10  }
 0x15d   : > { %1711 = vmatmul.msk.f32.vlgmr.msra.gmra.mxu1 %vm800_vm1, %v798_v7  ;;  %v3020_v7 = vmov 11  }
 0x161   : > { %v1101_v46 = vpop.permute.xlu1 %1100 }
 0x162   : > { %v1104_v60 = vmul.f32 %v2527_v18, %v1101_v46  ;;  %v1191_v17 = vpop.permute.xlu2 %1190 }
 0x164   : > { %v1109_v38 = vmul.f32 %v2416_v11, %v1104_v60  ;;  %v2549_v11 = vld [vmem:[%s3012_s6 + $0x90] sm:$0xff]  ;;  %v3021_v60 = vmov 9  }
 0x165   : > { %v1084_v36 = vmul.f32 %v2549_v11, %v2414_v9  ;;  %v2574_v9 = vld [vmem:[%s2939_s18] sm:$0xff] }
 0x166   : > { %v2537_v21 = vadd.f32 %v1142_v32, %v1109_v38  ;;  %1331 = vperm.xlu1 %1876, %v2574_v9   ;;  %1347 = vperm.xlu2 %1878, %v2574_v9   ;;  %v3022_v38 = vmov 12  }
 0x167   : > { %v1089_v40 = vmul.f32 %v2329_v63, %v1084_v36  ;;  %v1154_v63 = vmul.f32 %v2569_v28, %v2452_v33  ;;  %1339 = vperm.xlu0 %1877, %v2574_v9  }
 0x169   : > { %v1111_v44 = vpop.permute.xlu1 %1110 }
 0x16a   : > { %v1114_v47 = vmul.f32 %v2542_v2, %v1111_v44  ;;  %v3023_v44 = vmov 15  }
 0x16c   : > { %v1119_v39 = vmul.f32 %v2430_v15, %v1114_v47  ;;  %v3024_v47 = vmov 13  }
 0x16e   : > { %v1120_v34 = vadd.f32 %v1119_v39, %v1079_v27  ;;  %1881 = vset.pattern.permute.xlu1 %v1932_v14  ;;  %1882 = vset.pattern.permute.xlu2 %v3014_v10  ;;  %v1208_v14 = vpop.permute.xlu2 %1207  ;;  %v1197_v27 = vpop.permute.xlu0 %1196  ;;  %v2626_v10 = vld [vmem:[%s3012_s6 + $0xd0] sm:$0xff] }
 0x16f   : > { %1372 = vperm.xlu1 %1881, %v2574_v9   ;;  %1879 = vset.pattern.permute.xlu0 %v3015_v22  ;;  %v2631_v22 = vld [vmem:[%s3012_s6 + $0xd8] sm:$0xff] }
 0x170   : > { %1381 = vperm.xlu2 %1882, %v2574_v9   ;;  %1363 = vperm.xlu0 %1879, %v2574_v9  }
 0x171   : > { %v1128_v20 = vpop.permute.xlu1 %1127 }
 0x172   : > { %v1130_v1 = vmul.f32 %v1128_v20, %v1125_v54  ;;  %v3026_v54 = vmov 19   ;;  %v3027_v20 = vmov 17  }
 0x174   : > { %v1131_v59 = vadd.f32 %v1130_v1, %v1089_v40 }
 0x176   : > { %v2603_v32 = vpop.permute.xlu2 %1219  ;;  %v1226_v40 = vpop.permute.xlu0 %1225 }
 0x177   : > { %1883 = vset.pattern.permute.xlu1 %v3016_v62 }
 0x178   : > { %1390 = vperm.xlu1 %1883, %v2574_v9   ;;  %1884 = vset.pattern.permute.xlu2 %v3017_v25 }
 0x179   : > { %1880 = vset.pattern.permute.xlu0 %v3018_v19  ;;  %1399 = vperm.xlu2 %1884, %v2574_v9  }
 0x17a   : > { %v1146_v53 = vpop.permute.xlu1 %1145  ;;  %1355 = vperm.xlu0 %1880, %v2574_v9  }
 0x17b   : > { %v1148_v15 = vmul.f32 %v1146_v53, %v2461_v43  ;;  %v3028_v53 = vmov 16  }
 0x17d   : > { %v2564_v6 = vadd.f32 %v1148_v15, %v1120_v34  ;;  %v3025_v34 = vmov 14   ;;  %v2620_v15 = vld [vmem:[%s3012_s6 + $0xc8] sm:$0xff] }
 0x17e   : > { %v1237_v39 = vpop.permute.xlu2 %1236 }
 0x180   : > { %1886 = vset.pattern.permute.xlu1 %v3019_v58  ;;  %v3030_v58 = vmov 18  }
 0x181   : > { %1417 = vperm.xlu1 %1886, %v2574_v9   ;;  %1887 = vset.pattern.permute.xlu2 %v3020_v7 }
 0x182   : > { %1885 = vset.pattern.permute.xlu0 %v3021_v60  ;;  %1426 = vperm.xlu2 %1887, %v2574_v9  }
 0x183   : > { %v1157_v43 = vpop.permute.xlu1 %1156  ;;  %1408 = vperm.xlu0 %1885, %v2574_v9  }
 0x184   : > { %v1159_v3 = vmul.f32 %v1157_v43, %v1154_v63  ;;  %v1194_v63 = vmul.f32 %v2620_v15, %v1191_v17  ;;  %v1253_v43 = vpop.permute.xlu0 %1252  ;;  %v2637_v17 = vld [vmem:[%s3012_s6 + $0xf0] sm:$0xff] }
 0x185   : > { %3029 = vst [vmem:[#allocation6_spill] sm:$0xff] %v2637_v17 }
 0x186   : > { %v2583_v49 = vadd.f32 %v1159_v3, %v1131_v59  ;;  %v1248_v1 = vpop.permute.xlu2 %1247  ;;  %v1199_v19 = vmul.f32 %v1197_v27, %v1194_v63 }
 0x189   : > { %1888 = vset.pattern.permute.xlu1 %v3022_v38 }
 0x18a   : > { %1432 = vperm.xlu1 %1888, %v2574_v9   ;;  %1891 = vset.pattern.permute.xlu2 %v3023_v44 }
 0x18b   : > { %1889 = vset.pattern.permute.xlu0 %v3024_v47  ;;  %1459 = vperm.xlu2 %1891, %v2574_v9   ;;  %v1200_v47 = vadd.f32 %v1199_v19, %v2514_v5 }
 0x18c   : > { %v1174_v33 = vpop.permute.xlu1 %1173  ;;  %1441 = vperm.xlu0 %1889, %v2574_v9  }
 0x18d   : > { %v1176_v7 = vmul.f32 %v1174_v33, %v2472_v42  ;;  %v2654_v42 = vld [vmem:[%s3012_s6 + $0xe0] sm:$0xff] }
 0x18e   : > { %v1264_v3 = vpop.permute.xlu2 %1263 }
 0x18f   : > { %v1267_v38 = vmul.f32 %v2637_v17, %v1264_v3  ;;  %v2660_v3 = vld [vmem:[%s3012_s6 + $0xe8] sm:$0xff] }
 0x190   : > { %3032 = vst [vmem:[#allocation8_spill] sm:$0xff] %v2660_v3 }
 0x192   : > { %1890 = vset.pattern.permute.xlu1 %v3025_v34  ;;  %v1270_v34 = vpop.permute.xlu0 %1269 }
 0x193   : > { %1450 = vperm.xlu1 %1890, %v2574_v9   ;;  %1895 = vset.pattern.permute.xlu2 %v3026_v54  ;;  %v1177_v54 = vadd.f32 %v1176_v7, %v2537_v21 }
 0x194   : > { %1893 = vset.pattern.permute.xlu0 %v3027_v20 }
 0x195   : > { %v1186_v52 = vpop.permute.xlu1 %1185 }
 0x196   : > { %v1281_v27 = vpop.permute.xlu2 %1280  ;;  %v1188_v21 = vmul.f32 %v1186_v52, %v2455_v26 }
 0x198   : > { %v1189_v26 = vadd.f32 %v1188_v21, %v2583_v49  ;;  %v1041_v49 = vld [vmem:[%s2934_s13] sm:$0xff]  ;;  %v3035_v21 = vmov 22  }
 0x199   : > { %1721 = vmatmul.msk.f32.vlgmr.msra.gmra.mxu3 %vm800_vm1, %v1041_v49  ;;  %v1713_v49 = vld [vmem:[%s3012_s6 + $0x48] sm:$0xff] }
 0x19a   : > { %vm934_vm2 = vcmp.gt.f32.partialorder %v1713_v49, 0.5 }
 0x19b   : > { %1892 = vset.pattern.permute.xlu1 %v3028_v53  ;;  %v1228_v53 = vmul.f32 %v1226_v40, %v2351_v24 }
 0x19c   : > { %1468 = vperm.xlu1 %1892, %v2574_v9  }
 0x19d   : > { %v1202_v46 = vpop.permute.xlu1 %1201  ;;  %v1229_v63 = vadd.f32 %v1228_v53, %v1200_v47 }
 0x19e   : > { %v1205_v25 = vmul.f32 %v2626_v10, %v1202_v46  ;;  %v2647_v46 = vld [vmem:[%s3012_s6 + $0xf8] sm:$0xff] }
 0x19f   : > { %3031 = vst [vmem:[#allocation7_spill] sm:$0xff] %v2647_v46 }
 0x1a0   : > { %v1210_v44 = vmul.f32 %v1208_v14, %v1205_v25  ;;  %v1272_v14 = vmul.f32 %v1270_v34, %v1267_v38  ;;  %v1182_v25 = vmul.f32 %v2576_v51, %v2212_v31  ;;  %v2671_v38 = vld [vmem:[%s3012_s6 + $0x100] sm:$0xff]  ;;  %v1292_v34 = vpop.permute.xlu2 %1291  ;;  %v1222_v31 = vmul.f32 %v2603_v32, %v2468_v8 }
 0x1a1   : > { %3033 = vst [vmem:[#allocation9_spill] sm:$0xff] %v2671_v38  ;;  %v905_v8 = vld [vmem:[%s2932_s11] sm:$0xff] }
 0x1a2   : > { %v1211_v5 = vadd.f32 %v1210_v44, %v1177_v54  ;;  %v1273_v19 = vadd.f32 %v1272_v14, %v1229_v63  ;;  %v1183_v52 = vadd.f32 %v1182_v25, %v2564_v6  ;;  %v3034_v63 = vmov 20  }
 0x1a4   : > { %1894 = vset.pattern.permute.xlu1 %v3030_v58 }
 0x1a5   : > { %v1214_v23 = vpop.permute.xlu1 %1213 }
 0x1a6   : > { %v1216_v58 = vmul.f32 %v1214_v23, %v2500_v57 }
 0x1a8   : > { %v1217_v57 = vadd.f32 %v1216_v58, %v1183_v52 }
 0x1ad   : > { %v1231_v36 = vpop.permute.xlu1 %1230 }
 0x1ae   : > { %v1234_v60 = vmul.f32 %v2631_v22, %v1231_v36 }
 0x1b0   : > { %v1239_v20 = vmul.f32 %v1237_v39, %v1234_v60  ;;  %v1256_v60 = vmul.f32 %v2660_v3, %v1253_v43  ;;  %v1223_v43 = vadd.f32 %v1222_v31, %v1189_v26 }
 0x1b2   : > { %v1240_v39 = vadd.f32 %v1239_v20, %v1211_v5 }
 0x1b5   : > { %v1242_v59 = vpop.permute.xlu1 %1241 }
 0x1b6   : > { %v1245_v24 = vmul.f32 %v2654_v42, %v1242_v59 }
 0x1b8   : > { %v1250_v59 = vmul.f32 %v1248_v1, %v1245_v24 }
 0x1bd   : > { %v1259_v62 = vpop.permute.xlu1 %1258 }
 0x1be   : > { %v1261_v51 = vmul.f32 %v1259_v62, %v1256_v60  ;;  %v799_v62 = vld [vmem:[%s2929_s8] sm:$0xff] }
 0x1c0   : > { %v1262_v6 = vadd.f32 %v1261_v51, %v1223_v43  ;;  %v926_v32 = vpop.f32.mrf.mxu2  ;;  %v2723_v58 = vpop.permute.xlu2 %1347 }
 0x1c5   : > { %v1275_v33 = vpop.permute.xlu1 %1274 }
 0x1c6   : > { %v1278_v36 = vmul.f32 %v2647_v46, %v1275_v33  ;;  %v927_v33 = vadd.f32 %v926_v32, %v905_v8  ;;  %v1716_v8 = vld [vmem:[%s3012_s6 + $0x60] sm:$0xff] }
 0x1c7   : > { %vm952_vm6 = vcmp.gt.f32.partialorder %v1716_v8, 0.5 }
 0x1c8   : > { %v1283_v40 = vmul.f32 %v1281_v27, %v1278_v36  ;;  %v1251_v27 = vadd.f32 %v1250_v59, %v1217_v57 }
 0x1ca   : > { %v1284_v7 = vadd.f32 %v1283_v40, %v1240_v39 }
 0x1cc   : > { %v1297_v44 = vadd.f32 %v1284_v7, %v1273_v19 }
 0x1cd   : > { %v1286_v47 = vpop.permute.xlu1 %1285 }
 0x1ce   : > { %v1289_v23 = vmul.f32 %v2671_v38, %v1286_v47 }
 0x1d0   : > { %v1294_v54 = vmul.f32 %v1292_v34, %v1289_v23 }
 0x1d2   : > { %v1295_v1 = vadd.f32 %v1294_v54, %v1251_v27 }
 0x1d4   : > { %v1296_v20 = vadd.f32 %v1295_v1, %v1262_v6  ;;  %v1719_v6 = vld [vmem:[%s3012_s6 + $0x78] sm:$0xff] }
 0x1d5   : > { %vm973_vm3 = vcmp.gt.f32.partialorder %v1719_v6, 0.5 }
 0x1d6   : > { %v1298_v53 = vadd.f32 %v1297_v44, %v1296_v20  ;;  %v1718_v20 = vld [vmem:[%s3012_s6 + $0x70] sm:$0xff] }
 0x1d7   : > { %vm966_vm4 = vcmp.gt.f32.partialorder %v1718_v20, 0.5 }
 0x1d8   : > { %1319 = vmatpush.msrb.mxu1 %v1298_v53  ;;  %v2711_v24 = vpop.permute.xlu1 %1331  ;;  %v1717_v53 = vld [vmem:[%s3012_s6 + $0x68] sm:$0xff] }
 0x1d9   : > { %v2717_v25 = vpop.permute.xlu0 %1339  ;;  %vm959_vm5 = vcmp.gt.f32.partialorder %v1717_v53, 0.5 }
 0x1da   : > { %v821_v14 = vpop.f32.mrf.mxu1 }
 0x1db   : > { %v822_v5 = vadd.f32 %v821_v14, %v799_v62  ;;  %v1715_v62 = vld [vmem:[%s3012_s6 + $0x58] sm:$0xff]  ;;  %v1720_v14 = vld [vmem:[%s3012_s6 + $0x80] sm:$0xff] }
 0x1dc   : > { %vm946_vm7 = vcmp.gt.f32.partialorder %v1715_v62, 0.5  ;;  %vm980_vm9 = vcmp.gt.f32.partialorder %v1720_v14, 0.5 }
 0x1dd   : > { %v2689_v36 = vadd.f32 %v927_v33, %v822_v5  ;;  %v1714_v33 = vld [vmem:[%s3012_s6 + $0x50] sm:$0xff] }
 0x1de   : > { %vm940_vm8 = vcmp.gt.f32.partialorder %v1714_v33, 0.5 }
 0x1df   : > { %942 = vrot.lane.b32.xlu2 %v2689_v36, %s1975_s26  ;;  %936 = vrot.lane.b32.xlu1 %v2689_v36, %s1976_s30  ;;  %1574 = vst [vmem:[%s2693_s24] sm:$0xff] %v2689_v36  ;;  %s1981_s30 = smov 120   ;;  %s3046_s26 = smov 28  }
 0x1e0   : > { %930 = vrot.lane.b32.xlu0 %v2689_v36, %s1977_s2  ;;  %s3047_s2 = smov 30  }
 0x1e1   : > { %v2713_v39 = vpop.permute.xlu1 %1372 }
 0x1e2   : > { %v2721_v19 = vpop.permute.xlu0 %1363 }
 0x1e7   : > { %962 = vrot.lane.b32.xlu2 %v2689_v36, %s1978_s0  ;;  %955 = vrot.lane.b32.xlu1 %v2689_v36, %s1979_s25  ;;  %s3048_s0 = smov 12   ;;  %s3049_s25 = smov 20  }
 0x1e8   : > { %948 = vrot.lane.b32.xlu0 %v2689_v36, %s1980_s23  ;;  %s3050_s23 = smov 18  }
 0x1ea   : > { %v2715_v40 = vpop.permute.xlu1 %1390 }
 0x1ec   : > { %v2727_v60 = vpop.permute.xlu0 %1355 }
 0x1ef   : > { %1486 = vperm.xlu1 %1894, %v2574_v9   ;;  %1495 = vperm.xlu2 %1895, %v2574_v9  }
 0x1f0   : > { %969 = vrot.lane.b32.xlu0 %v2689_v36, %s1981_s30  ;;  %s3043_s30 = smov 32  }
 0x1f5   : > { %v2733_v52 = vpop.permute.xlu0 %1408 }
 0x1f7   : > { %1896 = vset.pattern.permute.xlu1 %v3034_v63  ;;  %1899 = vset.pattern.permute.xlu2 %v1971_v61  ;;  %v2719_v61 = vpop.permute.xlu1 %1417 }
 0x1f8   : > { %1504 = vperm.xlu1 %1896, %v2574_v9   ;;  %1477 = vperm.xlu0 %1893, %v2574_v9  }
 0x1fe   : > { %v2739_v47 = vpop.permute.xlu0 %1441 }
 0x1ff   : > { %v2725_v7 = vpop.permute.xlu1 %1432  ;;  %3039 = vst [vmem:[#allocation13_spill] sm:$0xff] %v2739_v47 }
 0x200   : > { %976 = vrot.lane.b32.xlu1 %v2689_v36, %s1982_s29  ;;  %1897 = vset.pattern.permute.xlu0 %v1969_v16  ;;  %3036 = vst [vmem:[#allocation10_spill] sm:$0xff] %v2725_v7  ;;  %v2729_v16 = vpop.permute.xlu2 %1381  ;;  %s3044_s29 = smov 34  }
 0x201   : > { %1898 = vset.pattern.permute.xlu1 %v3035_v21 }
 0x207   : > { %v2731_v26 = vpop.permute.xlu1 %1450 }
 0x208   : > { %3037 = vst [vmem:[#allocation11_spill] sm:$0xff] %v2731_v26  ;;  %v2735_v59 = vpop.permute.xlu2 %1399 }
 0x20f   : > { %v2737_v44 = vpop.permute.xlu1 %1468 }
 0x210   : > { %3038 = vst [vmem:[#allocation12_spill] sm:$0xff] %v2737_v44  ;;  %v2741_v34 = vpop.permute.xlu2 %1426 }
 0x218   : > { %v2743_v23 = vpop.permute.xlu2 %1459 }
 0x21c   : > { %v1063_v53 = vpop.f32.mrf.mxu3 }
 0x239   : > { %v943_v54 = vpop.permute.xlu2 %942 }
 0x23a   : > { %v947_v17 = vsel %vm946_vm7, %v943_v54, -inf }
 0x241   : > { %v963_v5 = vpop.permute.xlu2 %962 }
 0x242   : > { %v967_v49 = vsel %vm966_vm4, %v963_v5, -inf }
 0x243   : > { %v968_v8 = vmax.f32 %v947_v17, %v967_v49 }
 0x249   : > { %v2835_v17 = vpop.permute.xlu2 %1495 }
 0x24a   : > { %3068 = vst [vmem:[#allocation17_spill] sm:$0xff] %v2835_v17 }
 0x251   : > { %v937_v31 = vpop.permute.xlu1 %936 }
 0x252   : > { %v931_v57 = vpop.permute.xlu0 %930  ;;  %v941_v47 = vsel %vm940_vm8, %v937_v31, -inf }
 0x253   : > { %v935_v63 = vsel %vm934_vm2, %v931_v57, -inf  ;;  %v1042_v57 = vld [vmem:[%s2935_s14] sm:$0xff] }
 0x254   : > { %v954_v38 = vmax.f32 %v935_v63, %v2689_v36 }
 0x259   : > { %v956_v51 = vpop.permute.xlu1 %955 }
 0x25a   : > { %v949_v27 = vpop.permute.xlu0 %948  ;;  %v960_v6 = vsel %vm959_vm5, %v956_v51, -inf }
 0x25b   : > { %v953_v55 = vsel %vm952_vm6, %v949_v27, -inf  ;;  %v1064_v27 = vadd.f32 %v1063_v53, %v1042_v57 }
 0x261   : > { %v2745_v43 = vpop.permute.xlu1 %1486 }
 0x262   : > { %3040 = vst [vmem:[#allocation14_spill] sm:$0xff] %v2745_v43  ;;  %v970_v32 = vpop.permute.xlu0 %969 }
 0x263   : > { %v974_v21 = vsel %vm973_vm3, %v970_v32, -inf  ;;  %v961_v32 = vmax.f32 %v941_v47, %v960_v6 }
 0x264   : > { %v975_v43 = vmax.f32 %v953_v55, %v974_v21 }
 0x266   : > { %v984_v33 = vmax.f32 %v968_v8, %v975_v43 }
 0x26a   : > { %v2753_v1 = vpop.permute.xlu1 %1504  ;;  %v2838_v21 = vpop.permute.xlu0 %1477 }
 0x26b   : > { %3041 = vst [vmem:[#allocation15_spill] sm:$0xff] %v2753_v1 }
 0x26c   : > { %3069 = vst [vmem:[#allocation18_spill] sm:$0xff] %v2838_v21 }
 0x272   : > { %v977_v1 = vpop.permute.xlu1 %976 }
 0x273   : > { %v981_v20 = vsel %vm980_vm9, %v977_v1, -inf }
 0x274   : > { %v982_v62 = vmax.f32 %v954_v38, %v981_v20 }
 0x276   : > { %v983_v51 = vmax.f32 %v982_v62, %v961_v32 }
 0x278   : > { %v985_v14 = vmax.f32 %v983_v51, %v984_v33 }
 0x27a   : > { %v1066_v36 = vadd.f32 %v1064_v27, %v985_v14 }
 0x27c   : > { %v1067_v55 = vadd.f32 %v1066_v36, %v2209_v30  ;;  %v2778_v5 = vmax.f32 %v1066_v36, 0.0  ;;  %1575 = vst [vmem:[%s2693_s24 + $0x8] sm:$0xff] %v1066_v36  ;;  %v3062_v30 = vmov 24  }
 0x27e   : > { %3042 = vst [vmem:[#allocation16_spill] sm:$0xff] %v2778_v5  ;;  %1343 = vrot.lane.b32.xlu1 %v2778_v5, %s3043_s30  ;;  %1335 = vrot.lane.b32.xlu2 %v2778_v5, %s3044_s29  ;;  %s3053_s30 = smov 14   ;;  %s3054_s29 = smov 110  }
 0x27f   : > { %1576 = vst [vmem:[%s2693_s24 + $0x10] sm:$0xff] %v1067_v55  ;;  %1326 = vrot.lane.b32.xlu0 %v2778_v5, %s3045_s28  ;;  %s3055_s28 = smov 4   ;;  %v1299_v55 = vld [vmem:[%s2937_s16] sm:$0xff] }
 0x280   : > { %1738 = vmatmul.msk.f32.vlgmr.msrb.gmra.mxu1 %vm800_vm1, %v1299_v55 }
 0x286   : > { %1359 = vrot.lane.b32.xlu1 %v2778_v5, %s3046_s26  ;;  %1351 = vrot.lane.b32.xlu2 %v2778_v5, %s3047_s2  ;;  %s3056_s26 = smov 2   ;;  %s3057_s2 = smov 96  }
 0x287   : > { %1404 = vrot.lane.b32.xlu0 %v2778_v5, %s3048_s0  ;;  %s3058_s0 = smov 116  }
 0x28e   : > { %1368 = vrot.lane.b32.xlu1 %v2778_v5, %s3049_s25  ;;  %1377 = vrot.lane.b32.xlu2 %v2778_v5, %s3050_s23  ;;  %s3059_s25 = smov 126   ;;  %s3060_s23 = smov 108  }
 0x28f   : > { %1446 = vrot.lane.b32.xlu0 %v2778_v5, %s3051_s5  ;;  %s3061_s5 = smov 114  }
 0x296   : > { %1386 = vrot.lane.b32.xlu1 %v2778_v5, %s3052_s1  ;;  %1395 = vrot.lane.b32.xlu2 %v2778_v5, %s3053_s30  ;;  %s3063_s1 = smov 112   ;;  %s3064_s30 = smov 94  }
 0x297   : > { %1482 = vrot.lane.b32.xlu0 %v2778_v5, %s3054_s29  ;;  %s3065_s29 = smov 100  }
 0x29e   : > { %1413 = vrot.lane.b32.xlu1 %v2778_v5, %s3055_s28  ;;  %1422 = vrot.lane.b32.xlu2 %v2778_v5, %s3056_s26  ;;  %s3066_s28 = smov 98   ;;  %s3067_s26 = smov 92  }
 0x29f   : > { %1518 = vrot.lane.b32.xlu0 %v2778_v5, %s3057_s2 }
 0x2a6   : > { %1455 = vrot.lane.b32.xlu1 %v2778_v5, %s3058_s0  ;;  %1437 = vrot.lane.b32.xlu2 %v2778_v5, %s3059_s25 }
 0x2a7   : > { %1513 = vperm.xlu0 %1897, %v2574_v9  }
 0x2ae   : > { %1491 = vrot.lane.b32.xlu1 %v2778_v5, %s3060_s23  ;;  %1464 = vrot.lane.b32.xlu2 %v2778_v5, %s3061_s5 }
 0x2af   : > { %1901 = vset.pattern.permute.xlu0 %v3062_v30 }
 0x2b6   : > { %1522 = vperm.xlu1 %1898, %v2574_v9   ;;  %1473 = vrot.lane.b32.xlu2 %v2778_v5, %s3063_s1 }
 0x2be   : > { %1527 = vrot.lane.b32.xlu1 %v2778_v5, %s3064_s30  ;;  %1500 = vrot.lane.b32.xlu2 %v2778_v5, %s3065_s29 }
 0x2bf   : > { %1900 = vset.pattern.permute.xlu1 %v3062_v30 }
 0x2c6   : > { %1540 = vperm.xlu1 %1900, %v2574_v9   ;;  %1509 = vrot.lane.b32.xlu2 %v2778_v5, %s3066_s28  ;;  %s1741_s28 = sshll.u32 (%p2118_p4), %s2106_s27, 3 }
 0x2c7   : > { %s1586_s0 = scalar_lea.vmem (%p2118_p4), %s2942_s21, %s1741_s28 }
 0x2ce   : > { %1536 = vrot.lane.b32.xlu2 %v2778_v5, %s3067_s26 }
 0x2d6   : > { %1531 = vperm.xlu2 %1899, %v2574_v9  }
 0x2d8   : > { %v1336_v38 = vpop.permute.xlu2 %1335 }
 0x2d9   : > { %v1337_v12 = vmul.f32 %v2549_v11, %v1336_v38 }
 0x2e0   : > { %v1352_v47 = vpop.permute.xlu2 %1351 }
 0x2e1   : > { %v1353_v46 = vmul.f32 %v2527_v18, %v1352_v47 }
 0x2e8   : > { %v1378_v31 = vpop.permute.xlu2 %1377 }
 0x2e9   : > { %v1379_v44 = vmul.f32 %v1378_v31, %v2348_v13  ;;  %v3072_v31 = vld [vmem:[#allocation10_spill] sm:$0xff] }
 0x2eb   : > { %v1384_v38 = vmul.f32 %v2729_v16, %v1379_v44  ;;  %v3070_v44 = vld [vmem:[#allocation7_spill] sm:$0xff] }
 0x2f0   : > { %v1344_v43 = vpop.permute.xlu1 %1343  ;;  %v1396_v54 = vpop.permute.xlu2 %1395 }
 0x2f1   : > { %v1327_v20 = vpop.permute.xlu0 %1326  ;;  %v1345_v21 = vmul.f32 %v2442_v35, %v1344_v43  ;;  %v1397_v35 = vmul.f32 %v2383_v48, %v1396_v54 }
 0x2f2   : > { %v1328_v3 = vmul.f32 %v2535_v41, %v1327_v20  ;;  %v3077_v20 = vld [vmem:[#allocation8_spill] sm:$0xff] }
 0x2f4   : > { %v1334_v41 = vmul.f32 %v2711_v24, %v1328_v3 }
 0x2f8   : > { %v1360_v1 = vpop.permute.xlu1 %1359  ;;  %v1423_v63 = vpop.permute.xlu2 %1422 }
 0x2f9   : > { %v1405_v8 = vpop.permute.xlu0 %1404  ;;  %v1361_v30 = vmul.f32 %v2542_v2, %v1360_v1  ;;  %v1350_v2 = vmul.f32 %v2723_v58, %v1345_v21  ;;  %v1424_v11 = vmul.f32 %v2378_v37, %v1423_v63  ;;  %v1358_v58 = vmul.f32 %v2727_v60, %v1353_v46  ;;  %v3074_v1 = vld [vmem:[#allocation5_spill] sm:$0xff] }
 0x2fb   : > { %v1366_v7 = vmul.f32 %v2721_v19, %v1361_v30  ;;  %v1342_v19 = vmul.f32 %v2717_v25, %v1337_v12  ;;  %v1385_v24 = vadd.f32 %v1384_v38, %v1350_v2  ;;  %v1429_v12 = vmul.f32 %v2741_v34, %v1424_v11 }
 0x2fd   : > { %v1367_v18 = vadd.f32 %v1366_v7, %v1334_v41  ;;  %v3082_v41 = vld [vmem:[#allocation14_spill] sm:$0xff] }
 0x300   : > { %v1369_v49 = vpop.permute.xlu1 %1368  ;;  %v1438_v6 = vpop.permute.xlu2 %1437 }
 0x301   : > { %v1447_v33 = vpop.permute.xlu0 %1446  ;;  %v1370_v17 = vmul.f32 %v2556_v45, %v1369_v49  ;;  %v3076_v49 = vld [vmem:[#allocation17_spill] sm:$0xff] }
 0x302   : > { %v1448_v25 = vmul.f32 %v2620_v15, %v1447_v33  ;;  %v3071_v15 = vld [vmem:[#allocation16_spill] sm:$0xff] }
 0x303   : > { %v1375_v45 = vmul.f32 %v2713_v39, %v1370_v17  ;;  %v1402_v39 = vmul.f32 %v2735_v59, %v1397_v35  ;;  %v1435_v43 = vmul.f32 %v3072_v31, %v3071_v15 }
 0x305   : > { %v1376_v37 = vadd.f32 %v1375_v45, %v1342_v19  ;;  %v1403_v16 = vadd.f32 %v1402_v39, %v1367_v18 }
 0x308   : > { %v1387_v57 = vpop.permute.xlu1 %1386  ;;  %v1465_v53 = vpop.permute.xlu2 %1464 }
 0x309   : > { %v1483_v36 = vpop.permute.xlu0 %1482  ;;  %v1388_v26 = vmul.f32 %v2388_v50, %v1387_v57  ;;  %v3078_v57 = vld [vmem:[#allocation13_spill] sm:$0xff] }
 0x30b   : > { %v1393_v13 = vmul.f32 %v2715_v40, %v1388_v26  ;;  %v1466_v40 = vmul.f32 %v2404_v0, %v1465_v53  ;;  %v1436_v53 = vadd.f32 %v1435_v43, %v1403_v16 }
 0x30d   : > { %v1394_v7 = vadd.f32 %v1393_v13, %v1358_v58 }
 0x310   : > { %v1414_v32 = vpop.permute.xlu1 %1413  ;;  %v1474_v62 = vpop.permute.xlu2 %1473 }
 0x311   : > { %v1415_v55 = vmul.f32 %v2487_v29, %v1414_v32  ;;  %v1406_v29 = vmul.f32 %v2569_v28, %v1405_v8  ;;  %v1519_v47 = vpop.permute.xlu0 %1518  ;;  %v3079_v8 = vld [vmem:[#allocation18_spill] sm:$0xff] }
 0x313   : > { %v1420_v48 = vmul.f32 %v2719_v61, %v1415_v55  ;;  %v1411_v46 = vmul.f32 %v2733_v52, %v1406_v29  ;;  %v1439_v61 = vmul.f32 %v2396_v4, %v1438_v6  ;;  %v1484_v52 = vmul.f32 %v3074_v1, %v1483_v36  ;;  %v3075_v4 = vld [vmem:[#allocation11_spill] sm:$0xff] }
 0x314   : > { %v1453_v21 = vmul.f32 %v3075_v4, %v1448_v25 }
 0x315   : > { %v1421_v26 = vadd.f32 %v1420_v48, %v1385_v24  ;;  %v1412_v17 = vadd.f32 %v1411_v46, %v1376_v37  ;;  %v1489_v45 = vmul.f32 %v3082_v41, %v1484_v52 }
 0x317   : > { %v1454_v36 = vadd.f32 %v1453_v21, %v1421_v26  ;;  %v1623_v26 = vld [vmem:[%s2693_s24 + $0x8] sm:$0xff] (%p2118_p4) }
 0x318   : > { %v1456_v51 = vpop.permute.xlu1 %1455  ;;  %v1501_v9 = vpop.permute.xlu2 %1500  ;;  %1624 = vst [vmem:[%s1586_s0 + $0x10] sm:$0xff] (%p2118_p4), %v1623_v26 }
 0x319   : > { %v1457_v3 = vmul.f32 %v2626_v10, %v1456_v51  ;;  %v1475_v10 = vmul.f32 %v2372_v56, %v1474_v62  ;;  %v1502_v0 = vmul.f32 %v2654_v42, %v1501_v9  ;;  %v1430_v56 = vadd.f32 %v1429_v12, %v1394_v7  ;;  %v3080_v62 = vld [vmem:[#allocation6_spill] sm:$0xff]  ;;  %v1514_v51 = vpop.permute.xlu0 %1513  ;;  %v1321_v7 = vpop.f32.mrf.mxu1 }
 0x31a   : > { %v1444_v42 = vmul.f32 %v3078_v57, %v1439_v61  ;;  %v1520_v33 = vmul.f32 %v3080_v62, %v1519_v47  ;;  %v1490_v58 = vadd.f32 %v1489_v45, %v1454_v36 }
 0x31b   : > { %v1462_v59 = vmul.f32 %v2743_v23, %v1457_v3  ;;  %v1480_v32 = vmul.f32 %v3079_v8, %v1475_v10 }
 0x31c   : > { %v1445_v2 = vadd.f32 %v1444_v42, %v1412_v17 }
 0x31d   : > { %v1463_v9 = vadd.f32 %v1462_v59, %v1430_v56  ;;  %v1625_v59 = vld [vmem:[%s2693_s24 + $0x10] sm:$0xff] (%p2118_p4) }
 0x31e   : > { %v1481_v18 = vadd.f32 %v1480_v32, %v1445_v2  ;;  %1626 = vst [vmem:[%s1586_s0 + $0x20] sm:$0xff] (%p2118_p4), %v1625_v59 }
 0x320   : > { %v1492_v27 = vpop.permute.xlu1 %1491  ;;  %v1510_v14 = vpop.permute.xlu2 %1509 }
 0x321   : > { %v1493_v28 = vmul.f32 %v2631_v22, %v1492_v27  ;;  %v3073_v22 = vld [vmem:[#allocation12_spill] sm:$0xff]  ;;  %v1511_v23 = vmul.f32 %v3077_v20, %v1510_v14  ;;  %v3081_v27 = vld [vmem:[#allocation15_spill] sm:$0xff]  ;;  %v3083_v14 = vld [vmem:[#allocation9_spill] sm:$0xff] }
 0x322   : > { %v1471_v54 = vmul.f32 %v3073_v22, %v1466_v40  ;;  %v1507_v30 = vmul.f32 %v3081_v27, %v1502_v0 }
 0x323   : > { %v1498_v6 = vmul.f32 %v3076_v49, %v1493_v28  ;;  %v1516_v11 = vmul.f32 %v1514_v51, %v1511_v23  ;;  %v1549_v28 = vld [vmem:[%s2941_s20] sm:$0xff] }
 0x324   : > { %v1472_v35 = vadd.f32 %v1471_v54, %v1436_v53 }
 0x325   : > { %v1499_v38 = vadd.f32 %v1498_v6, %v1463_v9  ;;  %v1517_v24 = vadd.f32 %v1516_v11, %v1481_v18 }
 0x326   : > { %v1508_v47 = vadd.f32 %v1507_v30, %v1472_v35 }
 0x328   : > { %v1523_v5 = vpop.permute.xlu1 %1522  ;;  %v1537_v50 = vpop.permute.xlu2 %1536 }
 0x329   : > { %v1525_v13 = vmul.f32 %v1523_v5, %v1520_v33  ;;  %v1538_v19 = vmul.f32 %v3083_v14, %v1537_v50  ;;  %v1548_v5 = vld [vmem:[%s2940_s19] sm:$0xff] }
 0x32a   : > { %v1300_v50 = vld [vmem:[%s2938_s17] sm:$0xff] }
 0x32b   : > { %v1526_v39 = vadd.f32 %v1525_v13, %v1490_v58  ;;  %v1322_v16 = vadd.f32 %v1321_v7, %v1300_v50 }
 0x330   : > { %v1528_v60 = vpop.permute.xlu1 %1527  ;;  %v1532_v63 = vpop.permute.xlu2 %1531 }
 0x331   : > { %v1529_v34 = vmul.f32 %v3070_v44, %v1528_v60  ;;  %v1621_v60 = vld [vmem:[%s2693_s24] sm:$0xff] (%p2118_p4) }
 0x332   : > { %1622 = vst [vmem:[%s1586_s0] sm:$0xff] (%p2118_p4), %v1621_v60 }
 0x333   : > { %v1534_v55 = vmul.f32 %v1532_v63, %v1529_v34 }
 0x335   : > { %v1535_v48 = vadd.f32 %v1534_v55, %v1499_v38 }
 0x337   : > { %v1546_v12 = vadd.f32 %v1535_v48, %v1526_v39 }
 0x338   : > { %v1541_v29 = vpop.permute.xlu1 %1540 }
 0x339   : > { %v1543_v3 = vmul.f32 %v1541_v29, %v1538_v19 }
 0x33b   : > { %v1544_v37 = vadd.f32 %v1543_v3, %v1508_v47 }
 0x33d   : > { %v1545_v40 = vadd.f32 %v1544_v37, %v1517_v24 }
 0x33f   : > { %v1547_v25 = vadd.f32 %v1546_v12, %v1545_v40 }
 0x341   : > { %1568 = vmatpush.msrb.mxu2 %v1547_v25 }
 0x342   : > { %1739 = vmatmul.msk.f32.vlgmr.msrb.gmra.mxu2 %vm800_vm1, %v1548_v5 }
 0x3c5   : > { %v1570_v46 = vpop.f32.mrf.mxu2 }
 0x3c6   : > { %v1571_v61 = vadd.f32 %v1570_v46, %v1549_v28  ;;  %1584 = sbr.rel (!%p2118_p4) target bundleno = 979 (0x3d3), region = 108 }
 0x3c8   : > { %v1573_v10 = vadd.f32 %v1571_v61, %v1322_v16 }
 0x3ca   : > { %1577 = vst [vmem:[%s2693_s24 + $0x18] sm:$0xff] %v1573_v10 }
 0x3d1   : > { %v1627_v0 = vld [vmem:[%s2693_s24 + $0x18] sm:$0xff] }
 0x3d2   : > { %1628 = vst [vmem:[%s1586_s0 + $0x30] sm:$0xff] %v1627_v0 }
 0x3d3 PF: > { %s3084_s2 = sld [smem:[#allocation3_spill]]  ;;  %p28_p8 = scmp.ge.s32.totalorder %s2108_s3, 4  }
 0x3d4   : > { %s3085_s25 = sld [smem:[#allocation4_spill]]  ;;  %s3086_s26 = smov %s2108_s3 }
 0x3d5   :  { %30 = sbr.rel (!%p28_p8) target bundleno = 9 (0x9), region = 206 }

</bundles_post_ra>
